<compile_context>
chip_gen: v6e
topology: v6e:2x2x1
jax: 0.10.0
libtpu: 0.0.40
codegen_flags: <defaults>
</compile_context>

<pallas_src>
import functools
import math

import jax
import jax.numpy as jnp
from jax.experimental import pallas as pl
from jax.experimental.pallas import tpu as pltpu


# ----------------------------------------------------------------------------
# Fused GEMM + BatchNorm(affine) + (residual) + ReLU kernel
# Single K step: dot + epilogue written straight to the output block (no scratch).
# ----------------------------------------------------------------------------
def _mm_kernel(a_ref, b_ref, s_ref, c_ref, *rest, activation, has_residual):
    if has_residual:
        r_ref, o_ref = rest
    else:
        r_ref = None
        (o_ref,) = rest
    acc = jnp.dot(a_ref[...], b_ref[...], preferred_element_type=jnp.float32)
    y = acc * s_ref[...] + c_ref[...]
    if has_residual:
        y = y + r_ref[...].astype(jnp.float32)
    if activation == "relu":
        y = jnp.maximum(y, 0.0)
    o_ref[...] = y.astype(o_ref.dtype)


def _pick_tm(M):
    # Largest multiple-of-8 divisor of M that is <= 1568 and leaves >= 2 blocks;
    # otherwise fall back to the full extent (always a legal block shape).
    if M % 8 != 0 or M <= 784:
        return M
    cap = min(M // 2, 1568)
    best = 8
    for t in range(8, cap + 1, 8):
        if M % t == 0:
            best = t
    return best


def _pick_tiles(M, N):
    tm = _pick_tm(M)
    gm = M // tm
    if N > 256 and N % 256 == 0:
        tn = 256                       # keeps >= 2 parallel j-blocks (v7x: 2 TCs)
    elif N == 256 and gm < 2:
        tn = 128                       # split N when M gives only one block
    else:
        tn = N                         # full-extent block: no lane padding of B/out
    return tm, tn


@functools.lru_cache(maxsize=None)
def _build_matmul_call(M, K, N, has_residual, activation, out_dtype, tm, tn):
    grid = (M // tm, N // tn)
    in_specs = [
        pl.BlockSpec((tm, K), lambda i, j: (i, 0)),
        pl.BlockSpec((K, tn), lambda i, j: (0, j)),
        pl.BlockSpec((1, tn), lambda i, j: (0, j)),
        pl.BlockSpec((1, tn), lambda i, j: (0, j)),
    ]
    if has_residual:
        in_specs.append(pl.BlockSpec((tm, tn), lambda i, j: (i, j)))
    kernel = functools.partial(_mm_kernel, activation=activation,
                               has_residual=has_residual)
    call = pl.pallas_call(
        kernel,
        out_shape=jax.ShapeDtypeStruct((M, N), out_dtype),
        grid=grid,
        in_specs=in_specs,
        out_specs=pl.BlockSpec((tm, tn), lambda i, j: (i, j)),
        compiler_params=pltpu.CompilerParams(
            dimension_semantics=("parallel", "parallel"),
            # worst-case double-buffered working set is ~8 MiB; 32 MiB is safe on
            # v5e/v6e/v7x (v7x physical VMEM is 64 MiB).
            vmem_limit_bytes=32 * 1024 * 1024),
    )
    return jax.jit(call)


def matmul_bn_act(a, b, scale, bias, residual=None, activation="none",
                  out_dtype=jnp.bfloat16):
    """out = act((a @ b) * scale + bias [+ residual]); bf16 operands, f32 accum."""
    M, K = a.shape
    Kb, N = b.shape
    assert K == Kb
    tm, tn = _pick_tiles(M, N)
    args = [a, b, scale, bias]
    if residual is not None:
        args.append(residual)
    call = _build_matmul_call(M, K, N, residual is not None, activation,
                              out_dtype, tm, tn)
    return call(*args)


# ----------------------------------------------------------------------------
# Convolution = im2col (bf16 glue) + fused Pallas GEMM
# ----------------------------------------------------------------------------
def _im2col(x, kh, kw, stride, pad):
    N, H, W, C = x.shape
    if pad > 0:
        x = jnp.pad(x, ((0, 0), (pad, pad), (pad, pad), (0, 0)))
    Ho = (H + 2 * pad - kh) // stride + 1
    Wo = (W + 2 * pad - kw) // stride + 1
    cols = []
    for i in range(kh):
        for j in range(kw):
            cols.append(x[:, i:i + stride * (Ho - 1) + 1:stride,
                          j:j + stride * (Wo - 1) + 1:stride, :])
    patches = cols[0] if len(cols) == 1 else jnp.concatenate(cols, axis=-1)
    return patches.reshape(N * Ho * Wo, kh * kw * C), Ho, Wo


def conv_bn(x, wp, kh, kw, stride, pad, activation="none", residual=None):
    patches, Ho, Wo = _im2col(x, kh, kw, stride, pad)
    cout = wp['w'].shape[1]
    res = None if residual is None else residual.reshape(-1, cout)
    out = matmul_bn_act(patches, wp['w'], wp['scale'], wp['bias'],
                        residual=res, activation=activation,
                        out_dtype=jnp.bfloat16)
    return out.reshape(x.shape[0], Ho, Wo, cout)


# ----------------------------------------------------------------------------
# 3x3, stride-2, pad-1 max-pool: 9 bf16 taps, lane-dense (…, 128) Pallas max.
# ----------------------------------------------------------------------------
def _maxpool_kernel(x_ref, o_ref):
    m = x_ref[0, 0]
    for t in range(1, 9):
        m = jnp.maximum(m, x_ref[0, t])
    o_ref[0] = m


def maxpool_3x3_s2_p1(x):
    N, H, W, C = x.shape
    Ho = (H + 2 - 3) // 2 + 1
    Wo = (W + 2 - 3) // 2 + 1
    pad_val = float(jnp.finfo(x.dtype).min)
    xp = jnp.pad(x, ((0, 0), (1, 1), (1, 1), (0, 0)), constant_values=pad_val)
    taps = [xp[:, i:i + 2 * (Ho - 1) + 1:2, j:j + 2 * (Wo - 1) + 1:2, :]
            for i in range(3) for j in range(3)]
    total = Ho * Wo * C
    if total % 128 == 0:
        rows, lanes = total // 128, 128      # lane-dense view (elementwise max)
    else:
        rows, lanes = Ho * Wo, C
    stacked = jnp.stack(taps, axis=1).reshape(N, 9, rows, lanes)
    out = pl.pallas_call(
        _maxpool_kernel,
        out_shape=jax.ShapeDtypeStruct((N, rows, lanes), x.dtype),
        grid=(N,),
        in_specs=[pl.BlockSpec((1, 9, rows, lanes), lambda n: (n, 0, 0, 0))],
        out_specs=pl.BlockSpec((1, rows, lanes), lambda n: (n, 0, 0)),
    )(stacked)
    return out.reshape(N, Ho, Wo, C)


# ----------------------------------------------------------------------------
# Attention head: avgpool -> Linear(512,128) -> ReLU -> Linear(128,49)
#                 -> Softmax(dim=1) -> weighted sum over the 7x7 spatial grid.
# Whole batch in a single Pallas call.
# ----------------------------------------------------------------------------
def _attention_kernel(x_ref, w1_ref, b1_ref, w2_ref, b2_ref, o_ref):
    x = x_ref[...].astype(jnp.float32)                       # (B, 49, 512)
    pooled = jnp.mean(x, axis=1)                             # AdaptiveAvgPool + flatten
    h = jnp.dot(pooled, w1_ref[...], preferred_element_type=jnp.float32) + b1_ref[...]
    h = jnp.maximum(h, 0.0)                                  # (B, 128)
    logits = jnp.dot(h, w2_ref[...], preferred_element_type=jnp.float32) + b2_ref[...]
    logits = logits - jnp.max(logits, axis=-1, keepdims=True)
    e = jnp.exp(logits)
    w = e * pl.reciprocal(jnp.sum(e, axis=-1, keepdims=True), approx=False)  # (B, 49)
    # (x * w_expanded).sum over the spatial axis
    o_ref[...] = jnp.sum(x * jnp.expand_dims(w, -1), axis=1)                 # (B, 512)


def attention_head(x_nhwc, att):
    B, H, W, C = x_nhwc.shape
    S = H * W
    x_flat = x_nhwc.reshape(B, S, C)
    return pl.pallas_call(
        _attention_kernel,
        out_shape=jax.ShapeDtypeStruct((B, C), jnp.float32),
        grid=(1,),
        in_specs=[
            pl.BlockSpec((B, S, C), lambda i: (0, 0, 0)),
            pl.BlockSpec(att['w1'].shape, lambda i: (0, 0)),
            pl.BlockSpec(att['b1'].shape, lambda i: (0, 0)),
            pl.BlockSpec(att['w2'].shape, lambda i: (0, 0)),
            pl.BlockSpec(att['b2'].shape, lambda i: (0, 0)),
        ],
        out_specs=pl.BlockSpec((B, C), lambda i: (0, 0)),
    )(x_flat, att['w1'], att['b1'], att['w2'], att['b2'])


# ----------------------------------------------------------------------------
# Full S2CNN forward (ResNet-18 backbone, custom first conv, attention head)
# ----------------------------------------------------------------------------
def s2cnn_forward(params, x_nchw, attention=True):
    x = jnp.transpose(x_nchw, (0, 2, 3, 1)).astype(jnp.bfloat16)   # NCHW -> NHWC bf16
    x = conv_bn(x, params['conv1'], 7, 7, stride=2, pad=3, activation='relu')
    x = maxpool_3x3_s2_p1(x)
    for name in ('layer1', 'layer2', 'layer3', 'layer4'):
        for bi, blk in enumerate(params[name]):
            stride = 2 if (name != 'layer1' and bi == 0) else 1
            identity = x
            out = conv_bn(x, blk['conv1'], 3, 3, stride=stride, pad=1,
                          activation='relu')
            if 'down' in blk:
                identity = conv_bn(x, blk['down'], 1, 1, stride=stride, pad=0,
                                   activation='none')
            # second conv: BN + residual add + ReLU fused into the GEMM epilogue
            x = conv_bn(out, blk['conv2'], 3, 3, stride=1, pad=1,
                        activation='relu', residual=identity)
    if attention:
        return attention_head(x, params['att'])               # [bs, 512] f32
    return jnp.mean(x.astype(jnp.float32), axis=(1, 2))       # avgpool path [bs, 512]


# ----------------------------------------------------------------------------
# One-time parameter preparation: OIHW -> (kh*kw*Cin, Cout) bf16, BN folded.
# ----------------------------------------------------------------------------
def _fold_bn(bn, eps=1e-5):
    scale = bn['gamma'] * jax.lax.rsqrt(bn['var'] + eps)
    bias = bn['beta'] - bn['mean'] * scale
    return scale, bias


def _prep_conv(w_oihw, bn):
    cout, cin, kh, kw = w_oihw.shape
    w_mat = jnp.transpose(w_oihw, (2, 3, 1, 0)).reshape(kh * kw * cin, cout)
    scale, bias = _fold_bn(bn)
    return dict(w=w_mat.astype(jnp.bfloat16),
                scale=scale.reshape(1, cout).astype(jnp.float32),
                bias=bias.reshape(1, cout).astype(jnp.float32))


def prepare_params(raw):
    p = {'conv1': _prep_conv(raw['conv1'], raw['bn1'])}
    for name in ('layer1', 'layer2', 'layer3', 'layer4'):
        blocks = []
        for blk in raw[name]:
            nb = dict(conv1=_prep_conv(blk['conv1'], blk['bn1']),
                      conv2=_prep_conv(blk['conv2'], blk['bn2']))
            if 'down_conv' in blk:
                nb['down'] = _prep_conv(blk['down_conv'], blk['down_bn'])
            blocks.append(nb)
        p[name] = blocks
    p['att'] = {k: v.astype(jnp.float32) for k, v in raw['att'].items()}
    return p


# ----------------------------------------------------------------------------
# Deterministic synthetic parameters (shapes match resnet18 + attention block)
# ----------------------------------------------------------------------------
def _conv_w(key, cout, cin, kh, kw):
    return jax.random.normal(key, (cout, cin, kh, kw), jnp.float32) / math.sqrt(cin * kh * kw)


def _bn_p(key, c):
    k1, k2, k3, k4 = jax.random.split(key, 4)
    return dict(
        gamma=1.0 + 0.1 * jax.random.normal(k1, (c,), jnp.float32),
        beta=0.1 * jax.random.normal(k2, (c,), jnp.float32),
        mean=0.1 * jax.random.normal(k3, (c,), jnp.float32),
        var=jax.random.uniform(k4, (c,), jnp.float32, 0.5, 1.5),
    )


def make_params(key, in_ch):
    keys = iter(jax.random.split(key, 128))
    p = {'conv1': _conv_w(next(keys), 64, in_ch, 7, 7),
         'bn1': _bn_p(next(keys), 64)}
    cfg = [('layer1', 64, 64, 1), ('layer2', 64, 128, 2),
           ('layer3', 128, 256, 2), ('layer4', 256, 512, 2)]
    for name, cin, cout, stride in cfg:
        blocks = []
        for bi in range(2):
            s = stride if bi == 0 else 1
            c_in = cin if bi == 0 else cout
            blk = dict(
                conv1=_conv_w(next(keys), cout, c_in, 3, 3),
                bn1=_bn_p(next(keys), cout),
                conv2=_conv_w(next(keys), cout, cout, 3, 3),
                bn2=_bn_p(next(keys), cout),
            )
            if s != 1 or c_in != cout:
                blk['down_conv'] = _conv_w(next(keys), cout, c_in, 1, 1)
                blk['down_bn'] = _bn_p(next(keys), cout)
            blocks.append(blk)
        p[name] = blocks
    p['att'] = dict(
        w1=jax.random.normal(next(keys), (512, 128), jnp.float32) / math.sqrt(512.0),
        b1=0.01 * jax.random.normal(next(keys), (1, 128), jnp.float32),
        w2=jax.random.normal(next(keys), (128, 49), jnp.float32) / math.sqrt(128.0),
        b2=0.01 * jax.random.normal(next(keys), (1, 49), jnp.float32),
    )
    return p


if __name__ == "__main__":
    root = jax.random.PRNGKey(0)
    k_params, k_x = jax.random.split(root)
    in_ch = 6  # e.g. 4 Sentinel-2 bands + 2 spectral indexes
    raw_params = make_params(k_params, in_ch)
    params = prepare_params(raw_params)
    # ResNet-18 downsamples 32x and the attention head expects a 7x7 final
    # feature map (49 attention weights), so spatial input must be 224x224.
    x = jax.random.normal(k_x, (2, in_ch, 224, 224), jnp.float32)
    fwd = jax.jit(s2cnn_forward, static_argnames=("attention",))
    out = fwd(params, x, attention=True)
    out = jax.block_until_ready(out)
    assert out.shape == (2, 512), out.shape
    assert bool(jnp.all(jnp.isfinite(out)))
    print("KERNEL_OK")
</pallas_src>

<mosaic_0001>
module attributes {stable_mosaic.version = 11 : i64} {
  func.func @_mm_kernel(%arg0: i32, %arg1: i32, %arg2: memref<1568x294xbf16, #tpu.memory_space<vmem>>, %arg3: memref<294x64xbf16, #tpu.memory_space<vmem>>, %arg4: memref<1x64xf32, #tpu.memory_space<vmem>>, %arg5: memref<1x64xf32, #tpu.memory_space<vmem>>, %arg6: memref<1568x64xbf16, #tpu.memory_space<vmem>>) attributes {dimension_semantics = [#tpu.dimension_semantics<parallel>, #tpu.dimension_semantics<parallel>], iteration_bounds = array<i64: 16, 1>, scalar_prefetch = 0 : i64, scratch_operands = 0 : i64, tpu.core_type = #tpu.core_type<tc>, window_params = [{transform_indices = @transform_0, window_bounds = array<i64: 1568, 294>}, {transform_indices = @transform_1, window_bounds = array<i64: 294, 64>}, {transform_indices = @transform_2, window_bounds = array<i64: 1, 64>}, {transform_indices = @transform_3, window_bounds = array<i64: 1, 64>}, {transform_indices = @transform_4, window_bounds = array<i64: 1568, 64>}]} {
    %c0 = arith.constant 0 : index
    %c0_0 = arith.constant 0 : index
    %0 = vector.load %arg2[%c0, %c0_0] : memref<1568x294xbf16, #tpu.memory_space<vmem>>, vector<1568x294xbf16>
    %c0_1 = arith.constant 0 : index
    %c0_2 = arith.constant 0 : index
    %1 = vector.load %arg3[%c0_1, %c0_2] : memref<294x64xbf16, #tpu.memory_space<vmem>>, vector<294x64xbf16>
    %cst = arith.constant dense<0.000000e+00> : vector<1568x64xf32>
    %2 = tpu.matmul %0, %1, %cst {dimension_numbers = #tpu.dot_dimension_numbers<[1], [0], [0], [1], [0, 0, 1, 1], [], []>} : vector<1568x294xbf16>, vector<294x64xbf16>, vector<1568x64xf32> -> vector<1568x64xf32>
    %c0_3 = arith.constant 0 : index
    %c0_4 = arith.constant 0 : index
    %3 = vector.load %arg4[%c0_3, %c0_4] : memref<1x64xf32, #tpu.memory_space<vmem>>, vector<1x64xf32>
    %4 = vector.broadcast %3 : vector<1x64xf32> to vector<1568x64xf32>
    %5 = arith.mulf %2, %4 : vector<1568x64xf32>
    %c0_5 = arith.constant 0 : index
    %c0_6 = arith.constant 0 : index
    %6 = vector.load %arg5[%c0_5, %c0_6] : memref<1x64xf32, #tpu.memory_space<vmem>>, vector<1x64xf32>
    %7 = vector.broadcast %6 : vector<1x64xf32> to vector<1568x64xf32>
    %8 = arith.addf %5, %7 : vector<1568x64xf32>
    %cst_7 = arith.constant 0.000000e+00 : f32
    %9 = vector.broadcast %cst_7 : f32 to vector<1568x64xf32>
    %10 = arith.maximumf %8, %9 : vector<1568x64xf32>
    %11 = arith.truncf %10 : vector<1568x64xf32> to vector<1568x64xbf16>
    %c0_8 = arith.constant 0 : index
    %c0_9 = arith.constant 0 : index
    %12 = vector.load %arg6[%c0_8, %c0_9] : memref<1568x64xbf16, #tpu.memory_space<vmem>>, vector<1568x64xbf16>
    tpu.vector_store %arg6[%c0_8, %c0_9], %11 {strides = array<i32>} : memref<1568x64xbf16, #tpu.memory_space<vmem>>, vector<1568x64xbf16>,
    return
  }
  func.func @transform_0(%arg0: i32, %arg1: i32) -> (i32, i32) {
    %c0_i32 = arith.constant 0 : i32
    %c0_i32_0 = arith.constant 0 : i32
    return %arg0, %c0_i32 : i32, i32
  }
  func.func @transform_1(%arg0: i32, %arg1: i32) -> (i32, i32) {
    %c0_i32 = arith.constant 0 : i32
    %c0_i32_0 = arith.constant 0 : i32
    return %c0_i32, %arg1 : i32, i32
  }
  func.func @transform_2(%arg0: i32, %arg1: i32) -> (i32, i32) {
    %c0_i32 = arith.constant 0 : i32
    %c0_i32_0 = arith.constant 0 : i32
    return %c0_i32, %arg1 : i32, i32
  }
  func.func @transform_3(%arg0: i32, %arg1: i32) -> (i32, i32) {
    %c0_i32 = arith.constant 0 : i32
    %c0_i32_0 = arith.constant 0 : i32
    return %c0_i32, %arg1 : i32, i32
  }
  func.func @transform_4(%arg0: i32, %arg1: i32) -> (i32, i32) {
    %c0_i32 = arith.constant 0 : i32
    return %arg0, %arg1 : i32, i32
  }
}

</mosaic_0001>

<bundles_post_ra>
// kernel: tpu_custom_call.1
= control target key start
LH: loop header
LB: loop body
LE: loop exit
PB: predicated region body
PF: predicated region fallthrough
CT: control target
= control target key end

     0   :  { %s7556_s15 = smov 0   ;;  %s7558_s16 = smov 0   ;;  %s9436_s0 = inlined_call_operand.vmem [shape: bf16[25088,294], index: 0, kind: input, shape index: {}]   ;;  %s9437_s1 = inlined_call_operand.vmem [shape: bf16[294,64], index: 1, kind: input, shape index: {}]   ;;  %s9438_s2 = inlined_call_operand.vmem [shape: f32[1,64], index: 2, kind: input, shape index: {}]   ;;  %s9439_s3 = inlined_call_operand.vmem [shape: f32[1,64], index: 3, kind: input, shape index: {}]   ;;  %s9440_s4 = inlined_call_operand.vmem [shape: bf16[25088,64], index: 4, kind: output, shape index: {}]  }
   0x1   :  { %s7560_s17 = smov 0  }
   0x2 LB: > { %s26_s18 = sadd.s32 1, %s7524_s16  ;;  %p5917_p0 = scmp.ge.s32.totalorder %s7528_s17, 1  ;;  %s7528_s17 = sphi %s7560_s17, %s14_s17   ;;  %s7524_s16 = sphi %s7558_s16, %s9544_s16   ;;  %s7520_s15 = sphi %s7556_s15, %s9543_s15  }
   0x3   : > { %p28_p1 = scmp.ge.s32.totalorder %s26_s18, 16  ;;  %p203_p2 = scmp.lt.s32.totalorder %s7528_s17, 17 }
   0x5   : > { %s9546_s18 = smov (%p28_p1, %s26_s18), 0  ;;  %p204_p3 = pnand %p5917_p0, %p203_p2 }
   0x7   : > { %207 = sbr.rel (%p204_p3) target bundleno = 869 (0x365), region = 36 }
   0xc   : > { %v7089_v0 = vld [vmem:[%s9437_s1 + $0x38] sm:$0xff]   ;;  %v7530_v1 = vmov 0   ;;  %s243_s21 = smul.u32 196, %s7520_s15  ;;  %v7090_v2 = vld [vmem:[%s9437_s1 + $0x30] sm:$0xff]   ;;  %v7091_v3 = vld [vmem:[%s9437_s1 + $0x28] sm:$0xff]   ;;  %vm2575_vm0 = vcmask 1042432  }
   0xd   : > { %2579 = vmatprep.subr.bf16.mxu0 %v7530_v1  ;;  %7030 = vmatprep.subr.bf16.mxu1 %v7530_v1  ;;  %v7092_v4 = vld [vmem:[%s9437_s1 + $0x20] sm:$0xff]   ;;  %v7093_v5 = vld [vmem:[%s9437_s1 + $0x18] sm:$0xff]   ;;  %v7094_v7 = vld [vmem:[%s9437_s1 + $0x10] sm:$0xff]   ;;  %vm2280_vm1 = vcmask 310272   ;;  %vm5599_vm2 = vcmask 519168  }
   0xe   : > { %2580 = vmatpush1.bf16.msra.mxu0 %v7089_v0  ;;  %7046 = vmatpush1.bf16.msra.mxu1 %v7089_v0  ;;  %p244_p4 = scmp.lt.s32.totalorder %s243_s21, 3135  ;;  %v7095_v9 = vld [vmem:[%s9437_s1 + $0x8] sm:$0xff]   ;;  %v7096_v10 = vld [vmem:[%s9437_s1] sm:$0xff]   ;;  %v7097_v11 = vld [vmem:[%s9437_s1 + $0x78] sm:$0xff]  }
   0xf   : > { %2581 = vmatprep.subr.bf16.mxu0 %v7530_v1  ;;  %7031 = vmatprep.subr.bf16.mxu1 %v7530_v1  ;;  %v7098_v12 = vld [vmem:[%s9437_s1 + $0x70] sm:$0xff]   ;;  %v7099_v13 = vld [vmem:[%s9437_s1 + $0x68] sm:$0xff]   ;;  %v7100_v14 = vld [vmem:[%s9437_s1 + $0x60] sm:$0xff]  }
  0x10   : > { %s9548_s21 = smov (!%p244_p4, %s243_s21), 3135  ;;  %v7101_v15 = vld [vmem:[%s9437_s1 + $0x58] sm:$0xff]   ;;  %v7102_v16 = vld [vmem:[%s9437_s1 + $0x50] sm:$0xff]   ;;  %v7103_v17 = vld [vmem:[%s9437_s1 + $0x48] sm:$0xff]  }
  0x11   : > { %s7063_s28 = smul.u32 12, %s9548_s21  ;;  %v7104_v18 = vld [vmem:[%s9437_s1 + $0x40] sm:$0xff]   ;;  %v7111_v19 = vld [vmem:[%s9437_s1 + $0x90] ss:$0 sps:$4 sm:$0x77]   ;;  %v7160_v25 = vld [vmem:[%s9437_s1 + $0x88] sm:$0xff]  }
  0x12   : > { %2582 = vmatpush1.bf16.msra.mxu0 %v7090_v2  ;;  %7047 = vmatpush1.bf16.msra.mxu1 %v7090_v2  ;;  %v2577_v24 = vsel %vm2575_vm0, %v7111_v19, 0  ;;  %v7209_v26 = vld [vmem:[%s9437_s1 + $0x80] sm:$0xff]   ;;  %s5919_s23 = sshll.u32 %s9548_s21, 2 }
  0x13   : > { %2583 = vmatprep.subr.bf16.mxu0 %v7530_v1  ;;  %7032 = vmatprep.subr.bf16.mxu1 %v7530_v1  ;;  %s7603_s7 = scalar_lea.vmem %s9436_s0, %s7063_s28  ;;  %s8143_s21 = scalar_lea.vmem %s9440_s4, %s5919_s23 }
  0x14   : > { %v7107_v6 = vld [vmem:[%s7603_s7 + $0x4] ss:$12 sps:$4 sm:$0xff]   ;;  %v7110_v8 = vld [vmem:[%s7603_s7 + $0x6f4] ss:$12 sps:$4 sm:$0xff]   ;;  %v7112_v22 = vld [vmem:[%s7603_s7 + $0x1c] ss:$12 sps:$4 sm:$0xff]  }
  0x15   : > { %2611 = vmatprep.mubr.bf16.mxu0 %v7107_v6  ;;  %3203 = vmatprep.mubr.bf16.mxu1 %v7110_v8  ;;  %v7105_v20 = vld [vmem:[%s7603_s7] ss:$12 sps:$4 sm:$0xff]   ;;  %v7108_v21 = vld [vmem:[%s7603_s7 + $0x6f0] ss:$12 sps:$4 sm:$0xff]   ;;  %v7116_v27 = vld [vmem:[%s7603_s7 + $0x18] ss:$12 sps:$4 sm:$0xff]  }
  0x16   : > { %2584 = vmatpush1.bf16.msra.mxu0 %v7091_v3  ;;  %7048 = vmatpush1.bf16.msra.mxu1 %v7091_v3  ;;  %v7114_v23 = vld [vmem:[%s7603_s7 + $0x70c] ss:$12 sps:$4 sm:$0xff]   ;;  %v7117_v28 = vld [vmem:[%s7603_s7 + $0x708] ss:$12 sps:$4 sm:$0xff]   ;;  %v7120_v30 = vld [vmem:[%s7603_s7 + $0x724] ss:$12 sps:$4 sm:$0xff]  }
  0x17   : > { %2585 = vmatprep.subr.bf16.mxu0 %v7530_v1  ;;  %7033 = vmatprep.subr.bf16.mxu1 %v7530_v1  ;;  %v7118_v29 = vld [vmem:[%s7603_s7 + $0x34] ss:$12 sps:$4 sm:$0xff]   ;;  %v7122_v31 = vld [vmem:[%s7603_s7 + $0x30] ss:$12 sps:$4 sm:$0xff]   ;;  %v7124_v33 = vld [vmem:[%s7603_s7 + $0x4c] ss:$12 sps:$4 sm:$0xff]  }
  0x18   : > { %v7123_v32 = vld [vmem:[%s7603_s7 + $0x720] ss:$12 sps:$4 sm:$0xff]   ;;  %v7126_v34 = vld [vmem:[%s7603_s7 + $0x73c] ss:$12 sps:$4 sm:$0xff]   ;;  %v7129_v36 = vld [vmem:[%s7603_s7 + $0x738] ss:$12 sps:$4 sm:$0xff]  }
  0x19   : > { %v7128_v35 = vld [vmem:[%s7603_s7 + $0x48] ss:$12 sps:$4 sm:$0xff]   ;;  %v7130_v37 = vld [vmem:[%s7603_s7 + $0x64] ss:$12 sps:$4 sm:$0xff]   ;;  %v7134_v39 = vld [vmem:[%s7603_s7 + $0x60] ss:$12 sps:$4 sm:$0xff]  }
  0x1a   : > { %2586 = vmatpush1.bf16.msra.mxu0 %v7092_v4  ;;  %7049 = vmatpush1.bf16.msra.mxu1 %v7092_v4  ;;  %v7132_v38 = vld [vmem:[%s7603_s7 + $0x754] ss:$12 sps:$4 sm:$0xff]   ;;  %v7135_v40 = vld [vmem:[%s7603_s7 + $0x750] ss:$12 sps:$4 sm:$0xff]   ;;  %v7138_v42 = vld [vmem:[%s7603_s7 + $0x76c] ss:$12 sps:$4 sm:$0xff]  }
  0x1b   : > { %2587 = vmatprep.subr.bf16.mxu0 %v7530_v1  ;;  %7034 = vmatprep.subr.bf16.mxu1 %v7530_v1  ;;  %v7136_v41 = vld [vmem:[%s7603_s7 + $0x7c] ss:$12 sps:$4 sm:$0xff]   ;;  %v7140_v43 = vld [vmem:[%s7603_s7 + $0x78] ss:$12 sps:$4 sm:$0xff]   ;;  %v7142_v45 = vld [vmem:[%s7603_s7 + $0x94] ss:$12 sps:$4 sm:$0xff]  }
  0x1c   : > { %v7141_v44 = vld [vmem:[%s7603_s7 + $0x768] ss:$12 sps:$4 sm:$0xff]   ;;  %v7144_v46 = vld [vmem:[%s7603_s7 + $0x784] ss:$12 sps:$4 sm:$0xff]   ;;  %v7147_v48 = vld [vmem:[%s7603_s7 + $0x780] ss:$12 sps:$4 sm:$0xff]  }
  0x1d   : > { %v7146_v47 = vld [vmem:[%s7603_s7 + $0x90] ss:$12 sps:$4 sm:$0xff]   ;;  %v7148_v49 = vld [vmem:[%s7603_s7 + $0xac] ss:$12 sps:$4 sm:$0xff]   ;;  %v7152_v51 = vld [vmem:[%s7603_s7 + $0xa8] ss:$12 sps:$4 sm:$0xff]  }
  0x1e   : > { %2588 = vmatpush1.bf16.msra.mxu0 %v7093_v5  ;;  %7050 = vmatpush1.bf16.msra.mxu1 %v7093_v5  ;;  %v7150_v50 = vld [vmem:[%s7603_s7 + $0x79c] ss:$12 sps:$4 sm:$0xff]   ;;  %v7153_v52 = vld [vmem:[%s7603_s7 + $0x798] ss:$12 sps:$4 sm:$0xff]   ;;  %v7156_v54 = vld [vmem:[%s7603_s7 + $0x7b4] ss:$12 sps:$4 sm:$0xff]  }
  0x1f   : > { %2589 = vmatprep.subr.bf16.mxu0 %v7530_v1  ;;  %7035 = vmatprep.subr.bf16.mxu1 %v7530_v1  ;;  %v7154_v53 = vld [vmem:[%s7603_s7 + $0xc4] ss:$12 sps:$4 sm:$0xff]   ;;  %v7158_v55 = vld [vmem:[%s7603_s7 + $0xc0] ss:$12 sps:$4 sm:$0xff]   ;;  %v7161_v57 = vld [vmem:[%s7603_s7 + $0xdc] ss:$12 sps:$4 sm:$0xff]  }
  0x20   : > { %v7159_v56 = vld [vmem:[%s7603_s7 + $0x7b0] ss:$12 sps:$4 sm:$0xff]   ;;  %v7163_v58 = vld [vmem:[%s7603_s7 + $0x7cc] ss:$12 sps:$4 sm:$0xff]   ;;  %v7166_v60 = vld [vmem:[%s7603_s7 + $0x7c8] ss:$12 sps:$4 sm:$0xff]  }
  0x21   : > { %v7165_v59 = vld [vmem:[%s7603_s7 + $0xd8] ss:$12 sps:$4 sm:$0xff]   ;;  %v7167_v61 = vld [vmem:[%s7603_s7 + $0xf4] ss:$12 sps:$4 sm:$0xff]   ;;  %v7171_v63 = vld [vmem:[%s7603_s7 + $0xf0] ss:$12 sps:$4 sm:$0xff]  }
  0x22   : > { %2590 = vmatpush1.bf16.msra.mxu0 %v7094_v7  ;;  %7051 = vmatpush1.bf16.msra.mxu1 %v7094_v7  ;;  %v7169_v62 = vld [vmem:[%s7603_s7 + $0x7e4] ss:$12 sps:$4 sm:$0xff]   ;;  %v7172_v0 = vld [vmem:[%s7603_s7 + $0x7e0] ss:$12 sps:$4 sm:$0xff]   ;;  %v7175_v2 = vld [vmem:[%s7603_s7 + $0x7fc] ss:$12 sps:$4 sm:$0xff]  }
  0x23   : > { %2591 = vmatprep.subr.bf16.mxu0 %v7530_v1  ;;  %7036 = vmatprep.subr.bf16.mxu1 %v7530_v1  ;;  %v7177_v3 = vld [vmem:[%s7603_s7 + $0x108] ss:$12 sps:$4 sm:$0xff]   ;;  %v7178_v4 = vld [vmem:[%s7603_s7 + $0x7f8] ss:$12 sps:$4 sm:$0xff]   ;;  %v7183_v7 = vld [vmem:[%s7603_s7 + $0x120] ss:$12 sps:$4 sm:$0xff]  }
  0x24   : > { %v7179_v5 = vld [vmem:[%s7603_s7 + $0x124] ss:$12 sps:$4 sm:$0xff]   ;;  %v7181_v6 = vld [vmem:[%s7603_s7 + $0x814] ss:$12 sps:$4 sm:$0xff]  }
  0x25   : > { %v7184_v8 = vld [vmem:[%s7603_s7 + $0x810] ss:$12 sps:$4 sm:$0xff]  }
  0x26   : > { %2592 = vmatpush1.bf16.msra.mxu0 %v7095_v9  ;;  %7052 = vmatpush1.bf16.msra.mxu1 %v7095_v9  ;;  %v7185_v9 = vld [vmem:[%s7603_s7 + $0x13c] ss:$12 sps:$4 sm:$0xff]  }
  0x27   : > { %2593 = vmatprep.subr.bf16.mxu0 %v7530_v1  ;;  %7037 = vmatprep.subr.bf16.mxu1 %v7530_v1 }
  0x2a   : > { %2594 = vmatpush1.bf16.msra.mxu0 %v7096_v10  ;;  %7053 = vmatpush1.bf16.msra.mxu1 %v7096_v10  ;;  %v7187_v10 = vld [vmem:[%s7603_s7 + $0x82c] ss:$12 sps:$4 sm:$0xff]  }
  0x2b   : > { %2595 = vmatprep.subr.bf16.mxu0 %v7530_v1  ;;  %7038 = vmatprep.subr.bf16.mxu1 %v7530_v1 }
  0x2e   : > { %2596 = vmatpush2.bf16.msra.mxu0 %v7097_v11  ;;  %7054 = vmatpush2.bf16.msra.mxu1 %v7097_v11  ;;  %v7189_v11 = vld [vmem:[%s7603_s7 + $0x138] ss:$12 sps:$4 sm:$0xff]  }
  0x2f   : > { %2597 = vmatprep.subr.bf16.mxu0 %v7530_v1  ;;  %7039 = vmatprep.subr.bf16.mxu1 %v7530_v1 }
  0x32   : > { %2598 = vmatpush2.bf16.msra.mxu0 %v7098_v12  ;;  %7055 = vmatpush2.bf16.msra.mxu1 %v7098_v12  ;;  %v7190_v12 = vld [vmem:[%s7603_s7 + $0x828] ss:$12 sps:$4 sm:$0xff]  }
  0x33   : > { %2599 = vmatprep.subr.bf16.mxu0 %v7530_v1  ;;  %7040 = vmatprep.subr.bf16.mxu1 %v7530_v1 }
  0x36   : > { %2600 = vmatpush2.bf16.msra.mxu0 %v7099_v13  ;;  %7056 = vmatpush2.bf16.msra.mxu1 %v7099_v13  ;;  %v7191_v13 = vld [vmem:[%s7603_s7 + $0x154] ss:$12 sps:$4 sm:$0xff]  }
  0x37   : > { %2601 = vmatprep.subr.bf16.mxu0 %v7530_v1  ;;  %7041 = vmatprep.subr.bf16.mxu1 %v7530_v1 }
  0x3a   : > { %2602 = vmatpush2.bf16.msra.mxu0 %v7100_v14  ;;  %7057 = vmatpush2.bf16.msra.mxu1 %v7100_v14  ;;  %v7193_v14 = vld [vmem:[%s7603_s7 + $0x844] ss:$12 sps:$4 sm:$0xff]  }
  0x3b   : > { %2603 = vmatprep.subr.bf16.mxu0 %v7530_v1  ;;  %7042 = vmatprep.subr.bf16.mxu1 %v7530_v1 }
  0x3e   : > { %2604 = vmatpush2.bf16.msra.mxu0 %v7101_v15  ;;  %7058 = vmatpush2.bf16.msra.mxu1 %v7101_v15  ;;  %v7195_v15 = vld [vmem:[%s7603_s7 + $0x150] ss:$12 sps:$4 sm:$0xff]  }
  0x3f   : > { %2605 = vmatprep.subr.bf16.mxu0 %v7530_v1  ;;  %7043 = vmatprep.subr.bf16.mxu1 %v7530_v1 }
  0x42   : > { %2606 = vmatpush2.bf16.msra.mxu0 %v7102_v16  ;;  %7059 = vmatpush2.bf16.msra.mxu1 %v7102_v16  ;;  %v7196_v16 = vld [vmem:[%s7603_s7 + $0x840] ss:$12 sps:$4 sm:$0xff]  }
  0x43   : > { %2607 = vmatprep.subr.bf16.mxu0 %v7530_v1  ;;  %7044 = vmatprep.subr.bf16.mxu1 %v7530_v1 }
  0x46   : > { %2608 = vmatpush2.bf16.msra.mxu0 %v7103_v17  ;;  %7060 = vmatpush2.bf16.msra.mxu1 %v7103_v17  ;;  %v7197_v17 = vld [vmem:[%s7603_s7 + $0x16c] ss:$12 sps:$4 sm:$0xff]  }
  0x47   : > { %2609 = vmatprep.subr.bf16.mxu0 %v7530_v1  ;;  %7045 = vmatprep.subr.bf16.mxu1 %v7530_v1  ;;  %v7173_v1 = vld [vmem:[%s7603_s7 + $0x10c] ss:$12 sps:$4 sm:$0xff]  }
  0x4a   : > { %2610 = vmatpush2.bf16.msra.mxu0 %v7104_v18  ;;  %7061 = vmatpush2.bf16.msra.mxu1 %v7104_v18  ;;  %v7199_v18 = vld [vmem:[%s7603_s7 + $0x85c] ss:$12 sps:$4 sm:$0xff]  }
  0x4b   : > { %7062 = vmatprep.subr.msk.bf16.mxu1 %vm2575_vm0, %v7111_v19  ;;  %v7201_v19 = vld [vmem:[%s7603_s7 + $0x168] ss:$12 sps:$4 sm:$0xff]  }
  0x4d   : > { %2612 = vmatmul.mubr.bf16.vlgmr.msra.gmra.mxu0 %v7105_v20  ;;  %3204 = vmatmul.mubr.bf16.vlgmr.msra.gmra.mxu1 %v7108_v21  ;;  %v7202_v20 = vld [vmem:[%s7603_s7 + $0x858] ss:$12 sps:$4 sm:$0xff]  }
  0x4e   : > { %6829 = vmatpush3.bf16.msra.mxu1 %v2577_v24  ;;  %2619 = vmatprep.mubr.bf16.mxu0 %v7112_v22  ;;  %v7203_v21 = vld [vmem:[%s7603_s7 + $0x184] ss:$12 sps:$4 sm:$0xff]   ;;  %v7205_v22 = vld [vmem:[%s7603_s7 + $0x874] ss:$12 sps:$4 sm:$0xff]  }
  0x4f   : > { %3211 = vmatprep.mubr.bf16.mxu1 %v7114_v23  ;;  %6830 = vmatprep.subr.bf16.mxu1 %v7160_v25  ;;  %v7207_v23 = vld [vmem:[%s7603_s7 + $0x180] ss:$12 sps:$4 sm:$0xff]   ;;  %v7208_v24 = vld [vmem:[%s7603_s7 + $0x870] ss:$12 sps:$4 sm:$0xff]  }
  0x52   : > { %6831 = vmatpush3.bf16.msra.mxu1 %v7160_v25  ;;  %v7210_v25 = vld [vmem:[%s7603_s7 + $0x19c] ss:$12 sps:$4 sm:$0xff]  }
  0x53   : > { %6832 = vmatprep.subr.bf16.mxu1 %v7209_v26 }
  0x55   : > { %2620 = vmatmul.mubr.bf16.gmra.mxu0 %v7116_v27  ;;  %3212 = vmatmul.mubr.bf16.gmra.mxu1 %v7117_v28  ;;  %v7214_v27 = vld [vmem:[%s7603_s7 + $0x198] ss:$12 sps:$4 sm:$0xff]   ;;  %v7215_v28 = vld [vmem:[%s7603_s7 + $0x888] ss:$12 sps:$4 sm:$0xff]  }
  0x56   : > { %2627 = vmatprep.mubr.bf16.mxu0 %v7118_v29  ;;  %3219 = vmatprep.mubr.bf16.mxu1 %v7120_v30  ;;  %v7216_v29 = vld [vmem:[%s7603_s7 + $0x1b4] ss:$12 sps:$4 sm:$0xff]   ;;  %v7218_v30 = vld [vmem:[%s7603_s7 + $0x8a4] ss:$12 sps:$4 sm:$0xff]  }
  0x57   : > { %6833 = vmatpush3.bf16.msra.mxu1 %v7209_v26  ;;  %v7212_v26 = vld [vmem:[%s7603_s7 + $0x88c] ss:$12 sps:$4 sm:$0xff]  }
  0x5d   : > { %2628 = vmatmul.mubr.bf16.gmra.mxu0 %v7122_v31  ;;  %3220 = vmatmul.mubr.bf16.gmra.mxu1 %v7123_v32  ;;  %v7220_v31 = vld [vmem:[%s7603_s7 + $0x1b0] ss:$12 sps:$4 sm:$0xff]   ;;  %v7221_v32 = vld [vmem:[%s7603_s7 + $0x8a0] ss:$12 sps:$4 sm:$0xff]  }
  0x5e   : > { %2635 = vmatprep.mubr.bf16.mxu0 %v7124_v33  ;;  %3227 = vmatprep.mubr.bf16.mxu1 %v7126_v34  ;;  %v7222_v33 = vld [vmem:[%s7603_s7 + $0x1cc] ss:$12 sps:$4 sm:$0xff]   ;;  %v7224_v34 = vld [vmem:[%s7603_s7 + $0x8bc] ss:$12 sps:$4 sm:$0xff]  }
  0x65   : > { %2636 = vmatmul.mubr.bf16.gmra.mxu0 %v7128_v35  ;;  %3228 = vmatmul.mubr.bf16.gmra.mxu1 %v7129_v36  ;;  %v7226_v35 = vld [vmem:[%s7603_s7 + $0x1c8] ss:$12 sps:$4 sm:$0xff]   ;;  %v7227_v36 = vld [vmem:[%s7603_s7 + $0x8b8] ss:$12 sps:$4 sm:$0xff]  }
  0x66   : > { %2643 = vmatprep.mubr.bf16.mxu0 %v7130_v37  ;;  %3235 = vmatprep.mubr.bf16.mxu1 %v7132_v38  ;;  %v7228_v37 = vld [vmem:[%s7603_s7 + $0x1e4] ss:$12 sps:$4 sm:$0xff]   ;;  %v7230_v38 = vld [vmem:[%s7603_s7 + $0x8d4] ss:$12 sps:$4 sm:$0xff]  }
  0x6d   : > { %2644 = vmatmul.mubr.bf16.gmra.mxu0 %v7134_v39  ;;  %3236 = vmatmul.mubr.bf16.gmra.mxu1 %v7135_v40  ;;  %v7232_v39 = vld [vmem:[%s7603_s7 + $0x1e0] ss:$12 sps:$4 sm:$0xff]   ;;  %v7233_v40 = vld [vmem:[%s7603_s7 + $0x8d0] ss:$12 sps:$4 sm:$0xff]  }
  0x6e   : > { %2651 = vmatprep.mubr.bf16.mxu0 %v7136_v41  ;;  %3243 = vmatprep.mubr.bf16.mxu1 %v7138_v42  ;;  %v7234_v41 = vld [vmem:[%s7603_s7 + $0x1fc] ss:$12 sps:$4 sm:$0xff]   ;;  %v7236_v42 = vld [vmem:[%s7603_s7 + $0x8ec] ss:$12 sps:$4 sm:$0xff]  }
  0x75   : > { %2652 = vmatmul.mubr.bf16.gmra.mxu0 %v7140_v43  ;;  %3244 = vmatmul.mubr.bf16.gmra.mxu1 %v7141_v44  ;;  %v7238_v43 = vld [vmem:[%s7603_s7 + $0x1f8] ss:$12 sps:$4 sm:$0xff]   ;;  %v7239_v44 = vld [vmem:[%s7603_s7 + $0x8e8] ss:$12 sps:$4 sm:$0xff]  }
  0x76   : > { %2659 = vmatprep.mubr.bf16.mxu0 %v7142_v45  ;;  %3251 = vmatprep.mubr.bf16.mxu1 %v7144_v46  ;;  %v7240_v45 = vld [vmem:[%s7603_s7 + $0x214] ss:$12 sps:$4 sm:$0xff]   ;;  %v7242_v46 = vld [vmem:[%s7603_s7 + $0x904] ss:$12 sps:$4 sm:$0xff]  }
  0x7d   : > { %2660 = vmatmul.mubr.bf16.gmra.mxu0 %v7146_v47  ;;  %3252 = vmatmul.mubr.bf16.gmra.mxu1 %v7147_v48  ;;  %v7244_v47 = vld [vmem:[%s7603_s7 + $0x210] ss:$12 sps:$4 sm:$0xff]   ;;  %v7245_v48 = vld [vmem:[%s7603_s7 + $0x900] ss:$12 sps:$4 sm:$0xff]  }
  0x7e   : > { %2667 = vmatprep.mubr.bf16.mxu0 %v7148_v49  ;;  %3259 = vmatprep.mubr.bf16.mxu1 %v7150_v50  ;;  %v7246_v49 = vld [vmem:[%s7603_s7 + $0x22c] ss:$12 sps:$4 sm:$0xff]   ;;  %v7248_v50 = vld [vmem:[%s7603_s7 + $0x91c] ss:$12 sps:$4 sm:$0xff]  }
  0x85   : > { %2668 = vmatmul.mubr.bf16.gmra.mxu0 %v7152_v51  ;;  %3260 = vmatmul.mubr.bf16.gmra.mxu1 %v7153_v52  ;;  %v7250_v51 = vld [vmem:[%s7603_s7 + $0x228] ss:$12 sps:$4 sm:$0xff]   ;;  %v7251_v52 = vld [vmem:[%s7603_s7 + $0x918] ss:$12 sps:$4 sm:$0xff]  }
  0x86   : > { %2675 = vmatprep.mubr.bf16.mxu0 %v7154_v53  ;;  %3267 = vmatprep.mubr.bf16.mxu1 %v7156_v54  ;;  %v7252_v53 = vld [vmem:[%s7603_s7 + $0x244] ss:$12 sps:$4 sm:$0xff]   ;;  %v7254_v54 = vld [vmem:[%s7603_s7 + $0x8] ss:$12 sps:$4 sm:$0xff]  }
  0x8d   : > { %2676 = vmatmul.mubr.bf16.gmra.mxu0 %v7158_v55  ;;  %3268 = vmatmul.mubr.bf16.gmra.mxu1 %v7159_v56  ;;  %v7255_v55 = vld [vmem:[%s7603_s7 + $0x240] ss:$12 sps:$4 sm:$0xff]  }
  0x8e   : > { %2683 = vmatprep.mubr.bf16.mxu0 %v7161_v57  ;;  %3275 = vmatprep.mubr.bf16.mxu1 %v7163_v58  ;;  %v7256_v56 = vld [vmem:[%s7603_s7 + $0x20] ss:$12 sps:$4 sm:$0xff]   ;;  %v7257_v57 = vld [vmem:[%s7603_s7 + $0x25c] ss:$12 sps:$4 sm:$0xff]   ;;  %v7259_v58 = vld [vmem:[%s7603_s7 + $0x38] ss:$12 sps:$4 sm:$0xff]  }
  0x95   : > { %2684 = vmatmul.mubr.bf16.gmra.mxu0 %v7165_v59  ;;  %3276 = vmatmul.mubr.bf16.gmra.mxu1 %v7166_v60 }
  0x96   : > { %2691 = vmatprep.mubr.bf16.mxu0 %v7167_v61  ;;  %3283 = vmatprep.mubr.bf16.mxu1 %v7169_v62 }
  0x9d   : > { %2692 = vmatmul.mubr.bf16.gmra.mxu0 %v7171_v63  ;;  %3284 = vmatmul.mubr.bf16.gmra.mxu1 %v7172_v0 }
  0x9e   : > { %2699 = vmatprep.mubr.bf16.mxu0 %v7173_v1  ;;  %3291 = vmatprep.mubr.bf16.mxu1 %v7175_v2  ;;  %v7260_v1 = vld [vmem:[%s7603_s7 + $0x258] ss:$12 sps:$4 sm:$0xff]   ;;  %v7261_v2 = vld [vmem:[%s7603_s7 + $0x50] ss:$12 sps:$4 sm:$0xff]  }
  0xa5   : > { %2700 = vmatmul.mubr.bf16.gmra.mxu0 %v7177_v3  ;;  %3292 = vmatmul.mubr.bf16.gmra.mxu1 %v7178_v4  ;;  %v7262_v3 = vld [vmem:[%s7603_s7 + $0x274] ss:$12 sps:$4 sm:$0xff]  }
  0xa6   : > { %2707 = vmatprep.mubr.bf16.mxu0 %v7179_v5  ;;  %3299 = vmatprep.mubr.bf16.mxu1 %v7181_v6  ;;  %v7264_v4 = vld [vmem:[%s7603_s7 + $0x68] ss:$12 sps:$4 sm:$0xff]  }
  0xad   : > { %2708 = vmatmul.mubr.bf16.gmra.mxu0 %v7183_v7  ;;  %3300 = vmatmul.mubr.bf16.gmra.mxu1 %v7184_v8 }
  0xae   : > { %2715 = vmatprep.mubr.bf16.mxu0 %v7185_v9  ;;  %3307 = vmatprep.mubr.bf16.mxu1 %v7187_v10 }
  0xb5   : > { %2716 = vmatmul.mubr.bf16.gmra.mxu0 %v7189_v11  ;;  %3308 = vmatmul.mubr.bf16.gmra.mxu1 %v7190_v12 }
  0xb6   : > { %2723 = vmatprep.mubr.bf16.mxu0 %v7191_v13  ;;  %3315 = vmatprep.mubr.bf16.mxu1 %v7193_v14  ;;  %v7265_v13 = vld [vmem:[%s7603_s7 + $0x270] ss:$12 sps:$4 sm:$0xff]   ;;  %v7266_v14 = vld [vmem:[%s7603_s7 + $0x80] ss:$12 sps:$4 sm:$0xff]  }
  0xbd   : > { %2724 = vmatmul.mubr.bf16.gmra.mxu0 %v7195_v15  ;;  %3316 = vmatmul.mubr.bf16.gmra.mxu1 %v7196_v16  ;;  %v7267_v15 = vld [vmem:[%s7603_s7 + $0x28c] ss:$12 sps:$4 sm:$0xff]  }
  0xbe   : > { %2731 = vmatprep.mubr.bf16.mxu0 %v7197_v17  ;;  %3323 = vmatprep.mubr.bf16.mxu1 %v7199_v18  ;;  %v7269_v16 = vld [vmem:[%s7603_s7 + $0x98] ss:$12 sps:$4 sm:$0xff]  }
  0xc5   : > { %2732 = vmatmul.mubr.bf16.gmra.mxu0 %v7201_v19  ;;  %3324 = vmatmul.mubr.bf16.gmra.mxu1 %v7202_v20 }
  0xc6   : > { %2739 = vmatprep.mubr.bf16.mxu0 %v7203_v21  ;;  %3331 = vmatprep.mubr.bf16.mxu1 %v7205_v22 }
  0xcd   : > { %2740 = vmatmul.mubr.bf16.gmra.mxu0 %v7207_v23  ;;  %3332 = vmatmul.mubr.bf16.gmra.mxu1 %v7208_v24 }
  0xce   : > { %2747 = vmatprep.mubr.bf16.mxu0 %v7210_v25  ;;  %3339 = vmatprep.mubr.bf16.mxu1 %v7212_v26  ;;  %v7270_v25 = vld [vmem:[%s7603_s7 + $0x288] ss:$12 sps:$4 sm:$0xff]   ;;  %v7271_v26 = vld [vmem:[%s7603_s7 + $0xb0] ss:$12 sps:$4 sm:$0xff]  }
  0xd5   : > { %2748 = vmatmul.mubr.bf16.gmra.mxu0 %v7214_v27  ;;  %3340 = vmatmul.mubr.bf16.gmra.mxu1 %v7215_v28  ;;  %v7274_v27 = vld [vmem:[%s7603_s7 + $0x2a4] ss:$12 sps:$4 sm:$0xff]   ;;  %v7275_v28 = vld [vmem:[%s7603_s7 + $0xc8] ss:$12 sps:$4 sm:$0xff]  }
  0xd6   : > { %2755 = vmatprep.mubr.bf16.mxu0 %v7216_v29  ;;  %3347 = vmatprep.mubr.bf16.mxu1 %v7218_v30 }
  0xdd   : > { %2756 = vmatmul.mubr.bf16.gmra.mxu0 %v7220_v31  ;;  %3348 = vmatmul.mubr.bf16.gmra.mxu1 %v7221_v32 }
  0xde   : > { %2763 = vmatprep.mubr.bf16.mxu0 %v7222_v33  ;;  %3355 = vmatprep.mubr.bf16.mxu1 %v7224_v34 }
  0xe5   : > { %2764 = vmatmul.mubr.bf16.gmra.mxu0 %v7226_v35  ;;  %3356 = vmatmul.mubr.bf16.gmra.mxu1 %v7227_v36 }
  0xe6   : > { %2771 = vmatprep.mubr.bf16.mxu0 %v7228_v37  ;;  %3363 = vmatprep.mubr.bf16.mxu1 %v7230_v38  ;;  %v7272_v37 = vld [vmem:[%s7603_s7 + $0x2a0] ss:$12 sps:$4 sm:$0xff]  }
  0xe7   : > { %v7276_v38 = vld [vmem:[%s7603_s7 + $0xe0] ss:$12 sps:$4 sm:$0xff]  }
  0xed   : > { %2772 = vmatmul.mubr.bf16.gmra.mxu0 %v7232_v39  ;;  %3364 = vmatmul.mubr.bf16.gmra.mxu1 %v7233_v40  ;;  %v7279_v39 = vld [vmem:[%s7603_s7 + $0x2bc] ss:$12 sps:$4 sm:$0xff]   ;;  %v7280_v40 = vld [vmem:[%s7603_s7 + $0xf8] ss:$12 sps:$4 sm:$0xff]  }
  0xee   : > { %2779 = vmatprep.mubr.bf16.mxu0 %v7234_v41  ;;  %3371 = vmatprep.mubr.bf16.mxu1 %v7236_v42 }
  0xf5   : > { %2780 = vmatmul.mubr.bf16.gmra.mxu0 %v7238_v43  ;;  %3372 = vmatmul.mubr.bf16.gmra.mxu1 %v7239_v44 }
  0xf6   : > { %2787 = vmatprep.mubr.bf16.mxu0 %v7240_v45  ;;  %3379 = vmatprep.mubr.bf16.mxu1 %v7242_v46 }
  0xfd   : > { %2788 = vmatmul.mubr.bf16.gmra.mxu0 %v7244_v47  ;;  %3380 = vmatmul.mubr.bf16.gmra.mxu1 %v7245_v48 }
  0xfe   : > { %2795 = vmatprep.mubr.bf16.mxu0 %v7246_v49  ;;  %3387 = vmatprep.mubr.bf16.mxu1 %v7248_v50  ;;  %v7277_v49 = vld [vmem:[%s7603_s7 + $0x2b8] ss:$12 sps:$4 sm:$0xff]   ;;  %v7281_v50 = vld [vmem:[%s7603_s7 + $0x110] ss:$12 sps:$4 sm:$0xff]  }
 0x105   : > { %2796 = vmatmul.mubr.bf16.gmra.mxu0 %v7250_v51  ;;  %3388 = vmatmul.mubr.bf16.gmra.mxu1 %v7251_v52  ;;  %v7284_v51 = vld [vmem:[%s7603_s7 + $0x2d4] ss:$12 sps:$4 sm:$0xff]  }
 0x106   : > { %2803 = vmatprep.mubr.bf16.mxu0 %v7252_v53  ;;  %6834 = vmatprep.mubr.msk.bf16.mxu1 %vm2280_vm1, %v7254_v54  ;;  %v7285_v52 = vld [vmem:[%s7603_s7 + $0x128] ss:$12 sps:$4 sm:$0xff]  }
 0x10d   : > { %v7774_v59 = vpop.f32.mrf.mxu0  ;;  %2804 = vmatmul.mubr.bf16.gmra.mxu0 %v7255_v55  ;;  %v7776_v60 = vpop.f32.mrf.mxu1  ;;  %6835 = vmatmul.mubr.msk.bf16.vlgmr.msra.gmra.mxu1 %vm2280_vm1, %v7256_v56 }
 0x10e   : > { %9441 = vst [vmem:[#allocation2_spill] sm:$0xff] %v7776_v60  ;;  %2811 = vmatprep.mubr.bf16.mxu0 %v7257_v57  ;;  %6838 = vmatprep.mubr.msk.bf16.mxu1 %vm2280_vm1, %v7259_v58  ;;  %v7384_v60 = vld [vmem:[%s7603_s7 + $0x4b4] ss:$12 sps:$4 sm:$0xff]  }
 0x10f   : > { %v2615_v61 = vpop.f32.mrf.mxu0  ;;  %v3207_v62 = vpop.f32.mrf.mxu1 }
 0x111   : > { %v7780_v63 = vpop.f32.mrf.mxu0  ;;  %v7782_v0 = vpop.f32.mrf.mxu1 }
 0x112   : > { %9442 = vst [vmem:[#allocation3_spill] sm:$0xff] %v7782_v0 }
 0x113   : > { %v2618_v5 = vpop.f32.mrf.mxu0  ;;  %v3210_v6 = vpop.f32.mrf.mxu1 }
 0x115   : > { %v7788_v7 = vpop.f32.mrf.mxu0  ;;  %2812 = vmatmul.mubr.bf16.gmra.mxu0 %v7260_v1  ;;  %v7790_v8 = vpop.f32.mrf.mxu1  ;;  %6839 = vmatmul.mubr.msk.bf16.gmra.mxu1 %vm2280_vm1, %v7261_v2  ;;  %v7282_v1 = vld [vmem:[%s7603_s7 + $0x2d0] ss:$12 sps:$4 sm:$0xff]   ;;  %v7286_v2 = vld [vmem:[%s7603_s7 + $0x140] ss:$12 sps:$4 sm:$0xff]  }
 0x116   : > { %9443 = vst [vmem:[#allocation4_spill] sm:$0xff] %v7790_v8  ;;  %2819 = vmatprep.mubr.bf16.mxu0 %v7262_v3  ;;  %6842 = vmatprep.mubr.msk.bf16.mxu1 %vm2280_vm1, %v7264_v4  ;;  %v7289_v3 = vld [vmem:[%s7603_s7 + $0x2ec] ss:$12 sps:$4 sm:$0xff]   ;;  %v7385_v8 = vld [vmem:[%s7603_s7 + $0x4e8] ss:$12 sps:$4 sm:$0xff]  }
 0x117   : > { %v2623_v9 = vpop.f32.mrf.mxu0  ;;  %v3215_v10 = vpop.f32.mrf.mxu1  ;;  %v7290_v4 = vld [vmem:[%s7603_s7 + $0x158] ss:$12 sps:$4 sm:$0xff]  }
 0x119   : > { %v7794_v11 = vpop.f32.mrf.mxu0  ;;  %v7796_v12 = vpop.f32.mrf.mxu1 }
 0x11a   : > { %9444 = vst [vmem:[#allocation5_spill] sm:$0xff] %v7796_v12 }
 0x11b   : > { %v2626_v17 = vpop.f32.mrf.mxu0  ;;  %v3218_v18 = vpop.f32.mrf.mxu1 }
 0x11c   : > { %v7287_v17 = vld [vmem:[%s7603_s7 + $0x2e8] ss:$12 sps:$4 sm:$0xff]   ;;  %v7291_v18 = vld [vmem:[%s7603_s7 + $0x170] ss:$12 sps:$4 sm:$0xff]  }
 0x11d   : > { %v7802_v19 = vpop.f32.mrf.mxu0  ;;  %2820 = vmatmul.mubr.bf16.gmra.mxu0 %v7265_v13  ;;  %v7804_v20 = vpop.f32.mrf.mxu1  ;;  %6843 = vmatmul.mubr.msk.bf16.gmra.mxu1 %vm2280_vm1, %v7266_v14 }
 0x11e   : > { %9445 = vst [vmem:[#allocation6_spill] sm:$0xff] %v7804_v20  ;;  %2827 = vmatprep.mubr.bf16.mxu0 %v7267_v15  ;;  %6846 = vmatprep.mubr.msk.bf16.mxu1 %vm2280_vm1, %v7269_v16  ;;  %v7372_v20 = vld [vmem:[%s7603_s7 + $0x480] ss:$12 sps:$4 sm:$0xff]  }
 0x11f   : > { %v2631_v21 = vpop.f32.mrf.mxu0  ;;  %v3223_v22 = vpop.f32.mrf.mxu1 }
 0x120   : > { %v7294_v21 = vld [vmem:[%s7603_s7 + $0x304] ss:$12 sps:$4 sm:$0xff]   ;;  %v7295_v22 = vld [vmem:[%s7603_s7 + $0x188] ss:$12 sps:$4 sm:$0xff]  }
 0x121   : > { %v7808_v23 = vpop.f32.mrf.mxu0  ;;  %v7810_v24 = vpop.f32.mrf.mxu1 }
 0x122   : > { %9446 = vst [vmem:[#allocation7_spill] sm:$0xff] %v7810_v24  ;;  %v7367_v24 = vld [vmem:[%s7603_s7 + $0x468] ss:$12 sps:$4 sm:$0xff]  }
 0x123   : > { %v2634_v29 = vpop.f32.mrf.mxu0  ;;  %v3226_v30 = vpop.f32.mrf.mxu1 }
 0x125   : > { %v7816_v31 = vpop.f32.mrf.mxu0  ;;  %2828 = vmatmul.mubr.bf16.gmra.mxu0 %v7270_v25  ;;  %v7818_v32 = vpop.f32.mrf.mxu1  ;;  %6847 = vmatmul.mubr.msk.bf16.gmra.mxu1 %vm2280_vm1, %v7271_v26 }
 0x126   : > { %9447 = vst [vmem:[#allocation8_spill] sm:$0xff] %v7818_v32  ;;  %2835 = vmatprep.mubr.bf16.mxu0 %v7274_v27  ;;  %6850 = vmatprep.mubr.msk.bf16.mxu1 %vm2280_vm1, %v7275_v28  ;;  %v7376_v32 = vld [vmem:[%s7603_s7 + $0x4a0] ss:$12 sps:$4 sm:$0xff]  }
 0x127   : > { %v2639_v33 = vpop.f32.mrf.mxu0  ;;  %v3231_v34 = vpop.f32.mrf.mxu1 }
 0x129   : > { %v7822_v35 = vpop.f32.mrf.mxu0  ;;  %v7824_v36 = vpop.f32.mrf.mxu1 }
 0x12a   : > { %9448 = vst [vmem:[#allocation9_spill] sm:$0xff] %v7824_v36 }
 0x12b   : > { %v2642_v41 = vpop.f32.mrf.mxu0  ;;  %v3234_v42 = vpop.f32.mrf.mxu1 }
 0x12d   : > { %v7830_v43 = vpop.f32.mrf.mxu0  ;;  %2836 = vmatmul.mubr.bf16.gmra.mxu0 %v7272_v37  ;;  %v7832_v44 = vpop.f32.mrf.mxu1  ;;  %6851 = vmatmul.mubr.msk.bf16.gmra.mxu1 %vm2280_vm1, %v7276_v38  ;;  %v7292_v37 = vld [vmem:[%s7603_s7 + $0x300] ss:$12 sps:$4 sm:$0xff]  }
 0x12e   : > { %9449 = vst [vmem:[#allocation10_spill] sm:$0xff] %v7832_v44  ;;  %2843 = vmatprep.mubr.bf16.mxu0 %v7279_v39  ;;  %6854 = vmatprep.mubr.msk.bf16.mxu1 %vm2280_vm1, %v7280_v40  ;;  %v7296_v38 = vld [vmem:[%s7603_s7 + $0x1a0] ss:$12 sps:$4 sm:$0xff]   ;;  %v7299_v39 = vld [vmem:[%s7603_s7 + $0x31c] ss:$12 sps:$4 sm:$0xff]  }
 0x12f   : > { %v2647_v45 = vpop.f32.mrf.mxu0  ;;  %v3239_v46 = vpop.f32.mrf.mxu1  ;;  %v7300_v40 = vld [vmem:[%s7603_s7 + $0x1b8] ss:$12 sps:$4 sm:$0xff]   ;;  %v7362_v44 = vld [vmem:[%s7603_s7 + $0x450] ss:$12 sps:$4 sm:$0xff]  }
 0x131   : > { %v7836_v47 = vpop.f32.mrf.mxu0  ;;  %v7838_v48 = vpop.f32.mrf.mxu1 }
 0x132   : > { %9450 = vst [vmem:[#allocation11_spill] sm:$0xff] %v7838_v48  ;;  %v7357_v48 = vld [vmem:[%s7603_s7 + $0x438] ss:$12 sps:$4 sm:$0xff]  }
 0x133   : > { %v2650_v53 = vpop.f32.mrf.mxu0  ;;  %v3242_v54 = vpop.f32.mrf.mxu1 }
 0x134   : > { %v7297_v53 = vld [vmem:[%s7603_s7 + $0x318] ss:$12 sps:$4 sm:$0xff]   ;;  %v7301_v54 = vld [vmem:[%s7603_s7 + $0x1d0] ss:$12 sps:$4 sm:$0xff]  }
 0x135   : > { %v7844_v55 = vpop.f32.mrf.mxu0  ;;  %2844 = vmatmul.mubr.bf16.gmra.mxu0 %v7277_v49  ;;  %v7846_v56 = vpop.f32.mrf.mxu1  ;;  %6855 = vmatmul.mubr.msk.bf16.gmra.mxu1 %vm2280_vm1, %v7281_v50 }
 0x136   : > { %9451 = vst [vmem:[#allocation12_spill] sm:$0xff] %v7846_v56  ;;  %2851 = vmatprep.mubr.bf16.mxu0 %v7284_v51  ;;  %6858 = vmatprep.mubr.msk.bf16.mxu1 %vm2280_vm1, %v7285_v52 }
 0x137   : > { %v2655_v57 = vpop.f32.mrf.mxu0  ;;  %v3247_v58 = vpop.f32.mrf.mxu1 }
 0x138   : > { %v7304_v57 = vld [vmem:[%s7603_s7 + $0x334] ss:$12 sps:$4 sm:$0xff]  }
 0x139   : > { %v7850_v61 = vpop.f32.mrf.mxu0  ;;  %v7852_v62 = vpop.f32.mrf.mxu1  ;;  %v7305_v58 = vld [vmem:[%s7603_s7 + $0x1e8] ss:$12 sps:$4 sm:$0xff]  }
 0x13a   : > { %9452 = vst [vmem:[#allocation13_spill] sm:$0xff] %v7852_v62 }
 0x13b   : > { %v2658_v5 = vpop.f32.mrf.mxu0  ;;  %v3250_v6 = vpop.f32.mrf.mxu1 }
 0x13d   : > { %v7858_v9 = vpop.f32.mrf.mxu0  ;;  %2852 = vmatmul.mubr.bf16.gmra.mxu0 %v7282_v1  ;;  %v7860_v10 = vpop.f32.mrf.mxu1  ;;  %6859 = vmatmul.mubr.msk.bf16.gmra.mxu1 %vm2280_vm1, %v7286_v2 }
 0x13e   : > { %9453 = vst [vmem:[#allocation14_spill] sm:$0xff] %v7860_v10  ;;  %2859 = vmatprep.mubr.bf16.mxu0 %v7289_v3  ;;  %6862 = vmatprep.mubr.msk.bf16.mxu1 %vm2280_vm1, %v7290_v4  ;;  %v7352_v10 = vld [vmem:[%s7603_s7 + $0x420] ss:$12 sps:$4 sm:$0xff]  }
 0x13f   : > { %v2663_v13 = vpop.f32.mrf.mxu0  ;;  %v3255_v14 = vpop.f32.mrf.mxu1 }
 0x141   : > { %v7864_v15 = vpop.f32.mrf.mxu0  ;;  %v7866_v16 = vpop.f32.mrf.mxu1 }
 0x142   : > { %9454 = vst [vmem:[#allocation15_spill] sm:$0xff] %v7866_v16  ;;  %v7347_v16 = vld [vmem:[%s7603_s7 + $0x408] ss:$12 sps:$4 sm:$0xff]  }
 0x143   : > { %v2666_v25 = vpop.f32.mrf.mxu0  ;;  %v3258_v26 = vpop.f32.mrf.mxu1 }
 0x145   : > { %v7872_v27 = vpop.f32.mrf.mxu0  ;;  %2860 = vmatmul.mubr.bf16.gmra.mxu0 %v7287_v17  ;;  %v7874_v28 = vpop.f32.mrf.mxu1  ;;  %6863 = vmatmul.mubr.msk.bf16.gmra.mxu1 %vm2280_vm1, %v7291_v18  ;;  %v7302_v17 = vld [vmem:[%s7603_s7 + $0x330] ss:$12 sps:$4 sm:$0xff]   ;;  %v7306_v18 = vld [vmem:[%s7603_s7 + $0x200] ss:$12 sps:$4 sm:$0xff]  }
 0x146   : > { %9455 = vst [vmem:[#allocation16_spill] sm:$0xff] %v7874_v28  ;;  %2867 = vmatprep.mubr.bf16.mxu0 %v7294_v21  ;;  %6866 = vmatprep.mubr.msk.bf16.mxu1 %vm2280_vm1, %v7295_v22  ;;  %v7309_v21 = vld [vmem:[%s7603_s7 + $0x34c] ss:$12 sps:$4 sm:$0xff]  }
 0x147   : > { %v2671_v29 = vpop.f32.mrf.mxu0  ;;  %v3263_v30 = vpop.f32.mrf.mxu1  ;;  %v7310_v22 = vld [vmem:[%s7603_s7 + $0x218] ss:$12 sps:$4 sm:$0xff]  }
 0x149   : > { %v7878_v33 = vpop.f32.mrf.mxu0  ;;  %v7880_v34 = vpop.f32.mrf.mxu1 }
 0x14a   : > { %9456 = vst [vmem:[#allocation17_spill] sm:$0xff] %v7880_v34 }
 0x14b   : > { %v2674_v41 = vpop.f32.mrf.mxu0  ;;  %v3266_v42 = vpop.f32.mrf.mxu1 }
 0x14c   : > { %v7307_v41 = vld [vmem:[%s7603_s7 + $0x348] ss:$12 sps:$4 sm:$0xff]   ;;  %v7311_v42 = vld [vmem:[%s7603_s7 + $0x230] ss:$12 sps:$4 sm:$0xff]  }
 0x14d   : > { %v7886_v45 = vpop.f32.mrf.mxu0  ;;  %2868 = vmatmul.mubr.bf16.gmra.mxu0 %v7292_v37  ;;  %v7888_v46 = vpop.f32.mrf.mxu1  ;;  %6867 = vmatmul.mubr.msk.bf16.gmra.mxu1 %vm2280_vm1, %v7296_v38 }
 0x14e   : > { %9457 = vst [vmem:[#allocation18_spill] sm:$0xff] %v7888_v46  ;;  %2875 = vmatprep.mubr.bf16.mxu0 %v7299_v39  ;;  %6870 = vmatprep.mubr.msk.bf16.mxu1 %vm2280_vm1, %v7300_v40  ;;  %v7342_v46 = vld [vmem:[%s7603_s7 + $0x3f0] ss:$12 sps:$4 sm:$0xff]  }
 0x14f   : > { %v2679_v49 = vpop.f32.mrf.mxu0  ;;  %v3271_v50 = vpop.f32.mrf.mxu1 }
 0x150   : > { %v7314_v49 = vld [vmem:[%s7603_s7 + $0x364] ss:$12 sps:$4 sm:$0xff]   ;;  %v7315_v50 = vld [vmem:[%s7603_s7 + $0x248] ss:$12 sps:$4 sm:$0xff]  }
 0x151   : > { %v7892_v51 = vpop.f32.mrf.mxu0  ;;  %v7894_v52 = vpop.f32.mrf.mxu1 }
 0x152   : > { %9458 = vst [vmem:[#allocation19_spill] sm:$0xff] %v7894_v52  ;;  %v7337_v52 = vld [vmem:[%s7603_s7 + $0x3d8] ss:$12 sps:$4 sm:$0xff]  }
 0x153   : > { %v2682_v1 = vpop.f32.mrf.mxu0  ;;  %v3274_v2 = vpop.f32.mrf.mxu1 }
 0x155   : > { %v7900_v3 = vpop.f32.mrf.mxu0  ;;  %2876 = vmatmul.mubr.bf16.gmra.mxu0 %v7297_v53  ;;  %v7902_v4 = vpop.f32.mrf.mxu1  ;;  %6871 = vmatmul.mubr.msk.bf16.gmra.mxu1 %vm2280_vm1, %v7301_v54 }
 0x156   : > { %9459 = vst [vmem:[#allocation20_spill] sm:$0xff] %v7902_v4  ;;  %2883 = vmatprep.mubr.bf16.mxu0 %v7304_v57  ;;  %6874 = vmatprep.mubr.msk.bf16.mxu1 %vm2280_vm1, %v7305_v58 }
 0x157   : > { %v2687_v5 = vpop.f32.mrf.mxu0  ;;  %v3279_v6 = vpop.f32.mrf.mxu1 }
 0x159   : > { %v7906_v13 = vpop.f32.mrf.mxu0  ;;  %v7908_v14 = vpop.f32.mrf.mxu1 }
 0x15a   : > { %9460 = vst [vmem:[#allocation21_spill] sm:$0xff] %v7908_v14 }
 0x15b   : > { %v2690_v25 = vpop.f32.mrf.mxu0  ;;  %v3282_v26 = vpop.f32.mrf.mxu1 }
 0x15d   : > { %v7914_v29 = vpop.f32.mrf.mxu0  ;;  %2884 = vmatmul.mubr.bf16.gmra.mxu0 %v7302_v17  ;;  %v7916_v30 = vpop.f32.mrf.mxu1  ;;  %6875 = vmatmul.mubr.msk.bf16.gmra.mxu1 %vm2280_vm1, %v7306_v18  ;;  %v7312_v17 = vld [vmem:[%s7603_s7 + $0x360] ss:$12 sps:$4 sm:$0xff]  }
 0x15e   : > { %9461 = vst [vmem:[#allocation22_spill] sm:$0xff] %v7916_v30  ;;  %2891 = vmatprep.mubr.bf16.mxu0 %v7309_v21  ;;  %6878 = vmatprep.mubr.msk.bf16.mxu1 %vm2280_vm1, %v7310_v22  ;;  %v7316_v18 = vld [vmem:[%s7603_s7 + $0x260] ss:$12 sps:$4 sm:$0xff]   ;;  %v7319_v21 = vld [vmem:[%s7603_s7 + $0x37c] ss:$12 sps:$4 sm:$0xff]  }
 0x15f   : > { %v2695_v37 = vpop.f32.mrf.mxu0  ;;  %v3287_v38 = vpop.f32.mrf.mxu1  ;;  %v7320_v22 = vld [vmem:[%s7603_s7 + $0x278] ss:$12 sps:$4 sm:$0xff]   ;;  %v7332_v30 = vld [vmem:[%s7603_s7 + $0x3c0] ss:$12 sps:$4 sm:$0xff]  }
 0x161   : > { %v7920_v39 = vpop.f32.mrf.mxu0  ;;  %v7922_v40 = vpop.f32.mrf.mxu1 }
 0x162   : > { %9462 = vst [vmem:[#allocation23_spill] sm:$0xff] %v7922_v40  ;;  %v7327_v40 = vld [vmem:[%s7603_s7 + $0x3a8] ss:$12 sps:$4 sm:$0xff]  }
 0x163   : > { %v2698_v53 = vpop.f32.mrf.mxu0  ;;  %v3290_v54 = vpop.f32.mrf.mxu1 }
 0x164   : > { %v7317_v53 = vld [vmem:[%s7603_s7 + $0x378] ss:$12 sps:$4 sm:$0xff]   ;;  %v7321_v54 = vld [vmem:[%s7603_s7 + $0x290] ss:$12 sps:$4 sm:$0xff]  }
 0x165   : > { %v7928_v57 = vpop.f32.mrf.mxu0  ;;  %2892 = vmatmul.mubr.bf16.gmra.mxu0 %v7307_v41  ;;  %v7930_v58 = vpop.f32.mrf.mxu1  ;;  %6879 = vmatmul.mubr.msk.bf16.gmra.mxu1 %vm2280_vm1, %v7311_v42 }
 0x166   : > { %9463 = vst [vmem:[#allocation24_spill] sm:$0xff] %v7930_v58  ;;  %2899 = vmatprep.mubr.bf16.mxu0 %v7314_v49  ;;  %6882 = vmatprep.mubr.msk.bf16.mxu1 %vm2280_vm1, %v7315_v50 }
 0x167   : > { %v2703_v1 = vpop.f32.mrf.mxu0  ;;  %v3295_v2 = vpop.f32.mrf.mxu1 }
 0x168   : > { %v7324_v1 = vld [vmem:[%s7603_s7 + $0x394] ss:$12 sps:$4 sm:$0xff]  }
 0x169   : > { %v7934_v5 = vpop.f32.mrf.mxu0  ;;  %v7936_v6 = vpop.f32.mrf.mxu1  ;;  %v7325_v2 = vld [vmem:[%s7603_s7 + $0x2a8] ss:$12 sps:$4 sm:$0xff]  }
 0x16a   : > { %9464 = vst [vmem:[#allocation25_spill] sm:$0xff] %v7936_v6 }
 0x16b   : > { %v2706_v25 = vpop.f32.mrf.mxu0  ;;  %v3298_v26 = vpop.f32.mrf.mxu1 }
 0x16d   : > { %v7942_v37 = vpop.f32.mrf.mxu0  ;;  %2900 = vmatmul.mubr.bf16.gmra.mxu0 %v7312_v17  ;;  %v7944_v38 = vpop.f32.mrf.mxu1  ;;  %6883 = vmatmul.mubr.msk.bf16.gmra.mxu1 %vm2280_vm1, %v7316_v18 }
 0x16e   : > { %9465 = vst [vmem:[#allocation26_spill] sm:$0xff] %v7944_v38  ;;  %2907 = vmatprep.mubr.bf16.mxu0 %v7319_v21  ;;  %6886 = vmatprep.mubr.msk.bf16.mxu1 %vm2280_vm1, %v7320_v22 }
 0x16f   : > { %v2711_v41 = vpop.f32.mrf.mxu0  ;;  %v3303_v42 = vpop.f32.mrf.mxu1 }
 0x171   : > { %v7948_v49 = vpop.f32.mrf.mxu0  ;;  %v7950_v50 = vpop.f32.mrf.mxu1 }
 0x172   : > { %9466 = vst [vmem:[#allocation27_spill] sm:$0xff] %v7950_v50  ;;  %v7322_v50 = vld [vmem:[%s7603_s7 + $0x390] ss:$12 sps:$4 sm:$0xff]  }
 0x173   : > { %v2714_v17 = vpop.f32.mrf.mxu0  ;;  %v3306_v25 = vpop.f32.mrf.mxu1 }
 0x174   : > { %v7326_v17 = vld [vmem:[%s7603_s7 + $0x2c0] ss:$12 sps:$4 sm:$0xff]  }
 0x175   : > { %v7956_v18 = vpop.f32.mrf.mxu0  ;;  %2908 = vmatmul.mubr.bf16.gmra.mxu0 %v7317_v53  ;;  %v7958_v21 = vpop.f32.mrf.mxu1  ;;  %6887 = vmatmul.mubr.msk.bf16.gmra.mxu1 %vm2280_vm1, %v7321_v54  ;;  %v7329_v25 = vld [vmem:[%s7603_s7 + $0x3ac] ss:$12 sps:$4 sm:$0xff]  }
 0x176   : > { %9467 = vst [vmem:[#allocation28_spill] sm:$0xff] %v7958_v21  ;;  %2915 = vmatprep.mubr.bf16.mxu0 %v7324_v1  ;;  %6890 = vmatprep.mubr.msk.bf16.mxu1 %vm2280_vm1, %v7325_v2  ;;  %v7330_v53 = vld [vmem:[%s7603_s7 + $0x2d8] ss:$12 sps:$4 sm:$0xff]  }
 0x177   : > { %v2719_v22 = vpop.f32.mrf.mxu0  ;;  %v3311_v26 = vpop.f32.mrf.mxu1 }
 0x179   : > { %v7962_v41 = vpop.f32.mrf.mxu0  ;;  %v7964_v42 = vpop.f32.mrf.mxu1 }
 0x17a   : > { %9468 = vst [vmem:[#allocation29_spill] sm:$0xff] %v7964_v42 }
 0x17b   : > { %v2722_v38 = vpop.f32.mrf.mxu0  ;;  %v3314_v21 = vpop.f32.mrf.mxu1 }
 0x17c   : > { %v7331_v38 = vld [vmem:[%s7603_s7 + $0x2f0] ss:$12 sps:$4 sm:$0xff]  }
 0x17d   : > { %v7970_v54 = vpop.f32.mrf.mxu0  ;;  %2916 = vmatmul.mubr.bf16.gmra.mxu0 %v7322_v50  ;;  %v7972_v1 = vpop.f32.mrf.mxu1  ;;  %6891 = vmatmul.mubr.msk.bf16.gmra.mxu1 %vm2280_vm1, %v7326_v17  ;;  %v7334_v21 = vld [vmem:[%s7603_s7 + $0x3c4] ss:$12 sps:$4 sm:$0xff]   ;;  %v7335_v50 = vld [vmem:[%s7603_s7 + $0x308] ss:$12 sps:$4 sm:$0xff]  }
 0x17e   : > { %9469 = vst [vmem:[#allocation30_spill] sm:$0xff] %v7972_v1  ;;  %2923 = vmatprep.mubr.bf16.mxu0 %v7329_v25  ;;  %6894 = vmatprep.mubr.msk.bf16.mxu1 %vm2280_vm1, %v7330_v53 }
 0x17f   : > { %v2727_v2 = vpop.f32.mrf.mxu0  ;;  %v3319_v22 = vpop.f32.mrf.mxu1 }
 0x181   : > { %v7976_v26 = vpop.f32.mrf.mxu0  ;;  %v7978_v42 = vpop.f32.mrf.mxu1 }
 0x182   : > { %9470 = vst [vmem:[#allocation31_spill] sm:$0xff] %v7978_v42 }
 0x183   : > { %v2730_v1 = vpop.f32.mrf.mxu0  ;;  %v3322_v6 = vpop.f32.mrf.mxu1 }
 0x184   : > { %v7336_v1 = vld [vmem:[%s7603_s7 + $0x320] ss:$12 sps:$4 sm:$0xff]   ;;  %v7339_v6 = vld [vmem:[%s7603_s7 + $0x3dc] ss:$12 sps:$4 sm:$0xff]  }
 0x185   : > { %v7984_v17 = vpop.f32.mrf.mxu0  ;;  %2924 = vmatmul.mubr.bf16.gmra.mxu0 %v7327_v40  ;;  %v7986_v25 = vpop.f32.mrf.mxu1  ;;  %6895 = vmatmul.mubr.msk.bf16.gmra.mxu1 %vm2280_vm1, %v7331_v38  ;;  %v7340_v40 = vld [vmem:[%s7603_s7 + $0x338] ss:$12 sps:$4 sm:$0xff]  }
 0x186   : > { %9471 = vst [vmem:[#allocation32_spill] sm:$0xff] %v7986_v25  ;;  %2931 = vmatprep.mubr.bf16.mxu0 %v7334_v21  ;;  %6898 = vmatprep.mubr.msk.bf16.mxu1 %vm2280_vm1, %v7335_v50 }
 0x187   : > { %v2735_v53 = vpop.f32.mrf.mxu0  ;;  %v3327_v2 = vpop.f32.mrf.mxu1 }
 0x189   : > { %v7990_v22 = vpop.f32.mrf.mxu0  ;;  %v7992_v42 = vpop.f32.mrf.mxu1 }
 0x18a   : > { %9472 = vst [vmem:[#allocation33_spill] sm:$0xff] %v7992_v42 }
 0x18b   : > { %v2738_v25 = vpop.f32.mrf.mxu0  ;;  %v3330_v58 = vpop.f32.mrf.mxu1 }
 0x18c   : > { %v7341_v25 = vld [vmem:[%s7603_s7 + $0x350] ss:$12 sps:$4 sm:$0xff]   ;;  %v7344_v58 = vld [vmem:[%s7603_s7 + $0x3f4] ss:$12 sps:$4 sm:$0xff]  }
 0x18d   : > { %v7998_v38 = vpop.f32.mrf.mxu0  ;;  %2932 = vmatmul.mubr.bf16.gmra.mxu0 %v7332_v30  ;;  %v8000_v21 = vpop.f32.mrf.mxu1  ;;  %6899 = vmatmul.mubr.msk.bf16.gmra.mxu1 %vm2280_vm1, %v7336_v1  ;;  %v7345_v30 = vld [vmem:[%s7603_s7 + $0x368] ss:$12 sps:$4 sm:$0xff]  }
 0x18e   : > { %9473 = vst [vmem:[#allocation34_spill] sm:$0xff] %v8000_v21  ;;  %2939 = vmatprep.mubr.bf16.mxu0 %v7339_v6  ;;  %6902 = vmatprep.mubr.msk.bf16.mxu1 %vm2280_vm1, %v7340_v40 }
 0x18f   : > { %v2743_v50 = vpop.f32.mrf.mxu0  ;;  %v3335_v53 = vpop.f32.mrf.mxu1 }
 0x191   : > { %v8004_v2 = vpop.f32.mrf.mxu0  ;;  %v8006_v42 = vpop.f32.mrf.mxu1 }
 0x192   : > { %9474 = vst [vmem:[#allocation35_spill] sm:$0xff] %v8006_v42 }
 0x193   : > { %v2746_v21 = vpop.f32.mrf.mxu0  ;;  %v3338_v14 = vpop.f32.mrf.mxu1 }
 0x194   : > { %v7346_v21 = vld [vmem:[%s7603_s7 + $0x380] ss:$12 sps:$4 sm:$0xff]  }
 0x195   : > { %v8012_v1 = vpop.f32.mrf.mxu0  ;;  %2940 = vmatmul.mubr.bf16.gmra.mxu0 %v7337_v52  ;;  %v8014_v6 = vpop.f32.mrf.mxu1  ;;  %6903 = vmatmul.mubr.msk.bf16.gmra.mxu1 %vm2280_vm1, %v7341_v25  ;;  %v7349_v14 = vld [vmem:[%s7603_s7 + $0x40c] ss:$12 sps:$4 sm:$0xff]  }
 0x196   : > { %9475 = vst [vmem:[#allocation36_spill] sm:$0xff] %v8014_v6  ;;  %2947 = vmatprep.mubr.bf16.mxu0 %v7344_v58  ;;  %6906 = vmatprep.mubr.msk.bf16.mxu1 %vm2280_vm1, %v7345_v30  ;;  %v7350_v52 = vld [vmem:[%s7603_s7 + $0x398] ss:$12 sps:$4 sm:$0xff]  }
 0x197   : > { %v2751_v40 = vpop.f32.mrf.mxu0  ;;  %v3343_v50 = vpop.f32.mrf.mxu1 }
 0x199   : > { %v8018_v53 = vpop.f32.mrf.mxu0  ;;  %v8020_v42 = vpop.f32.mrf.mxu1 }
 0x19a   : > { %9476 = vst [vmem:[#allocation37_spill] sm:$0xff] %v8020_v42 }
 0x19b   : > { %v2754_v6 = vpop.f32.mrf.mxu0  ;;  %v3346_v4 = vpop.f32.mrf.mxu1 }
 0x19c   : > { %v7351_v6 = vld [vmem:[%s7603_s7 + $0x3b0] ss:$12 sps:$4 sm:$0xff]  }
 0x19d   : > { %v8026_v25 = vpop.f32.mrf.mxu0  ;;  %2948 = vmatmul.mubr.bf16.gmra.mxu0 %v7342_v46  ;;  %v8028_v58 = vpop.f32.mrf.mxu1  ;;  %6907 = vmatmul.mubr.msk.bf16.gmra.mxu1 %vm2280_vm1, %v7346_v21  ;;  %v7354_v4 = vld [vmem:[%s7603_s7 + $0x424] ss:$12 sps:$4 sm:$0xff]   ;;  %v7355_v46 = vld [vmem:[%s7603_s7 + $0x3c8] ss:$12 sps:$4 sm:$0xff]  }
 0x19e   : > { %9477 = vst [vmem:[#allocation38_spill] sm:$0xff] %v8028_v58  ;;  %2955 = vmatprep.mubr.bf16.mxu0 %v7349_v14  ;;  %6910 = vmatprep.mubr.msk.bf16.mxu1 %vm2280_vm1, %v7350_v52 }
 0x19f   : > { %v2759_v30 = vpop.f32.mrf.mxu0  ;;  %v3351_v40 = vpop.f32.mrf.mxu1 }
 0x1a1   : > { %v8032_v50 = vpop.f32.mrf.mxu0  ;;  %v8034_v42 = vpop.f32.mrf.mxu1 }
 0x1a2   : > { %9478 = vst [vmem:[#allocation39_spill] sm:$0xff] %v8034_v42 }
 0x1a3   : > { %v2762_v58 = vpop.f32.mrf.mxu0  ;;  %v3354_v34 = vpop.f32.mrf.mxu1 }
 0x1a4   : > { %v7356_v58 = vld [vmem:[%s7603_s7 + $0x3e0] ss:$12 sps:$4 sm:$0xff]   ;;  %v7359_v34 = vld [vmem:[%s7603_s7 + $0x43c] ss:$12 sps:$4 sm:$0xff]  }
 0x1a5   : > { %v8040_v21 = vpop.f32.mrf.mxu0  ;;  %2956 = vmatmul.mubr.bf16.gmra.mxu0 %v7347_v16  ;;  %v8042_v14 = vpop.f32.mrf.mxu1  ;;  %6911 = vmatmul.mubr.msk.bf16.gmra.mxu1 %vm2280_vm1, %v7351_v6  ;;  %v7360_v16 = vld [vmem:[%s7603_s7 + $0x3f8] ss:$12 sps:$4 sm:$0xff]  }
 0x1a6   : > { %9479 = vst [vmem:[#allocation40_spill] sm:$0xff] %v8042_v14  ;;  %2963 = vmatprep.mubr.bf16.mxu0 %v7354_v4  ;;  %6914 = vmatprep.mubr.msk.bf16.mxu1 %vm2280_vm1, %v7355_v46 }
 0x1a7   : > { %v2767_v52 = vpop.f32.mrf.mxu0  ;;  %v3359_v30 = vpop.f32.mrf.mxu1 }
 0x1a9   : > { %v8046_v40 = vpop.f32.mrf.mxu0  ;;  %v8048_v42 = vpop.f32.mrf.mxu1 }
 0x1aa   : > { %9480 = vst [vmem:[#allocation41_spill] sm:$0xff] %v8048_v42 }
 0x1ab   : > { %v2770_v14 = vpop.f32.mrf.mxu0  ;;  %v3362_v28 = vpop.f32.mrf.mxu1 }
 0x1ac   : > { %v7361_v14 = vld [vmem:[%s7603_s7 + $0x410] ss:$12 sps:$4 sm:$0xff]   ;;  %v7364_v28 = vld [vmem:[%s7603_s7 + $0x454] ss:$12 sps:$4 sm:$0xff]  }
 0x1ad   : > { %v8054_v6 = vpop.f32.mrf.mxu0  ;;  %2964 = vmatmul.mubr.bf16.gmra.mxu0 %v7352_v10  ;;  %v8056_v4 = vpop.f32.mrf.mxu1  ;;  %6915 = vmatmul.mubr.msk.bf16.gmra.mxu1 %vm2280_vm1, %v7356_v58  ;;  %v7365_v10 = vld [vmem:[%s7603_s7 + $0x428] ss:$12 sps:$4 sm:$0xff]  }
 0x1ae   : > { %9481 = vst [vmem:[#allocation42_spill] sm:$0xff] %v8056_v4  ;;  %2971 = vmatprep.mubr.bf16.mxu0 %v7359_v34  ;;  %6918 = vmatprep.mubr.msk.bf16.mxu1 %vm2280_vm1, %v7360_v16 }
 0x1af   : > { %v2775_v46 = vpop.f32.mrf.mxu0  ;;  %v3367_v52 = vpop.f32.mrf.mxu1 }
 0x1b1   : > { %v8060_v30 = vpop.f32.mrf.mxu0  ;;  %v8062_v42 = vpop.f32.mrf.mxu1 }
 0x1b2   : > { %9482 = vst [vmem:[#allocation43_spill] sm:$0xff] %v8062_v42 }
 0x1b3   : > { %v2778_v4 = vpop.f32.mrf.mxu0  ;;  %v3370_v62 = vpop.f32.mrf.mxu1 }
 0x1b4   : > { %v7366_v4 = vld [vmem:[%s7603_s7 + $0x440] ss:$12 sps:$4 sm:$0xff]  }
 0x1b5   : > { %v8068_v58 = vpop.f32.mrf.mxu0  ;;  %2972 = vmatmul.mubr.bf16.gmra.mxu0 %v7357_v48  ;;  %v8070_v34 = vpop.f32.mrf.mxu1  ;;  %6919 = vmatmul.mubr.msk.bf16.gmra.mxu1 %vm2280_vm1, %v7361_v14  ;;  %v7369_v62 = vld [vmem:[%s7603_s7 + $0x46c] ss:$12 sps:$4 sm:$0xff]  }
 0x1b6   : > { %9483 = vst [vmem:[#allocation44_spill] sm:$0xff] %v8070_v34  ;;  %2979 = vmatprep.mubr.bf16.mxu0 %v7364_v28  ;;  %6922 = vmatprep.mubr.msk.bf16.mxu1 %vm2280_vm1, %v7365_v10  ;;  %v7370_v48 = vld [vmem:[%s7603_s7 + $0x458] ss:$12 sps:$4 sm:$0xff]  }
 0x1b7   : > { %v2783_v16 = vpop.f32.mrf.mxu0  ;;  %v3375_v46 = vpop.f32.mrf.mxu1 }
 0x1b9   : > { %v8074_v52 = vpop.f32.mrf.mxu0  ;;  %v8076_v42 = vpop.f32.mrf.mxu1 }
 0x1ba   : > { %9484 = vst [vmem:[#allocation45_spill] sm:$0xff] %v8076_v42 }
 0x1bb   : > { %v2786_v34 = vpop.f32.mrf.mxu0  ;;  %v3378_v56 = vpop.f32.mrf.mxu1 }
 0x1bc   : > { %v7371_v34 = vld [vmem:[%s7603_s7 + $0x470] ss:$12 sps:$4 sm:$0xff]  }
 0x1bd   : > { %v8082_v14 = vpop.f32.mrf.mxu0  ;;  %2980 = vmatmul.mubr.bf16.gmra.mxu0 %v7362_v44  ;;  %v8084_v28 = vpop.f32.mrf.mxu1  ;;  %6923 = vmatmul.mubr.msk.bf16.gmra.mxu1 %vm2280_vm1, %v7366_v4  ;;  %v7374_v56 = vld [vmem:[%s7603_s7 + $0x484] ss:$12 sps:$4 sm:$0xff]   ;;  %v7375_v44 = vld [vmem:[%s7603_s7 + $0x488] ss:$12 sps:$4 sm:$0xff]  }
 0x1be   : > { %9485 = vst [vmem:[#allocation46_spill] sm:$0xff] %v8084_v28  ;;  %2987 = vmatprep.mubr.bf16.mxu0 %v7369_v62  ;;  %6926 = vmatprep.mubr.msk.bf16.mxu1 %vm2280_vm1, %v7370_v48 }
 0x1bf   : > { %v2791_v10 = vpop.f32.mrf.mxu0  ;;  %v3383_v16 = vpop.f32.mrf.mxu1 }
 0x1c1   : > { %v8088_v46 = vpop.f32.mrf.mxu0  ;;  %v8090_v42 = vpop.f32.mrf.mxu1 }
 0x1c2   : > { %9486 = vst [vmem:[#allocation47_spill] sm:$0xff] %v8088_v46  ;;  %9487 = vst [vmem:[#allocation48_spill] sm:$0xff] %v8090_v42 }
 0x1c3   : > { %v2794_v28 = vpop.f32.mrf.mxu0  ;;  %v3386_v36 = vpop.f32.mrf.mxu1 }
 0x1c4   : > { %v7379_v28 = vld [vmem:[%s7603_s7 + $0x49c] ss:$12 sps:$4 sm:$0xff]   ;;  %v7380_v36 = vld [vmem:[%s7603_s7 + $0x4b8] ss:$12 sps:$4 sm:$0xff]  }
 0x1c5   : > { %v8096_v4 = vpop.f32.mrf.mxu0  ;;  %2988 = vmatmul.mubr.bf16.gmra.mxu0 %v7367_v24  ;;  %v8098_v62 = vpop.f32.mrf.mxu1  ;;  %6927 = vmatmul.mubr.msk.bf16.gmra.mxu1 %vm2280_vm1, %v7371_v34 }
 0x1c6   : > { %9488 = vst [vmem:[#allocation49_spill] sm:$0xff] %v8098_v62  ;;  %2995 = vmatprep.mubr.bf16.mxu0 %v7374_v56  ;;  %6930 = vmatprep.mubr.msk.bf16.mxu1 %vm2280_vm1, %v7375_v44  ;;  %v8115_v56 = vld [vmem:[%s9438_s2] ss:$0 sm:$0xff] }
 0x1c7   : > { %v2799_v48 = vpop.f32.mrf.mxu0  ;;  %v3391_v10 = vpop.f32.mrf.mxu1 }
 0x1c9   : > { %v8102_v16 = vpop.f32.mrf.mxu0  ;;  %v8104_v42 = vpop.f32.mrf.mxu1 }
 0x1ca   : > { %9489 = vst [vmem:[#allocation50_spill] sm:$0xff] %v8104_v42 }
 0x1cb   : > { %v2802_v0 = vpop.f32.mrf.mxu0  ;;  %v3394_v12 = vpop.f32.mrf.mxu1 }
 0x1cc   : > { %v8123_v0 = vld [vmem:[%s9439_s3] ss:$0 sm:$0xff] }
 0x1cd   : > { %v8110_v24 = vpop.f32.mrf.mxu0  ;;  %2996 = vmatmul.mubr.bf16.gmra.mxu0 %v7372_v20  ;;  %v6836_v34 = vpop.f32.mrf.mxu1  ;;  %6931 = vmatmul.mubr.msk.bf16.gmra.mxu1 %vm2280_vm1, %v7376_v32 }
 0x1ce   : > { %9490 = vst [vmem:[#allocation51_spill] sm:$0xff] %v8110_v24  ;;  %v3439_v44 = vadd.f32 %v6836_v34, %v7788_v7  ;;  %3003 = vmatprep.mubr.bf16.mxu0 %v7379_v28  ;;  %6934 = vmatprep.mubr.msk.bf16.mxu1 %vm2280_vm1, %v7380_v36  ;;  %v7377_v7 = vld [vmem:[%s7603_s7 + $0x498] ss:$12 sps:$4 sm:$0xff]   ;;  %v7381_v34 = vld [vmem:[%s7603_s7 + $0x4d0] ss:$12 sps:$4 sm:$0xff]  }
 0x1cf   : > { %v2807_v12 = vpop.f32.mrf.mxu0  ;;  %v3430_v20 = vpop.f32.mrf.mxu1 }
 0x1d0   : > { %v4222_v48 = vmul.f32 %v8115_v56, %v3439_v44  ;;  %v3431_v10 = vadd.f32 %v3430_v20, %v7774_v59 }
 0x1d1   : > { %v8127_v42 = vpop.f32.mrf.mxu0  ;;  %v6837_v32 = vpop.f32.mrf.mxu1 }
 0x1d2   : > { %9491 = vst [vmem:[#allocation52_spill] sm:$0xff] %v8127_v42  ;;  %v4425_v28 = vadd.f32 %v8123_v0, %v4222_v48  ;;  %v4220_v36 = vmul.f32 %v8115_v56, %v3431_v10  ;;  %v3442_v62 = vadd.f32 %v6837_v32, %v7794_v11 }
 0x1d3   : > { %v2810_v12 = vpop.f32.mrf.mxu0  ;;  %v3433_v24 = vpop.f32.mrf.mxu1 }
 0x1d4   : > { %v4621_v46 = vmax.f32 %v4425_v28, 0.0  ;;  %v4423_v44 = vadd.f32 %v8123_v0, %v4220_v36  ;;  %v4223_v59 = vmul.f32 %v8115_v56, %v3442_v62  ;;  %v3434_v20 = vadd.f32 %v3433_v24, %v7780_v63 }
 0x1d5   : > { %v8145_v48 = vpop.f32.mrf.mxu0  ;;  %3004 = vmatmul.mubr.bf16.gmra.mxu0 %v7377_v7  ;;  %v6840_v11 = vpop.f32.mrf.mxu1  ;;  %6935 = vmatmul.mubr.msk.bf16.gmra.mxu1 %vm2280_vm1, %v7381_v34 }
 0x1d6   : > { %v6533_v10 = vpack.c.bf16 %v4621_v46, %v4621_v46  ;;  %v4619_v32 = vmax.f32 %v4423_v44, 0.0  ;;  %v4426_v62 = vadd.f32 %v8123_v0, %v4223_v59  ;;  %v4221_v63 = vmul.f32 %v8115_v56, %v3434_v20  ;;  %3011 = vmatprep.mubr.bf16.mxu0 %v7384_v60  ;;  %6938 = vmatprep.mubr.msk.bf16.mxu1 %vm2280_vm1, %v7385_v8  ;;  %v7382_v59 = vld [vmem:[%s7603_s7 + $0x4b0] ss:$12 sps:$4 sm:$0xff]  }
 0x1d7   : > { %v3455_v24 = vadd.f32 %v6840_v11, %v7816_v31  ;;  %v2815_v28 = vpop.f32.mrf.mxu0  ;;  %v3446_v36 = vpop.f32.mrf.mxu1  ;;  %v7386_v31 = vld [vmem:[%s7603_s7 + $0x500] ss:$12 sps:$4 sm:$0xff]  }
 0x1d8   : > { %5602 = vst.msk [vmem:[%s8143_s21 + $0x8] sm:$0xf] %vm5599_vm2, %v6533_v10  ;;  %v6531_v46 = vpack.c.bf16 %v4619_v32, %v4619_v32  ;;  %v4622_v7 = vmax.f32 %v4426_v62, 0.0  ;;  %v4424_v34 = vadd.f32 %v8123_v0, %v4221_v63  ;;  %v3447_v12 = vadd.f32 %v3446_v36, %v7802_v19  ;;  %v7389_v62 = vld [vmem:[%s7603_s7 + $0x4cc] ss:$12 sps:$4 sm:$0xff]  }
 0x1d9   : > { %v4226_v44 = vmul.f32 %v8115_v56, %v3455_v24  ;;  %v8157_v60 = vpop.f32.mrf.mxu0  ;;  %v6841_v8 = vpop.f32.mrf.mxu1  ;;  %v7390_v63 = vld [vmem:[%s7603_s7 + $0x518] ss:$12 sps:$4 sm:$0xff]  }
 0x1da   : > { %5600 = vst.msk [vmem:[%s8143_s21] sm:$0xf] %vm5599_vm2, %v6531_v46  ;;  %v6534_v20 = vpack.c.bf16 %v4622_v7, %v4622_v7  ;;  %v4620_v11 = vmax.f32 %v4424_v34, 0.0  ;;  %v4224_v10 = vmul.f32 %v8115_v56, %v3447_v12  ;;  %v3458_v32 = vadd.f32 %v6841_v8, %v7822_v35 }
 0x1db   : > { %v4429_v19 = vadd.f32 %v8123_v0, %v4226_v44  ;;  %v2818_v28 = vpop.f32.mrf.mxu0  ;;  %v3449_v24 = vpop.f32.mrf.mxu1 }
 0x1dc   : > { %5603 = vst.msk [vmem:[%s8143_s21 + $0xc] sm:$0xf] %vm5599_vm2, %v6534_v20  ;;  %v6532_v36 = vpack.c.bf16 %v4620_v11, %v4620_v11  ;;  %v4427_v42 = vadd.f32 %v8123_v0, %v4224_v10  ;;  %v4227_v46 = vmul.f32 %v8115_v56, %v3458_v32  ;;  %v3450_v7 = vadd.f32 %v3449_v24, %v7808_v23  ;;  %v7391_v24 = vld [vmem:[%s7603_s7 + $0x530] ss:$12 sps:$4 sm:$0xff]  }
 0x1dd   : > { %v4625_v34 = vmax.f32 %v4429_v19, 0.0  ;;  %v8173_v12 = vpop.f32.mrf.mxu0  ;;  %3012 = vmatmul.mubr.bf16.gmra.mxu0 %v7382_v59  ;;  %v6844_v35 = vpop.f32.mrf.mxu1  ;;  %6939 = vmatmul.mubr.msk.bf16.gmra.mxu1 %vm2280_vm1, %v7386_v31 }
 0x1de   : > { %5601 = vst.msk [vmem:[%s8143_s21 + $0x4] sm:$0xf] %vm5599_vm2, %v6532_v36  ;;  %v4623_v44 = vmax.f32 %v4427_v42, 0.0  ;;  %v4430_v8 = vadd.f32 %v8123_v0, %v4227_v46  ;;  %v4225_v20 = vmul.f32 %v8115_v56, %v3450_v7  ;;  %v3471_v11 = vadd.f32 %v6844_v35, %v7844_v55  ;;  %3019 = vmatprep.mubr.bf16.mxu0 %v7389_v62  ;;  %v7394_v35 = vld [vmem:[%s7603_s7 + $0x4e4] ss:$12 sps:$4 sm:$0xff]  }
 0x1df   : > { %6942 = vmatprep.mubr.msk.bf16.mxu1 %vm2280_vm1, %v7390_v63  ;;  %v6537_v23 = vpack.c.bf16 %v4625_v34, %v4625_v34  ;;  %v2823_v59 = vpop.f32.mrf.mxu0  ;;  %v3462_v10 = vpop.f32.mrf.mxu1  ;;  %v7387_v63 = vld [vmem:[%s7603_s7 + $0x4c8] ss:$12 sps:$4 sm:$0xff]  }
 0x1e0   : > { %v6535_v31 = vpack.c.bf16 %v4623_v44, %v4623_v44  ;;  %v4626_v32 = vmax.f32 %v4430_v8, 0.0  ;;  %v4428_v42 = vadd.f32 %v8123_v0, %v4225_v20  ;;  %v4230_v19 = vmul.f32 %v8115_v56, %v3471_v11 }
 0x1e1   : > { %5606 = vst.msk [vmem:[%s8143_s21 + $0x18] sm:$0xf] %vm5599_vm2, %v6537_v23  ;;  %v3463_v55 = vadd.f32 %v3462_v10, %v7830_v43  ;;  %v8187_v28 = vpop.f32.mrf.mxu0  ;;  %v6845_v62 = vpop.f32.mrf.mxu1  ;;  %v7395_v43 = vld [vmem:[%s7603_s7 + $0x548] ss:$12 sps:$4 sm:$0xff]  }
 0x1e2   : > { %5604 = vst.msk [vmem:[%s8143_s21 + $0x10] sm:$0xf] %vm5599_vm2, %v6535_v31  ;;  %v6538_v36 = vpack.c.bf16 %v4626_v32, %v4626_v32  ;;  %v4624_v46 = vmax.f32 %v4428_v42, 0.0  ;;  %v4433_v7 = vadd.f32 %v8123_v0, %v4230_v19  ;;  %v3474_v34 = vadd.f32 %v6845_v62, %v7850_v61 }
 0x1e3   : > { %v4228_v44 = vmul.f32 %v8115_v56, %v3463_v55  ;;  %v2826_v8 = vpop.f32.mrf.mxu0  ;;  %v3465_v20 = vpop.f32.mrf.mxu1 }
 0x1e4   : > { %5607 = vst.msk [vmem:[%s8143_s21 + $0x1c] sm:$0xf] %vm5599_vm2, %v6538_v36  ;;  %v6536_v11 = vpack.c.bf16 %v4624_v46, %v4624_v46  ;;  %v4629_v23 = vmax.f32 %v4433_v7, 0.0  ;;  %v4231_v59 = vmul.f32 %v8115_v56, %v3474_v34  ;;  %v3466_v10 = vadd.f32 %v3465_v20, %v7836_v47  ;;  %v7392_v8 = vld [vmem:[%s7603_s7 + $0x4e0] ss:$12 sps:$4 sm:$0xff]  }
 0x1e5   : > { %v4431_v31 = vadd.f32 %v8123_v0, %v4228_v44  ;;  %v8203_v32 = vpop.f32.mrf.mxu0  ;;  %3020 = vmatmul.mubr.bf16.gmra.mxu0 %v7387_v63  ;;  %v6848_v61 = vpop.f32.mrf.mxu1  ;;  %6943 = vmatmul.mubr.msk.bf16.gmra.mxu1 %vm2280_vm1, %v7391_v24  ;;  %v7396_v20 = vld [vmem:[%s7603_s7 + $0x560] ss:$12 sps:$4 sm:$0xff]  }
 0x1e6   : > { %5605 = vst.msk [vmem:[%s8143_s21 + $0x14] sm:$0xf] %vm5599_vm2, %v6536_v11  ;;  %v6541_v42 = vpack.c.bf16 %v4629_v23, %v4629_v23  ;;  %v4434_v19 = vadd.f32 %v8123_v0, %v4231_v59  ;;  %v4229_v55 = vmul.f32 %v8115_v56, %v3466_v10  ;;  %v3487_v47 = vadd.f32 %v6848_v61, %v7872_v27  ;;  %v7399_v10 = vld [vmem:[%s7603_s7 + $0x4fc] ss:$12 sps:$4 sm:$0xff]  }
 0x1e7   : > { %3027 = vmatprep.mubr.bf16.mxu0 %v7394_v35  ;;  %v4627_v62 = vmax.f32 %v4431_v31, 0.0  ;;  %v2831_v36 = vpop.f32.mrf.mxu0  ;;  %v3478_v46 = vpop.f32.mrf.mxu1  ;;  %6946 = vmatprep.mubr.msk.bf16.mxu1 %vm2280_vm1, %v7395_v43  ;;  %v7400_v31 = vld [vmem:[%s7603_s7 + $0x578] ss:$12 sps:$4 sm:$0xff]  }
 0x1e8   : > { %5610 = vst.msk [vmem:[%s8143_s21 + $0x28] sm:$0xf] %vm5599_vm2, %v6541_v42  ;;  %v4630_v63 = vmax.f32 %v4434_v19, 0.0  ;;  %v4432_v24 = vadd.f32 %v8123_v0, %v4229_v55  ;;  %v4234_v7 = vmul.f32 %v8115_v56, %v3487_v47  ;;  %v3479_v34 = vadd.f32 %v3478_v46, %v7858_v9 }
 0x1e9   : > { %v6539_v27 = vpack.c.bf16 %v4627_v62, %v4627_v62  ;;  %v8217_v35 = vpop.f32.mrf.mxu0  ;;  %v6849_v44 = vpop.f32.mrf.mxu1 }
 0x1ea   : > { %v6542_v11 = vpack.c.bf16 %v4630_v63, %v4630_v63  ;;  %v4628_v43 = vmax.f32 %v4432_v24, 0.0  ;;  %v4437_v23 = vadd.f32 %v8123_v0, %v4234_v7  ;;  %v4232_v59 = vmul.f32 %v8115_v56, %v3479_v34 }
 0x1eb   : > { %5608 = vst.msk [vmem:[%s8143_s21 + $0x20] sm:$0xf] %vm5599_vm2, %v6539_v27  ;;  %v3490_v9 = vadd.f32 %v6849_v44, %v7878_v33  ;;  %v2834_v61 = vpop.f32.mrf.mxu0  ;;  %v3481_v42 = vpop.f32.mrf.mxu1 }
 0x1ec   : > { %5611 = vst.msk [vmem:[%s8143_s21 + $0x2c] sm:$0xf] %vm5599_vm2, %v6542_v11  ;;  %v6540_v19 = vpack.c.bf16 %v4628_v43, %v4628_v43  ;;  %v4633_v55 = vmax.f32 %v4437_v23, 0.0  ;;  %v4435_v47 = vadd.f32 %v8123_v0, %v4232_v59  ;;  %v3482_v62 = vadd.f32 %v3481_v42, %v7864_v15 }
 0x1ed   : > { %v4235_v36 = vmul.f32 %v8115_v56, %v3490_v9  ;;  %v8233_v46 = vpop.f32.mrf.mxu0  ;;  %3028 = vmatmul.mubr.bf16.gmra.mxu0 %v7392_v8  ;;  %v6852_v63 = vpop.f32.mrf.mxu1  ;;  %6947 = vmatmul.mubr.msk.bf16.gmra.mxu1 %vm2280_vm1, %v7396_v20 }
 0x1ee   : > { %5609 = vst.msk [vmem:[%s8143_s21 + $0x24] sm:$0xf] %vm5599_vm2, %v6540_v19  ;;  %v6545_v33 = vpack.c.bf16 %v4633_v55, %v4633_v55  ;;  %v4631_v24 = vmax.f32 %v4435_v47, 0.0  ;;  %v4233_v7 = vmul.f32 %v8115_v56, %v3482_v62  ;;  %v3503_v34 = vadd.f32 %v6852_v63, %v7900_v3  ;;  %3035 = vmatprep.mubr.bf16.mxu0 %v7399_v10  ;;  %v7397_v10 = vld [vmem:[%s7603_s7 + $0x4f8] ss:$12 sps:$4 sm:$0xff]  }
 0x1ef   : > { %6950 = vmatprep.mubr.msk.bf16.mxu1 %vm2280_vm1, %v7400_v31  ;;  %v4438_v15 = vadd.f32 %v8123_v0, %v4235_v36  ;;  %v2839_v27 = vpop.f32.mrf.mxu0  ;;  %v3494_v44 = vpop.f32.mrf.mxu1  ;;  %v7401_v31 = vld [vmem:[%s7603_s7 + $0x590] ss:$12 sps:$4 sm:$0xff]   ;;  %v7404_v55 = vld [vmem:[%s7603_s7 + $0x514] ss:$12 sps:$4 sm:$0xff]  }
 0x1f0   : > { %5614 = vst.msk [vmem:[%s8143_s21 + $0x38] sm:$0xf] %vm5599_vm2, %v6545_v33  ;;  %v6543_v8 = vpack.c.bf16 %v4631_v24, %v4631_v24  ;;  %v4436_v20 = vadd.f32 %v8123_v0, %v4233_v7  ;;  %v4238_v11 = vmul.f32 %v8115_v56, %v3503_v34  ;;  %v3495_v43 = vadd.f32 %v3494_v44, %v7886_v45  ;;  %v7405_v47 = vld [vmem:[%s7603_s7 + $0x5a8] ss:$12 sps:$4 sm:$0xff]  }
 0x1f1   : > { %v4634_v3 = vmax.f32 %v4438_v15, 0.0  ;;  %v8247_v23 = vpop.f32.mrf.mxu0  ;;  %v6853_v59 = vpop.f32.mrf.mxu1 }
 0x1f2   : > { %5612 = vst.msk [vmem:[%s8143_s21 + $0x30] sm:$0xf] %vm5599_vm2, %v6543_v8  ;;  %v4632_v9 = vmax.f32 %v4436_v20, 0.0  ;;  %v4441_v61 = vadd.f32 %v8123_v0, %v4238_v11  ;;  %v4236_v42 = vmul.f32 %v8115_v56, %v3495_v43  ;;  %v3506_v19 = vadd.f32 %v6853_v59, %v7906_v13 }
 0x1f3   : > { %v6546_v45 = vpack.c.bf16 %v4634_v3, %v4634_v3  ;;  %v2842_v62 = vpop.f32.mrf.mxu0  ;;  %v3497_v36 = vpop.f32.mrf.mxu1 }
 0x1f4   : > { %v6544_v63 = vpack.c.bf16 %v4632_v9, %v4632_v9  ;;  %v4637_v33 = vmax.f32 %v4441_v61, 0.0  ;;  %v4439_v24 = vadd.f32 %v8123_v0, %v4236_v42  ;;  %v4239_v7 = vmul.f32 %v8115_v56, %v3506_v19  ;;  %v7402_v42 = vld [vmem:[%s7603_s7 + $0x510] ss:$12 sps:$4 sm:$0xff]   ;;  %v7406_v19 = vld [vmem:[%s7603_s7 + $0x5c0] ss:$12 sps:$4 sm:$0xff]  }
 0x1f5   : > { %5615 = vst.msk [vmem:[%s8143_s21 + $0x3c] sm:$0xf] %vm5599_vm2, %v6546_v45  ;;  %v3498_v34 = vadd.f32 %v3497_v36, %v7892_v51  ;;  %v8263_v15 = vpop.f32.mrf.mxu0  ;;  %3036 = vmatmul.mubr.bf16.gmra.mxu0 %v7397_v10  ;;  %v6856_v13 = vpop.f32.mrf.mxu1  ;;  %6951 = vmatmul.mubr.msk.bf16.gmra.mxu1 %vm2280_vm1, %v7401_v31  ;;  %v7409_v36 = vld [vmem:[%s7603_s7 + $0x52c] ss:$12 sps:$4 sm:$0xff]  }
 0x1f6   : > { %5613 = vst.msk [vmem:[%s8143_s21 + $0x34] sm:$0xf] %vm5599_vm2, %v6544_v63  ;;  %v6549_v27 = vpack.c.bf16 %v4637_v33, %v4637_v33  ;;  %v4635_v44 = vmax.f32 %v4439_v24, 0.0  ;;  %v4442_v8 = vadd.f32 %v8123_v0, %v4239_v7  ;;  %v3519_v20 = vadd.f32 %v6856_v13, %v7928_v57  ;;  %3043 = vmatprep.mubr.bf16.mxu0 %v7404_v55  ;;  %v7410_v63 = vld [vmem:[%s7603_s7 + $0x5d8] ss:$12 sps:$4 sm:$0xff]  }
 0x1f7   : > { %6954 = vmatprep.mubr.msk.bf16.mxu1 %vm2280_vm1, %v7405_v47  ;;  %v4237_v51 = vmul.f32 %v8115_v56, %v3498_v34  ;;  %v2847_v11 = vpop.f32.mrf.mxu0  ;;  %v3510_v43 = vpop.f32.mrf.mxu1 }
 0x1f8   : > { %5618 = vst.msk [vmem:[%s8143_s21 + $0x48] sm:$0xf] %vm5599_vm2, %v6549_v27  ;;  %v6547_v3 = vpack.c.bf16 %v4635_v44, %v4635_v44  ;;  %v4638_v59 = vmax.f32 %v4442_v8, 0.0  ;;  %v4242_v10 = vmul.f32 %v8115_v56, %v3519_v20  ;;  %v3511_v31 = vadd.f32 %v3510_v43, %v7914_v29 }
 0x1f9   : > { %v4440_v57 = vadd.f32 %v8123_v0, %v4237_v51  ;;  %v8277_v9 = vpop.f32.mrf.mxu0  ;;  %v6857_v61 = vpop.f32.mrf.mxu1 }
 0x1fa   : > { %5616 = vst.msk [vmem:[%s8143_s21 + $0x40] sm:$0xf] %vm5599_vm2, %v6547_v3  ;;  %v6550_v55 = vpack.c.bf16 %v4638_v59, %v4638_v59  ;;  %v4445_v47 = vadd.f32 %v8123_v0, %v4242_v10  ;;  %v4240_v45 = vmul.f32 %v8115_v56, %v3511_v31  ;;  %v3522_v62 = vadd.f32 %v6857_v61, %v7934_v5 }
 0x1fb   : > { %v4636_v29 = vmax.f32 %v4440_v57, 0.0  ;;  %v2850_v33 = vpop.f32.mrf.mxu0  ;;  %v3513_v24 = vpop.f32.mrf.mxu1 }
 0x1fc   : > { %5619 = vst.msk [vmem:[%s8143_s21 + $0x4c] sm:$0xf] %vm5599_vm2, %v6550_v55  ;;  %v4641_v7 = vmax.f32 %v4445_v47, 0.0  ;;  %v4443_v34 = vadd.f32 %v8123_v0, %v4240_v45  ;;  %v4243_v13 = vmul.f32 %v8115_v56, %v3522_v62  ;;  %v3514_v27 = vadd.f32 %v3513_v24, %v7920_v39  ;;  %v7407_v47 = vld [vmem:[%s7603_s7 + $0x528] ss:$12 sps:$4 sm:$0xff]  }
 0x1fd   : > { %v6548_v44 = vpack.c.bf16 %v4636_v29, %v4636_v29  ;;  %v8293_v8 = vpop.f32.mrf.mxu0  ;;  %3044 = vmatmul.mubr.bf16.gmra.mxu0 %v7402_v42  ;;  %v6860_v5 = vpop.f32.mrf.mxu1  ;;  %6955 = vmatmul.mubr.msk.bf16.gmra.mxu1 %vm2280_vm1, %v7406_v19  ;;  %v7414_v29 = vld [vmem:[%s7603_s7 + $0x544] ss:$12 sps:$4 sm:$0xff]   ;;  %v7415_v33 = vld [vmem:[%s7603_s7 + $0x608] ss:$12 sps:$4 sm:$0xff]  }
 0x1fe   : > { %v6553_v20 = vpack.c.bf16 %v4641_v7, %v4641_v7  ;;  %v4639_v51 = vmax.f32 %v4443_v34, 0.0  ;;  %v4446_v11 = vadd.f32 %v8123_v0, %v4243_v13  ;;  %v4241_v43 = vmul.f32 %v8115_v56, %v3514_v27  ;;  %3051 = vmatprep.mubr.bf16.mxu0 %v7409_v36  ;;  %6958 = vmatprep.mubr.msk.bf16.mxu1 %vm2280_vm1, %v7410_v63 }
 0x1ff   : > { %5617 = vst.msk [vmem:[%s8143_s21 + $0x44] sm:$0xf] %vm5599_vm2, %v6548_v44  ;;  %v3535_v39 = vadd.f32 %v6860_v5, %v7956_v18  ;;  %v2855_v3 = vpop.f32.mrf.mxu0  ;;  %v3526_v59 = vpop.f32.mrf.mxu1  ;;  %v7411_v18 = vld [vmem:[%s7603_s7 + $0x5f0] ss:$12 sps:$4 sm:$0xff]  }
 0x200   : > { %5622 = vst.msk [vmem:[%s8143_s21 + $0x58] sm:$0xf] %vm5599_vm2, %v6553_v20  ;;  %v6551_v10 = vpack.c.bf16 %v4639_v51, %v4639_v51  ;;  %v4642_v31 = vmax.f32 %v4446_v11, 0.0  ;;  %v4444_v57 = vadd.f32 %v8123_v0, %v4241_v43  ;;  %v3527_v61 = vadd.f32 %v3526_v59, %v7942_v37 }
 0x201   : > { %v4246_v42 = vmul.f32 %v8115_v56, %v3535_v39  ;;  %v8307_v19 = vpop.f32.mrf.mxu0  ;;  %v6861_v55 = vpop.f32.mrf.mxu1 }
 0x202   : > { %5620 = vst.msk [vmem:[%s8143_s21 + $0x50] sm:$0xf] %vm5599_vm2, %v6551_v10  ;;  %v6554_v45 = vpack.c.bf16 %v4642_v31, %v4642_v31  ;;  %v4640_v62 = vmax.f32 %v4444_v57, 0.0  ;;  %v4244_v36 = vmul.f32 %v8115_v56, %v3527_v61  ;;  %v3538_v63 = vadd.f32 %v6861_v55, %v7962_v41 }
 0x203   : > { %v4449_v37 = vadd.f32 %v8123_v0, %v4246_v42  ;;  %v2858_v24 = vpop.f32.mrf.mxu0  ;;  %v3529_v7 = vpop.f32.mrf.mxu1 }
 0x204   : > { %5623 = vst.msk [vmem:[%s8143_s21 + $0x5c] sm:$0xf] %vm5599_vm2, %v6554_v45  ;;  %v6552_v34 = vpack.c.bf16 %v4640_v62, %v4640_v62  ;;  %v4447_v13 = vadd.f32 %v8123_v0, %v4244_v36  ;;  %v4247_v27 = vmul.f32 %v8115_v56, %v3538_v63  ;;  %v3530_v44 = vadd.f32 %v3529_v7, %v7948_v49 }
 0x205   : > { %v4645_v5 = vmax.f32 %v4449_v37, 0.0  ;;  %v8323_v20 = vpop.f32.mrf.mxu0  ;;  %3052 = vmatmul.mubr.bf16.gmra.mxu0 %v7407_v47  ;;  %v6864_v41 = vpop.f32.mrf.mxu1  ;;  %6959 = vmatmul.mubr.msk.bf16.gmra.mxu1 %vm2280_vm1, %v7411_v18  ;;  %v7412_v47 = vld [vmem:[%s7603_s7 + $0x540] ss:$12 sps:$4 sm:$0xff]  }
 0x206   : > { %5621 = vst.msk [vmem:[%s8143_s21 + $0x54] sm:$0xf] %vm5599_vm2, %v6552_v34  ;;  %v4643_v51 = vmax.f32 %v4447_v13, 0.0  ;;  %v4450_v11 = vadd.f32 %v8123_v0, %v4247_v27  ;;  %v4245_v43 = vmul.f32 %v8115_v56, %v3530_v44  ;;  %v3551_v39 = vadd.f32 %v6864_v41, %v7984_v17  ;;  %3059 = vmatprep.mubr.bf16.mxu0 %v7414_v29  ;;  %v7416_v18 = vld [vmem:[%s7603_s7 + $0x620] ss:$12 sps:$4 sm:$0xff]  }
 0x207   : > { %6962 = vmatprep.mubr.msk.bf16.mxu1 %vm2280_vm1, %v7415_v33  ;;  %v6557_v49 = vpack.c.bf16 %v4645_v5, %v4645_v5  ;;  %v2863_v3 = vpop.f32.mrf.mxu0  ;;  %v3542_v59 = vpop.f32.mrf.mxu1  ;;  %v7419_v29 = vld [vmem:[%s7603_s7 + $0x55c] ss:$12 sps:$4 sm:$0xff]  }
 0x208   : > { %v6555_v10 = vpack.c.bf16 %v4643_v51, %v4643_v51  ;;  %v4646_v31 = vmax.f32 %v4450_v11, 0.0  ;;  %v4448_v57 = vadd.f32 %v8123_v0, %v4245_v43  ;;  %v4250_v61 = vmul.f32 %v8115_v56, %v3551_v39 }
 0x209   : > { %5626 = vst.msk [vmem:[%s8143_s21 + $0x68] sm:$0xf] %vm5599_vm2, %v6557_v49  ;;  %v3543_v17 = vadd.f32 %v3542_v59, %v7970_v54  ;;  %v8337_v42 = vpop.f32.mrf.mxu0  ;;  %v6865_v55 = vpop.f32.mrf.mxu1  ;;  %v7420_v54 = vld [vmem:[%s7603_s7 + $0x638] ss:$12 sps:$4 sm:$0xff]  }
 0x20a   : > { %5624 = vst.msk [vmem:[%s8143_s21 + $0x60] sm:$0xf] %vm5599_vm2, %v6555_v10  ;;  %v6558_v45 = vpack.c.bf16 %v4646_v31, %v4646_v31  ;;  %v4644_v62 = vmax.f32 %v4448_v57, 0.0  ;;  %v4453_v36 = vadd.f32 %v8123_v0, %v4250_v61  ;;  %v3554_v63 = vadd.f32 %v6865_v55, %v7990_v22  ;;  %v7421_v55 = vld [vmem:[%s7603_s7 + $0x650] ss:$12 sps:$4 sm:$0xff]  }
 0x20b   : > { %v4248_v33 = vmul.f32 %v8115_v56, %v3543_v17  ;;  %v2866_v37 = vpop.f32.mrf.mxu0  ;;  %v3545_v24 = vpop.f32.mrf.mxu1  ;;  %v7417_v17 = vld [vmem:[%s7603_s7 + $0x558] ss:$12 sps:$4 sm:$0xff]  }
 0x20c   : > { %5627 = vst.msk [vmem:[%s8143_s21 + $0x6c] sm:$0xf] %vm5599_vm2, %v6558_v45  ;;  %v6556_v7 = vpack.c.bf16 %v4644_v62, %v4644_v62  ;;  %v4649_v34 = vmax.f32 %v4453_v36, 0.0  ;;  %v4251_v13 = vmul.f32 %v8115_v56, %v3554_v63  ;;  %v3546_v27 = vadd.f32 %v3545_v24, %v7976_v26  ;;  %v7424_v36 = vld [vmem:[%s7603_s7 + $0x574] ss:$12 sps:$4 sm:$0xff]  }
 0x20d   : > { %v4451_v44 = vadd.f32 %v8123_v0, %v4248_v33  ;;  %v8353_v5 = vpop.f32.mrf.mxu0  ;;  %3060 = vmatmul.mubr.bf16.gmra.mxu0 %v7412_v47  ;;  %v6868_v22 = vpop.f32.mrf.mxu1  ;;  %6963 = vmatmul.mubr.msk.bf16.gmra.mxu1 %vm2280_vm1, %v7416_v18  ;;  %v7425_v63 = vld [vmem:[%s7603_s7 + $0x668] ss:$12 sps:$4 sm:$0xff]  }
 0x20e   : > { %5625 = vst.msk [vmem:[%s8143_s21 + $0x64] sm:$0xf] %vm5599_vm2, %v6556_v7  ;;  %v6561_v41 = vpack.c.bf16 %v4649_v34, %v4649_v34  ;;  %v4454_v51 = vadd.f32 %v8123_v0, %v4251_v13  ;;  %v4249_v11 = vmul.f32 %v8115_v56, %v3546_v27  ;;  %v3567_v26 = vadd.f32 %v6868_v22, %v8012_v1 }
 0x20f   : > { %3067 = vmatprep.mubr.bf16.mxu0 %v7419_v29  ;;  %v4647_v43 = vmax.f32 %v4451_v44, 0.0  ;;  %v2871_v39 = vpop.f32.mrf.mxu0  ;;  %v3558_v49 = vpop.f32.mrf.mxu1  ;;  %6966 = vmatprep.mubr.msk.bf16.mxu1 %vm2280_vm1, %v7420_v54 }
 0x210   : > { %5630 = vst.msk [vmem:[%s8143_s21 + $0x78] sm:$0xf] %vm5599_vm2, %v6561_v41  ;;  %v4650_v3 = vmax.f32 %v4454_v51, 0.0  ;;  %v4452_v59 = vadd.f32 %v8123_v0, %v4249_v11  ;;  %v4254_v10 = vmul.f32 %v8115_v56, %v3567_v26  ;;  %v3559_v31 = vadd.f32 %v3558_v49, %v7998_v38 }
 0x211   : > { %v6559_v1 = vpack.c.bf16 %v4647_v43, %v4647_v43  ;;  %v8367_v57 = vpop.f32.mrf.mxu0  ;;  %v6869_v61 = vpop.f32.mrf.mxu1 }
 0x212   : > { %v6562_v47 = vpack.c.bf16 %v4650_v3, %v4650_v3  ;;  %v4648_v18 = vmax.f32 %v4452_v59, 0.0  ;;  %v4457_v45 = vadd.f32 %v8123_v0, %v4254_v10  ;;  %v4252_v62 = vmul.f32 %v8115_v56, %v3559_v31  ;;  %v7422_v10 = vld [vmem:[%s7603_s7 + $0x570] ss:$12 sps:$4 sm:$0xff]   ;;  %v7426_v31 = vld [vmem:[%s7603_s7 + $0x680] ss:$12 sps:$4 sm:$0xff]  }
 0x213   : > { %5628 = vst.msk [vmem:[%s8143_s21 + $0x70] sm:$0xf] %vm5599_vm2, %v6559_v1  ;;  %v3570_v38 = vadd.f32 %v6869_v61, %v8018_v53  ;;  %v2874_v29 = vpop.f32.mrf.mxu0  ;;  %v3561_v33 = vpop.f32.mrf.mxu1 }
 0x214   : > { %5631 = vst.msk [vmem:[%s8143_s21 + $0x7c] sm:$0xf] %vm5599_vm2, %v6562_v47  ;;  %v6560_v37 = vpack.c.bf16 %v4648_v18, %v4648_v18  ;;  %v4653_v24 = vmax.f32 %v4457_v45, 0.0  ;;  %v4455_v54 = vadd.f32 %v8123_v0, %v4252_v62  ;;  %v3562_v7 = vadd.f32 %v3561_v33, %v8004_v2  ;;  %v7429_v47 = vld [vmem:[%s7603_s7 + $0x58c] ss:$12 sps:$4 sm:$0xff]  }
 0x215   : > { %v4255_v34 = vmul.f32 %v8115_v56, %v3570_v38  ;;  %v8383_v13 = vpop.f32.mrf.mxu0  ;;  %3068 = vmatmul.mubr.bf16.gmra.mxu0 %v7417_v17  ;;  %v6872_v27 = vpop.f32.mrf.mxu1  ;;  %6967 = vmatmul.mubr.msk.bf16.gmra.mxu1 %vm2280_vm1, %v7421_v55  ;;  %v7430_v18 = vld [vmem:[%s7603_s7 + $0x698] ss:$12 sps:$4 sm:$0xff]  }
 0x216   : > { %5629 = vst.msk [vmem:[%s8143_s21 + $0x74] sm:$0xf] %vm5599_vm2, %v6560_v37  ;;  %v6565_v53 = vpack.c.bf16 %v4653_v24, %v4653_v24  ;;  %v4651_v44 = vmax.f32 %v4455_v54, 0.0  ;;  %v4253_v22 = vmul.f32 %v8115_v56, %v3562_v7  ;;  %v3583_v41 = vadd.f32 %v6872_v27, %v8040_v21  ;;  %3075 = vmatprep.mubr.bf16.mxu0 %v7424_v36 }
 0x217   : > { %6970 = vmatprep.mubr.msk.bf16.mxu1 %vm2280_vm1, %v7425_v63  ;;  %v4458_v2 = vadd.f32 %v8123_v0, %v4255_v34  ;;  %v2879_v51 = vpop.f32.mrf.mxu0  ;;  %v3574_v11 = vpop.f32.mrf.mxu1 }
 0x218   : > { %5634 = vst.msk [vmem:[%s8143_s21 + $0x88] sm:$0xf] %vm5599_vm2, %v6565_v53  ;;  %v6563_v26 = vpack.c.bf16 %v4651_v44, %v4651_v44  ;;  %v4456_v43 = vadd.f32 %v8123_v0, %v4253_v22  ;;  %v4258_v39 = vmul.f32 %v8115_v56, %v3583_v41  ;;  %v3575_v49 = vadd.f32 %v3574_v11, %v8026_v25 }
 0x219   : > { %v4654_v21 = vmax.f32 %v4458_v2, 0.0  ;;  %v8397_v3 = vpop.f32.mrf.mxu0  ;;  %v6873_v59 = vpop.f32.mrf.mxu1 }
 0x21a   : > { %5632 = vst.msk [vmem:[%s8143_s21 + $0x80] sm:$0xf] %vm5599_vm2, %v6563_v26  ;;  %v4652_v1 = vmax.f32 %v4456_v43, 0.0  ;;  %v4461_v61 = vadd.f32 %v8123_v0, %v4258_v39  ;;  %v4256_v17 = vmul.f32 %v8115_v56, %v3575_v49  ;;  %v3586_v55 = vadd.f32 %v6873_v59, %v8046_v40  ;;  %v7427_v26 = vld [vmem:[%s7603_s7 + $0x588] ss:$12 sps:$4 sm:$0xff]  }
 0x21b   : > { %v6566_v25 = vpack.c.bf16 %v4654_v21, %v4654_v21  ;;  %v2882_v45 = vpop.f32.mrf.mxu0  ;;  %v3577_v62 = vpop.f32.mrf.mxu1  ;;  %v7431_v43 = vld [vmem:[%s7603_s7 + $0x6b0] ss:$12 sps:$4 sm:$0xff]  }
 0x21c   : > { %v6564_v36 = vpack.c.bf16 %v4652_v1, %v4652_v1  ;;  %v4657_v63 = vmax.f32 %v4461_v61, 0.0  ;;  %v4459_v38 = vadd.f32 %v8123_v0, %v4256_v17  ;;  %v4259_v29 = vmul.f32 %v8115_v56, %v3586_v55 }
 0x21d   : > { %5635 = vst.msk [vmem:[%s8143_s21 + $0x8c] sm:$0xf] %vm5599_vm2, %v6566_v25  ;;  %v3578_v33 = vadd.f32 %v3577_v62, %v8032_v50  ;;  %v8413_v37 = vpop.f32.mrf.mxu0  ;;  %3076 = vmatmul.mubr.bf16.gmra.mxu0 %v7422_v10  ;;  %v6876_v40 = vpop.f32.mrf.mxu1  ;;  %6971 = vmatmul.mubr.msk.bf16.gmra.mxu1 %vm2280_vm1, %v7426_v31  ;;  %v7434_v10 = vld [vmem:[%s7603_s7 + $0x5a4] ss:$12 sps:$4 sm:$0xff]   ;;  %v7435_v31 = vld [vmem:[%s7603_s7 + $0x6c8] ss:$12 sps:$4 sm:$0xff]  }
 0x21e   : > { %5633 = vst.msk [vmem:[%s8143_s21 + $0x84] sm:$0xf] %vm5599_vm2, %v6564_v36  ;;  %v6569_v24 = vpack.c.bf16 %v4657_v63, %v4657_v63  ;;  %v4655_v54 = vmax.f32 %v4459_v38, 0.0  ;;  %v4462_v7 = vadd.f32 %v8123_v0, %v4259_v29  ;;  %v3599_v34 = vadd.f32 %v6876_v40, %v8068_v58  ;;  %3083 = vmatprep.mubr.bf16.mxu0 %v7429_v47 }
 0x21f   : > { %6974 = vmatprep.mubr.msk.bf16.mxu1 %vm2280_vm1, %v7430_v18  ;;  %v4257_v50 = vmul.f32 %v8115_v56, %v3578_v33  ;;  %v2887_v27 = vpop.f32.mrf.mxu0  ;;  %v3590_v53 = vpop.f32.mrf.mxu1 }
 0x220   : > { %5638 = vst.msk [vmem:[%s8143_s21 + $0x98] sm:$0xf] %vm5599_vm2, %v6569_v24  ;;  %v6567_v44 = vpack.c.bf16 %v4655_v54, %v4655_v54  ;;  %v4658_v22 = vmax.f32 %v4462_v7, 0.0  ;;  %v4262_v41 = vmul.f32 %v8115_v56, %v3599_v34  ;;  %v3591_v2 = vadd.f32 %v3590_v53, %v8054_v6  ;;  %v7432_v53 = vld [vmem:[%s7603_s7 + $0x5a0] ss:$12 sps:$4 sm:$0xff]  }
 0x221   : > { %v4460_v58 = vadd.f32 %v8123_v0, %v4257_v50  ;;  %v8427_v51 = vpop.f32.mrf.mxu0  ;;  %v6877_v11 = vpop.f32.mrf.mxu1 }
 0x222   : > { %5636 = vst.msk [vmem:[%s8143_s21 + $0x90] sm:$0xf] %vm5599_vm2, %v6567_v44  ;;  %v6570_v39 = vpack.c.bf16 %v4658_v22, %v4658_v22  ;;  %v4465_v49 = vadd.f32 %v8123_v0, %v4262_v41  ;;  %v4260_v21 = vmul.f32 %v8115_v56, %v3591_v2  ;;  %v3602_v59 = vadd.f32 %v6877_v11, %v8074_v52  ;;  %v7440_v11 = vld [vmem:[%s7603_s7 + $0x6f8] ss:$12 sps:$4 sm:$0xff]  }
 0x223   : > { %v4656_v6 = vmax.f32 %v4460_v58, 0.0  ;;  %v2890_v1 = vpop.f32.mrf.mxu0  ;;  %v3593_v61 = vpop.f32.mrf.mxu1  ;;  %v7439_v58 = vld [vmem:[%s7603_s7 + $0x5bc] ss:$12 sps:$4 sm:$0xff]  }
 0x224   : > { %5639 = vst.msk [vmem:[%s8143_s21 + $0x9c] sm:$0xf] %vm5599_vm2, %v6570_v39  ;;  %v4661_v17 = vmax.f32 %v4465_v49, 0.0  ;;  %v4463_v55 = vadd.f32 %v8123_v0, %v4260_v21  ;;  %v4263_v47 = vmul.f32 %v8115_v56, %v3602_v59  ;;  %v3594_v18 = vadd.f32 %v3593_v61, %v8060_v30  ;;  %v9492_v59 = vld [vmem:[#allocation47_spill] sm:$0xff] }
 0x225   : > { %v6568_v25 = vpack.c.bf16 %v4656_v6, %v4656_v6  ;;  %v8443_v45 = vpop.f32.mrf.mxu0  ;;  %3084 = vmatmul.mubr.bf16.gmra.mxu0 %v7427_v26  ;;  %v6880_v52 = vpop.f32.mrf.mxu1  ;;  %6975 = vmatmul.mubr.msk.bf16.gmra.mxu1 %vm2280_vm1, %v7431_v43 }
 0x226   : > { %v6573_v62 = vpack.c.bf16 %v4661_v17, %v4661_v17  ;;  %v4659_v36 = vmax.f32 %v4463_v55, 0.0  ;;  %v4466_v63 = vadd.f32 %v8123_v0, %v4263_v47  ;;  %v4261_v38 = vmul.f32 %v8115_v56, %v3594_v18  ;;  %3091 = vmatprep.mubr.bf16.mxu0 %v7434_v10  ;;  %6978 = vmatprep.mubr.msk.bf16.mxu1 %vm2280_vm1, %v7435_v31 }
 0x227   : > { %5637 = vst.msk [vmem:[%s8143_s21 + $0x94] sm:$0xf] %vm5599_vm2, %v6568_v25  ;;  %v3615_v30 = vadd.f32 %v6880_v52, %v8096_v4  ;;  %v2895_v29 = vpop.f32.mrf.mxu0  ;;  %v3606_v33 = vpop.f32.mrf.mxu1  ;;  %v7436_v4 = vld [vmem:[%s7603_s7 + $0x6e0] ss:$12 sps:$4 sm:$0xff]  }
 0x228   : > { %5642 = vst.msk [vmem:[%s8143_s21 + $0xa8] sm:$0xf] %vm5599_vm2, %v6573_v62  ;;  %v6571_v40 = vpack.c.bf16 %v4659_v36, %v4659_v36  ;;  %v4662_v24 = vmax.f32 %v4466_v63, 0.0  ;;  %v4464_v54 = vadd.f32 %v8123_v0, %v4261_v38  ;;  %v3607_v7 = vadd.f32 %v3606_v33, %v8082_v14  ;;  %v9493_v38 = vld [vmem:[#allocation51_spill] sm:$0xff]  ;;  %v7437_v33 = vld [vmem:[%s7603_s7 + $0x5b8] ss:$12 sps:$4 sm:$0xff]  }
 0x229   : > { %v4266_v34 = vmul.f32 %v8115_v56, %v3615_v30  ;;  %v8457_v50 = vpop.f32.mrf.mxu0  ;;  %v6881_v27 = vpop.f32.mrf.mxu1 }
 0x22a   : > { %5640 = vst.msk [vmem:[%s8143_s21 + $0xa0] sm:$0xf] %vm5599_vm2, %v6571_v40  ;;  %v6574_v44 = vpack.c.bf16 %v4662_v24, %v4662_v24  ;;  %v4660_v22 = vmax.f32 %v4464_v54, 0.0  ;;  %v4264_v41 = vmul.f32 %v8115_v56, %v3607_v7  ;;  %v3618_v2 = vadd.f32 %v6881_v27, %v8102_v16  ;;  %v7441_v40 = vld [vmem:[%s7603_s7 + $0x710] ss:$12 sps:$4 sm:$0xff]  }
 0x22b   : > { %v4469_v14 = vadd.f32 %v8123_v0, %v4266_v34  ;;  %v2898_v26 = vpop.f32.mrf.mxu0  ;;  %v3609_v43 = vpop.f32.mrf.mxu1  ;;  %v7444_v27 = vld [vmem:[%s7603_s7 + $0x5d4] ss:$12 sps:$4 sm:$0xff]  }
 0x22c   : > { %5643 = vst.msk [vmem:[%s8143_s21 + $0xac] sm:$0xf] %vm5599_vm2, %v6574_v44  ;;  %v6572_v39 = vpack.c.bf16 %v4660_v22, %v4660_v22  ;;  %v4467_v49 = vadd.f32 %v8123_v0, %v4264_v41  ;;  %v4267_v21 = vmul.f32 %v8115_v56, %v3618_v2  ;;  %v3610_v10 = vadd.f32 %v3609_v43, %v9492_v59  ;;  %v7445_v22 = vld [vmem:[%s7603_s7 + $0x728] ss:$12 sps:$4 sm:$0xff]  }
 0x22d   : > { %v4665_v31 = vmax.f32 %v4469_v14, 0.0  ;;  %v8473_v6 = vpop.f32.mrf.mxu0  ;;  %3092 = vmatmul.mubr.bf16.gmra.mxu0 %v7432_v53  ;;  %v6884_v16 = vpop.f32.mrf.mxu1  ;;  %6979 = vmatmul.mubr.msk.bf16.gmra.mxu1 %vm2280_vm1, %v7436_v4 }
 0x22e   : > { %5641 = vst.msk [vmem:[%s8143_s21 + $0xa4] sm:$0xf] %vm5599_vm2, %v6572_v39  ;;  %v4663_v1 = vmax.f32 %v4467_v49, 0.0  ;;  %v4470_v61 = vadd.f32 %v8123_v0, %v4267_v21  ;;  %v4265_v17 = vmul.f32 %v8115_v56, %v3610_v10  ;;  %v3631_v55 = vadd.f32 %v6884_v16, %v8145_v48  ;;  %3099 = vmatprep.mubr.bf16.mxu0 %v7439_v58 }
 0x22f   : > { %6982 = vmatprep.mubr.msk.bf16.mxu1 %vm2280_vm1, %v7440_v11  ;;  %v6577_v47 = vpack.c.bf16 %v4665_v31, %v4665_v31  ;;  %v2903_v18 = vpop.f32.mrf.mxu0  ;;  %v3622_v25 = vpop.f32.mrf.mxu1  ;;  %v9494_v11 = vld [vmem:[#allocation52_spill] sm:$0xff] }
 0x230   : > { %v6575_v52 = vpack.c.bf16 %v4663_v1, %v4663_v1  ;;  %v4666_v62 = vmax.f32 %v4470_v61, 0.0  ;;  %v4468_v36 = vadd.f32 %v8123_v0, %v4265_v17  ;;  %v4270_v63 = vmul.f32 %v8115_v56, %v3631_v55  ;;  %v8522_v1 = vld [vmem:[%s9439_s3] ss:$0 sm:$0xff] }
 0x231   : > { %5646 = vst.msk [vmem:[%s8143_s21 + $0xb8] sm:$0xf] %vm5599_vm2, %v6577_v47  ;;  %v3623_v48 = vadd.f32 %v3622_v25, %v9493_v38  ;;  %v8487_v30 = vpop.f32.mrf.mxu0  ;;  %v6885_v29 = vpop.f32.mrf.mxu1  ;;  %v7442_v25 = vld [vmem:[%s7603_s7 + $0x5d0] ss:$12 sps:$4 sm:$0xff]  }
 0x232   : > { %5644 = vst.msk [vmem:[%s8143_s21 + $0xb0] sm:$0xf] %vm5599_vm2, %v6575_v52  ;;  %v6578_v24 = vpack.c.bf16 %v4666_v62, %v4666_v62  ;;  %v4664_v54 = vmax.f32 %v4468_v36, 0.0  ;;  %v4473_v7 = vadd.f32 %v8123_v0, %v4270_v63  ;;  %v3634_v34 = vadd.f32 %v6885_v29, %v8157_v60  ;;  %v7446_v52 = vld [vmem:[%s7603_s7 + $0x740] ss:$12 sps:$4 sm:$0xff]  }
 0x233   : > { %v4268_v53 = vmul.f32 %v8115_v56, %v3623_v48  ;;  %v2906_v4 = vpop.f32.mrf.mxu0  ;;  %v3625_v44 = vpop.f32.mrf.mxu1  ;;  %v7449_v48 = vld [vmem:[%s7603_s7 + $0x5ec] ss:$12 sps:$4 sm:$0xff]  }
 0x234   : > { %5647 = vst.msk [vmem:[%s8143_s21 + $0xbc] sm:$0xf] %vm5599_vm2, %v6578_v24  ;;  %v6576_v41 = vpack.c.bf16 %v4664_v54, %v4664_v54  ;;  %v4669_v2 = vmax.f32 %v4473_v7, 0.0  ;;  %v4271_v58 = vmul.f32 %v8115_v56, %v3634_v34  ;;  %v3626_v14 = vadd.f32 %v3625_v44, %v9494_v11  ;;  %v8512_v56 = vld [vmem:[%s9438_s2] ss:$0 sm:$0xff] }
 0x235   : > { %v4471_v26 = vadd.f32 %v8123_v0, %v4268_v53  ;;  %v8503_v43 = vpop.f32.mrf.mxu0  ;;  %3100 = vmatmul.mubr.bf16.gmra.mxu0 %v7437_v33  ;;  %v6888_v60 = vpop.f32.mrf.mxu1  ;;  %6983 = vmatmul.mubr.msk.bf16.gmra.mxu1 %vm2280_vm1, %v7441_v40  ;;  %v7450_v29 = vld [vmem:[%s7603_s7 + $0x758] ss:$12 sps:$4 sm:$0xff]  }
 0x236   : > { %5645 = vst.msk [vmem:[%s8143_s21 + $0xb4] sm:$0xf] %vm5599_vm2, %v6576_v41  ;;  %v6581_v39 = vpack.c.bf16 %v4669_v2, %v4669_v2  ;;  %v4474_v49 = vadd.f32 %v8123_v0, %v4271_v58  ;;  %v4269_v21 = vmul.f32 %v8512_v56, %v3626_v14  ;;  %v3647_v59 = vadd.f32 %v6888_v60, %v8203_v32 }
 0x237   : > { %3107 = vmatprep.mubr.bf16.mxu0 %v7444_v27  ;;  %v4667_v10 = vmax.f32 %v4471_v26, 0.0  ;;  %v2911_v31 = vpop.f32.mrf.mxu0  ;;  %v3638_v16 = vpop.f32.mrf.mxu1  ;;  %6986 = vmatprep.mubr.msk.bf16.mxu1 %vm2280_vm1, %v7445_v22 }
 0x238   : > { %5650 = vst.msk [vmem:[%s8143_s21 + $0xc8] sm:$0xf] %vm5599_vm2, %v6581_v39  ;;  %v4670_v0 = vmax.f32 %v4474_v49, 0.0  ;;  %v4472_v32 = vadd.f32 %v8522_v1, %v4269_v21  ;;  %v4274_v61 = vmul.f32 %v8512_v56, %v3647_v59  ;;  %v3639_v17 = vadd.f32 %v3638_v16, %v8173_v12  ;;  %v7447_v21 = vld [vmem:[%s7603_s7 + $0x5e8] ss:$12 sps:$4 sm:$0xff]  }
 0x239   : > { %v6579_v55 = vpack.c.bf16 %v4667_v10, %v4667_v10  ;;  %v8527_v47 = vpop.f32.mrf.mxu0  ;;  %v6889_v18 = vpop.f32.mrf.mxu1  ;;  %v7451_v59 = vld [vmem:[%s7603_s7 + $0x770] ss:$12 sps:$4 sm:$0xff]  }
 0x23a   : > { %v6582_v62 = vpack.c.bf16 %v4670_v0, %v4670_v0  ;;  %v4668_v36 = vmax.f32 %v4472_v32, 0.0  ;;  %v4477_v63 = vadd.f32 %v8522_v1, %v4274_v61  ;;  %v4272_v38 = vmul.f32 %v8512_v56, %v3639_v17  ;;  %v7454_v32 = vld [vmem:[%s7603_s7 + $0x604] ss:$12 sps:$4 sm:$0xff]   ;;  %v7455_v61 = vld [vmem:[%s7603_s7 + $0x788] ss:$12 sps:$4 sm:$0xff]  }
 0x23b   : > { %5648 = vst.msk [vmem:[%s8143_s21 + $0xc0] sm:$0xf] %vm5599_vm2, %v6579_v55  ;;  %v3650_v12 = vadd.f32 %v6889_v18, %v8217_v35  ;;  %v2914_v33 = vpop.f32.mrf.mxu0  ;;  %v3641_v40 = vpop.f32.mrf.mxu1 }
 0x23c   : > { %5651 = vst.msk [vmem:[%s8143_s21 + $0xcc] sm:$0xf] %vm5599_vm2, %v6582_v62  ;;  %v6580_v24 = vpack.c.bf16 %v4668_v36, %v4668_v36  ;;  %v4673_v54 = vmax.f32 %v4477_v63, 0.0  ;;  %v4475_v7 = vadd.f32 %v8522_v1, %v4272_v38  ;;  %v3642_v34 = vadd.f32 %v3641_v40, %v8187_v28 }
 0x23d   : > { %v4275_v27 = vmul.f32 %v8512_v56, %v3650_v12  ;;  %v8543_v53 = vpop.f32.mrf.mxu0  ;;  %3108 = vmatmul.mubr.bf16.gmra.mxu0 %v7442_v25  ;;  %v6892_v4 = vpop.f32.mrf.mxu1  ;;  %6987 = vmatmul.mubr.msk.bf16.gmra.mxu1 %vm2280_vm1, %v7446_v52 }
 0x23e   : > { %5649 = vst.msk [vmem:[%s8143_s21 + $0xc4] sm:$0xf] %vm5599_vm2, %v6580_v24  ;;  %v6585_v35 = vpack.c.bf16 %v4673_v54, %v4673_v54  ;;  %v4671_v44 = vmax.f32 %v4475_v7, 0.0  ;;  %v4273_v22 = vmul.f32 %v8512_v56, %v3642_v34  ;;  %v3663_v41 = vadd.f32 %v6892_v4, %v8263_v15  ;;  %3115 = vmatprep.mubr.bf16.mxu0 %v7449_v48 }
 0x23f   : > { %6990 = vmatprep.mubr.msk.bf16.mxu1 %vm2280_vm1, %v7450_v29  ;;  %v4478_v28 = vadd.f32 %v8522_v1, %v4275_v27  ;;  %v2919_v2 = vpop.f32.mrf.mxu0  ;;  %v3654_v58 = vpop.f32.mrf.mxu1 }
 0x240   : > { %5654 = vst.msk [vmem:[%s8143_s21 + $0xd8] sm:$0xf] %vm5599_vm2, %v6585_v35  ;;  %v6583_v11 = vpack.c.bf16 %v4671_v44, %v4671_v44  ;;  %v4476_v14 = vadd.f32 %v8522_v1, %v4273_v22  ;;  %v4278_v26 = vmul.f32 %v8512_v56, %v3663_v41  ;;  %v3655_v60 = vadd.f32 %v3654_v58, %v8233_v46  ;;  %v7452_v35 = vld [vmem:[%s7603_s7 + $0x600] ss:$12 sps:$4 sm:$0xff]   ;;  %v7459_v58 = vld [vmem:[%s7603_s7 + $0x61c] ss:$12 sps:$4 sm:$0xff]  }
 0x241   : > { %v4674_v15 = vmax.f32 %v4478_v28, 0.0  ;;  %v8557_v39 = vpop.f32.mrf.mxu0  ;;  %v6893_v49 = vpop.f32.mrf.mxu1  ;;  %v7456_v44 = vld [vmem:[%s7603_s7 + $0x7a0] ss:$12 sps:$4 sm:$0xff]  }
 0x242   : > { %5652 = vst.msk [vmem:[%s8143_s21 + $0xd0] sm:$0xf] %vm5599_vm2, %v6583_v11  ;;  %v4672_v10 = vmax.f32 %v4476_v14, 0.0  ;;  %v4481_v31 = vadd.f32 %v8522_v1, %v4278_v26  ;;  %v4276_v16 = vmul.f32 %v8512_v56, %v3655_v60  ;;  %v3666_v0 = vadd.f32 %v6893_v49, %v8277_v9  ;;  %v7460_v11 = vld [vmem:[%s7603_s7 + $0x7b8] ss:$12 sps:$4 sm:$0xff]  }
 0x243   : > { %v6586_v46 = vpack.c.bf16 %v4674_v15, %v4674_v15  ;;  %v2922_v17 = vpop.f32.mrf.mxu0  ;;  %v3657_v55 = vpop.f32.mrf.mxu1 }
 0x244   : > { %v6584_v18 = vpack.c.bf16 %v4672_v10, %v4672_v10  ;;  %v4677_v25 = vmax.f32 %v4481_v31, 0.0  ;;  %v4479_v52 = vadd.f32 %v8522_v1, %v4276_v16  ;;  %v4279_v62 = vmul.f32 %v8512_v56, %v3666_v0 }
 0x245   : > { %5655 = vst.msk [vmem:[%s8143_s21 + $0xdc] sm:$0xf] %vm5599_vm2, %v6586_v46  ;;  %v3658_v36 = vadd.f32 %v3657_v55, %v8247_v23  ;;  %v8573_v63 = vpop.f32.mrf.mxu0  ;;  %3116 = vmatmul.mubr.bf16.gmra.mxu0 %v7447_v21  ;;  %v6896_v9 = vpop.f32.mrf.mxu1  ;;  %6991 = vmatmul.mubr.msk.bf16.gmra.mxu1 %vm2280_vm1, %v7451_v59 }
 0x246   : > { %5653 = vst.msk [vmem:[%s8143_s21 + $0xd4] sm:$0xf] %vm5599_vm2, %v6584_v18  ;;  %v6589_v38 = vpack.c.bf16 %v4677_v25, %v4677_v25  ;;  %v4675_v48 = vmax.f32 %v4479_v52, 0.0  ;;  %v4482_v29 = vadd.f32 %v8522_v1, %v4279_v62  ;;  %v3679_v12 = vadd.f32 %v6896_v9, %v8323_v20  ;;  %3123 = vmatprep.mubr.bf16.mxu0 %v7454_v32  ;;  %v7457_v9 = vld [vmem:[%s7603_s7 + $0x618] ss:$12 sps:$4 sm:$0xff]  }
 0x247   : > { %6994 = vmatprep.mubr.msk.bf16.mxu1 %vm2280_vm1, %v7455_v61  ;;  %v4277_v23 = vmul.f32 %v8512_v56, %v3658_v36  ;;  %v2927_v33 = vpop.f32.mrf.mxu0  ;;  %v3670_v40 = vpop.f32.mrf.mxu1 }
 0x248   : > { %5658 = vst.msk [vmem:[%s8143_s21 + $0xe8] sm:$0xf] %vm5599_vm2, %v6589_v38  ;;  %v6587_v24 = vpack.c.bf16 %v4675_v48, %v4675_v48  ;;  %v4678_v54 = vmax.f32 %v4482_v29, 0.0  ;;  %v4282_v7 = vmul.f32 %v8512_v56, %v3679_v12  ;;  %v3671_v34 = vadd.f32 %v3670_v40, %v8293_v8  ;;  %v7465_v33 = vld [vmem:[%s7603_s7 + $0x7e8] ss:$12 sps:$4 sm:$0xff]  }
 0x249   : > { %v4480_v20 = vadd.f32 %v8522_v1, %v4277_v23  ;;  %v8587_v27 = vpop.f32.mrf.mxu0  ;;  %v6897_v4 = vpop.f32.mrf.mxu1  ;;  %v7464_v23 = vld [vmem:[%s7603_s7 + $0x634] ss:$12 sps:$4 sm:$0xff]  }
 0x24a   : > { %5656 = vst.msk [vmem:[%s8143_s21 + $0xe0] sm:$0xf] %vm5599_vm2, %v6587_v24  ;;  %v6590_v22 = vpack.c.bf16 %v4678_v54, %v4678_v54  ;;  %v4485_v41 = vadd.f32 %v8522_v1, %v4282_v7  ;;  %v4280_v28 = vmul.f32 %v8512_v56, %v3671_v34  ;;  %v3682_v2 = vadd.f32 %v6897_v4, %v8337_v42 }
 0x24b   : > { %v4676_v8 = vmax.f32 %v4480_v20, 0.0  ;;  %v2930_v14 = vpop.f32.mrf.mxu0  ;;  %v3673_v26 = vpop.f32.mrf.mxu1 }
 0x24c   : > { %5659 = vst.msk [vmem:[%s8143_s21 + $0xec] sm:$0xf] %vm5599_vm2, %v6590_v22  ;;  %v4681_v60 = vmax.f32 %v4485_v41, 0.0  ;;  %v4483_v15 = vadd.f32 %v8522_v1, %v4280_v28  ;;  %v4283_v49 = vmul.f32 %v8512_v56, %v3682_v2  ;;  %v3674_v21 = vadd.f32 %v3673_v26, %v8307_v19 }
 0x24d   : > { %v6588_v59 = vpack.c.bf16 %v4676_v8, %v4676_v8  ;;  %v8603_v10 = vpop.f32.mrf.mxu0  ;;  %3124 = vmatmul.mubr.bf16.gmra.mxu0 %v7452_v35  ;;  %v6900_v42 = vpop.f32.mrf.mxu1  ;;  %6995 = vmatmul.mubr.msk.bf16.gmra.mxu1 %vm2280_vm1, %v7456_v44 }
 0x24e   : > { %v6593_v31 = vpack.c.bf16 %v4681_v60, %v4681_v60  ;;  %v4679_v16 = vmax.f32 %v4483_v15, 0.0  ;;  %v4486_v0 = vadd.f32 %v8522_v1, %v4283_v49  ;;  %v4281_v32 = vmul.f32 %v8512_v56, %v3674_v21  ;;  %3131 = vmatprep.mubr.bf16.mxu0 %v7459_v58  ;;  %6998 = vmatprep.mubr.msk.bf16.mxu1 %vm2280_vm1, %v7460_v11  ;;  %v7462_v49 = vld [vmem:[%s7603_s7 + $0x630] ss:$12 sps:$4 sm:$0xff]   ;;  %v7466_v21 = vld [vmem:[%s7603_s7 + $0x800] ss:$12 sps:$4 sm:$0xff]  }
 0x24f   : > { %5657 = vst.msk [vmem:[%s8143_s21 + $0xe4] sm:$0xf] %vm5599_vm2, %v6588_v59  ;;  %v3695_v19 = vadd.f32 %v6900_v42, %v8383_v13  ;;  %v2935_v61 = vpop.f32.mrf.mxu0  ;;  %v3686_v46 = vpop.f32.mrf.mxu1  ;;  %v7461_v13 = vld [vmem:[%s7603_s7 + $0x7d0] ss:$12 sps:$4 sm:$0xff]  }
 0x250   : > { %5662 = vst.msk [vmem:[%s8143_s21 + $0xf8] sm:$0xf] %vm5599_vm2, %v6593_v31  ;;  %v6591_v17 = vpack.c.bf16 %v4679_v16, %v4679_v16  ;;  %v4682_v55 = vmax.f32 %v4486_v0, 0.0  ;;  %v4484_v18 = vadd.f32 %v8522_v1, %v4281_v32  ;;  %v3687_v25 = vadd.f32 %v3686_v46, %v8353_v5  ;;  %v7469_v0 = vld [vmem:[%s7603_s7 + $0x64c] ss:$12 sps:$4 sm:$0xff]  }
 0x251   : > { %v4286_v52 = vmul.f32 %v8512_v56, %v3695_v19  ;;  %v8617_v62 = vpop.f32.mrf.mxu0  ;;  %v6901_v36 = vpop.f32.mrf.mxu1 }
 0x252   : > { %5660 = vst.msk [vmem:[%s8143_s21 + $0xf0] sm:$0xf] %vm5599_vm2, %v6591_v17  ;;  %v6594_v38 = vpack.c.bf16 %v4682_v55, %v4682_v55  ;;  %v4680_v48 = vmax.f32 %v4484_v18, 0.0  ;;  %v4284_v29 = vmul.f32 %v8512_v56, %v3687_v25  ;;  %v3698_v12 = vadd.f32 %v6901_v36, %v8397_v3 }
 0x253   : > { %v4489_v5 = vadd.f32 %v8522_v1, %v4286_v52  ;;  %v2938_v40 = vpop.f32.mrf.mxu0  ;;  %v3689_v24 = vpop.f32.mrf.mxu1 }
 0x254   : > { %5663 = vst.msk [vmem:[%s8143_s21 + $0xfc] sm:$0xf] %vm5599_vm2, %v6594_v38  ;;  %v6592_v54 = vpack.c.bf16 %v4680_v48, %v4680_v48  ;;  %v4487_v7 = vadd.f32 %v8522_v1, %v4284_v29  ;;  %v4287_v34 = vmul.f32 %v8512_v56, %v3698_v12  ;;  %v3690_v20 = vadd.f32 %v3689_v24, %v8367_v57 }
 0x255   : > { %v4685_v4 = vmax.f32 %v4489_v5, 0.0  ;;  %v8633_v35 = vpop.f32.mrf.mxu0  ;;  %3132 = vmatmul.mubr.bf16.gmra.mxu0 %v7457_v9  ;;  %v6904_v3 = vpop.f32.mrf.mxu1  ;;  %6999 = vmatmul.mubr.msk.bf16.gmra.mxu1 %vm2280_vm1, %v7461_v13 }
 0x256   : > { %5661 = vst.msk [vmem:[%s8143_s21 + $0xf4] sm:$0xf] %vm5599_vm2, %v6592_v54  ;;  %v4683_v44 = vmax.f32 %v4487_v7, 0.0  ;;  %v4490_v22 = vadd.f32 %v8522_v1, %v4287_v34  ;;  %v4285_v41 = vmul.f32 %v8512_v56, %v3690_v20  ;;  %v3711_v28 = vadd.f32 %v6904_v3, %v8443_v45  ;;  %3139 = vmatprep.mubr.bf16.mxu0 %v7464_v23  ;;  %v7467_v54 = vld [vmem:[%s7603_s7 + $0x648] ss:$12 sps:$4 sm:$0xff]  }
 0x257   : > { %7002 = vmatprep.mubr.msk.bf16.mxu1 %vm2280_vm1, %v7465_v33  ;;  %v6597_v57 = vpack.c.bf16 %v4685_v4, %v4685_v4  ;;  %v2943_v2 = vpop.f32.mrf.mxu0  ;;  %v3702_v58 = vpop.f32.mrf.mxu1  ;;  %v7471_v7 = vld [vmem:[%s7603_s7 + $0x830] ss:$12 sps:$4 sm:$0xff]  }
 0x258   : > { %v6595_v11 = vpack.c.bf16 %v4683_v44, %v4683_v44  ;;  %v4686_v8 = vmax.f32 %v4490_v22, 0.0  ;;  %v4488_v14 = vadd.f32 %v8522_v1, %v4285_v41  ;;  %v4290_v26 = vmul.f32 %v8512_v56, %v3711_v28  ;;  %v7474_v44 = vld [vmem:[%s7603_s7 + $0x664] ss:$12 sps:$4 sm:$0xff]   ;;  %v7475_v22 = vld [vmem:[%s7603_s7 + $0x848] ss:$12 sps:$4 sm:$0xff]  }
 0x259   : > { %5666 = vst.msk [vmem:[%s8143_s21 + $0x108] sm:$0xf] %vm5599_vm2, %v6597_v57  ;;  %v3703_v45 = vadd.f32 %v3702_v58, %v8413_v37  ;;  %v8647_v60 = vpop.f32.mrf.mxu0  ;;  %v6905_v15 = vpop.f32.mrf.mxu1  ;;  %v7470_v37 = vld [vmem:[%s7603_s7 + $0x818] ss:$12 sps:$4 sm:$0xff]  }
 0x25a   : > { %5664 = vst.msk [vmem:[%s8143_s21 + $0x100] sm:$0xf] %vm5599_vm2, %v6595_v11  ;;  %v6598_v59 = vpack.c.bf16 %v4686_v8, %v4686_v8  ;;  %v4684_v42 = vmax.f32 %v4488_v14, 0.0  ;;  %v4493_v31 = vadd.f32 %v8522_v1, %v4290_v26  ;;  %v3714_v16 = vadd.f32 %v6905_v15, %v8457_v50 }
 0x25b   : > { %v4288_v32 = vmul.f32 %v8512_v56, %v3703_v45  ;;  %v2946_v19 = vpop.f32.mrf.mxu0  ;;  %v3705_v61 = vpop.f32.mrf.mxu1 }
 0x25c   : > { %5667 = vst.msk [vmem:[%s8143_s21 + $0x10c] sm:$0xf] %vm5599_vm2, %v6598_v59  ;;  %v6596_v46 = vpack.c.bf16 %v4684_v42, %v4684_v42  ;;  %v4689_v17 = vmax.f32 %v4493_v31, 0.0  ;;  %v4291_v55 = vmul.f32 %v8512_v56, %v3714_v16  ;;  %v3706_v18 = vadd.f32 %v3705_v61, %v8427_v51  ;;  %v7472_v61 = vld [vmem:[%s7603_s7 + $0x660] ss:$12 sps:$4 sm:$0xff]  }
 0x25d   : > { %v4491_v25 = vadd.f32 %v8522_v1, %v4288_v32  ;;  %v8663_v52 = vpop.f32.mrf.mxu0  ;;  %3140 = vmatmul.mubr.bf16.gmra.mxu0 %v7462_v49  ;;  %v6908_v50 = vpop.f32.mrf.mxu1  ;;  %7003 = vmatmul.mubr.msk.bf16.gmra.mxu1 %vm2280_vm1, %v7466_v21 }
 0x25e   : > { %5665 = vst.msk [vmem:[%s8143_s21 + $0x104] sm:$0xf] %vm5599_vm2, %v6596_v46  ;;  %v6601_v36 = vpack.c.bf16 %v4689_v17, %v4689_v17  ;;  %v4494_v9 = vadd.f32 %v8522_v1, %v4291_v55  ;;  %v4289_v13 = vmul.f32 %v8512_v56, %v3706_v18  ;;  %v3727_v51 = vadd.f32 %v6908_v50, %v8503_v43  ;;  %v7480_v50 = vld [vmem:[%s7603_s7 + $0x878] ss:$12 sps:$4 sm:$0xff]  }
 0x25f   : > { %3147 = vmatprep.mubr.bf16.mxu0 %v7469_v0  ;;  %v4687_v38 = vmax.f32 %v4491_v25, 0.0  ;;  %v2951_v48 = vpop.f32.mrf.mxu0  ;;  %v3718_v29 = vpop.f32.mrf.mxu1  ;;  %7006 = vmatprep.mubr.msk.bf16.mxu1 %vm2280_vm1, %v7470_v37  ;;  %v7476_v37 = vld [vmem:[%s7603_s7 + $0x860] ss:$12 sps:$4 sm:$0xff]   ;;  %v7479_v25 = vld [vmem:[%s7603_s7 + $0x67c] ss:$12 sps:$4 sm:$0xff]  }
 0x260   : > { %5670 = vst.msk [vmem:[%s8143_s21 + $0x118] sm:$0xf] %vm5599_vm2, %v6601_v36  ;;  %v4690_v12 = vmax.f32 %v4494_v9, 0.0  ;;  %v4492_v23 = vadd.f32 %v8522_v1, %v4289_v13  ;;  %v4294_v33 = vmul.f32 %v8512_v56, %v3727_v51  ;;  %v3719_v5 = vadd.f32 %v3718_v29, %v8473_v6 }
 0x261   : > { %v6599_v43 = vpack.c.bf16 %v4687_v38, %v4687_v38  ;;  %v8677_v40 = vpop.f32.mrf.mxu0  ;;  %v6909_v24 = vpop.f32.mrf.mxu1 }
 0x262   : > { %v6602_v34 = vpack.c.bf16 %v4690_v12, %v4690_v12  ;;  %v4688_v20 = vmax.f32 %v4492_v23, 0.0  ;;  %v4497_v4 = vadd.f32 %v8522_v1, %v4294_v33  ;;  %v4292_v3 = vmul.f32 %v8512_v56, %v3719_v5 }
 0x263   : > { %5668 = vst.msk [vmem:[%s8143_s21 + $0x110] sm:$0xf] %vm5599_vm2, %v6599_v43  ;;  %v3730_v6 = vadd.f32 %v6909_v24, %v8527_v47  ;;  %v2954_v41 = vpop.f32.mrf.mxu0  ;;  %v3721_v28 = vpop.f32.mrf.mxu1 }
 0x264   : > { %5671 = vst.msk [vmem:[%s8143_s21 + $0x11c] sm:$0xf] %vm5599_vm2, %v6602_v34  ;;  %v6600_v57 = vpack.c.bf16 %v4688_v20, %v4688_v20  ;;  %v4693_v2 = vmax.f32 %v4497_v4, 0.0  ;;  %v4495_v58 = vadd.f32 %v8522_v1, %v4292_v3  ;;  %v3722_v11 = vadd.f32 %v3721_v28, %v8487_v30 }
 0x265   : > { %v4295_v8 = vmul.f32 %v8512_v56, %v3730_v6  ;;  %v8693_v14 = vpop.f32.mrf.mxu0  ;;  %3148 = vmatmul.mubr.bf16.gmra.mxu0 %v7467_v54  ;;  %v6912_v26 = vpop.f32.mrf.mxu1  ;;  %7007 = vmatmul.mubr.msk.bf16.gmra.mxu1 %vm2280_vm1, %v7471_v7  ;;  %v7481_v6 = vld [vmem:[%s7603_s7 + $0x890] ss:$12 sps:$4 sm:$0xff]  }
 0x266   : > { %5669 = vst.msk [vmem:[%s8143_s21 + $0x114] sm:$0xf] %vm5599_vm2, %v6600_v57  ;;  %v6605_v47 = vpack.c.bf16 %v4693_v2, %v4693_v2  ;;  %v4691_v45 = vmax.f32 %v4495_v58, 0.0  ;;  %v4293_v15 = vmul.f32 %v8512_v56, %v3722_v11  ;;  %v3743_v49 = vadd.f32 %v6912_v26, %v8573_v63  ;;  %3155 = vmatprep.mubr.bf16.mxu0 %v7474_v44  ;;  %v7484_v58 = vld [vmem:[%s7603_s7 + $0x694] ss:$12 sps:$4 sm:$0xff]  }
 0x267   : > { %7010 = vmatprep.mubr.msk.bf16.mxu1 %vm2280_vm1, %v7475_v22  ;;  %v4498_v30 = vadd.f32 %v8522_v1, %v4295_v8  ;;  %v2959_v21 = vpop.f32.mrf.mxu0  ;;  %v3734_v59 = vpop.f32.mrf.mxu1  ;;  %v7477_v22 = vld [vmem:[%s7603_s7 + $0x678] ss:$12 sps:$4 sm:$0xff]   ;;  %v7485_v11 = vld [vmem:[%s7603_s7 + $0x8a8] ss:$12 sps:$4 sm:$0xff]  }
 0x268   : > { %5674 = vst.msk [vmem:[%s8143_s21 + $0x128] sm:$0xf] %vm5599_vm2, %v6605_v47  ;;  %v6603_v42 = vpack.c.bf16 %v4691_v45, %v4691_v45  ;;  %v4496_v31 = vadd.f32 %v8522_v1, %v4293_v15  ;;  %v4298_v16 = vmul.f32 %v8512_v56, %v3743_v49  ;;  %v3735_v0 = vadd.f32 %v3734_v59, %v8543_v53 }
 0x269   : > { %v4694_v63 = vmax.f32 %v4498_v30, 0.0  ;;  %v8707_v32 = vpop.f32.mrf.mxu0  ;;  %v6913_v19 = vpop.f32.mrf.mxu1 }
 0x26a   : > { %5672 = vst.msk [vmem:[%s8143_s21 + $0x120] sm:$0xf] %vm5599_vm2, %v6603_v42  ;;  %v4692_v46 = vmax.f32 %v4496_v31, 0.0  ;;  %v4501_v17 = vadd.f32 %v8522_v1, %v4298_v16  ;;  %v4296_v55 = vmul.f32 %v8512_v56, %v3735_v0  ;;  %v3746_v18 = vadd.f32 %v6913_v19, %v8587_v27 }
 0x26b   : > { %v6606_v53 = vpack.c.bf16 %v4694_v63, %v4694_v63  ;;  %v2962_v36 = vpop.f32.mrf.mxu0  ;;  %v3737_v9 = vpop.f32.mrf.mxu1 }
 0x26c   : > { %v6604_v13 = vpack.c.bf16 %v4692_v46, %v4692_v46  ;;  %v4697_v51 = vmax.f32 %v4501_v17, 0.0  ;;  %v4499_v38 = vadd.f32 %v8522_v1, %v4296_v55  ;;  %v4299_v48 = vmul.f32 %v8512_v56, %v3746_v18 }
 0x26d   : > { %5675 = vst.msk [vmem:[%s8143_s21 + $0x12c] sm:$0xf] %vm5599_vm2, %v6606_v53  ;;  %v3738_v29 = vadd.f32 %v3737_v9, %v8557_v39  ;;  %v8723_v12 = vpop.f32.mrf.mxu0  ;;  %3156 = vmatmul.mubr.bf16.gmra.mxu0 %v7472_v61  ;;  %v6916_v27 = vpop.f32.mrf.mxu1  ;;  %7011 = vmatmul.mubr.msk.bf16.gmra.mxu1 %vm2280_vm1, %v7476_v37 }
 0x26e   : > { %5673 = vst.msk [vmem:[%s8143_s21 + $0x124] sm:$0xf] %vm5599_vm2, %v6604_v13  ;;  %v6609_v23 = vpack.c.bf16 %v4697_v51, %v4697_v51  ;;  %v4695_v33 = vmax.f32 %v4499_v38, 0.0  ;;  %v4502_v5 = vadd.f32 %v8522_v1, %v4299_v48  ;;  %v3759_v43 = vadd.f32 %v6916_v27, %v8633_v35  ;;  %3163 = vmatprep.mubr.bf16.mxu0 %v7479_v25  ;;  %v7482_v25 = vld [vmem:[%s7603_s7 + $0x690] ss:$12 sps:$4 sm:$0xff]  }
 0x26f   : > { %7014 = vmatprep.mubr.msk.bf16.mxu1 %vm2280_vm1, %v7480_v50  ;;  %v4297_v39 = vmul.f32 %v8512_v56, %v3738_v29  ;;  %v2967_v24 = vpop.f32.mrf.mxu0  ;;  %v3750_v54 = vpop.f32.mrf.mxu1  ;;  %v7486_v50 = vld [vmem:[%s7603_s7 + $0x8c0] ss:$12 sps:$4 sm:$0xff]   ;;  %v7490_v51 = vld [vmem:[%s7603_s7 + $0x8d8] ss:$12 sps:$4 sm:$0xff]  }
 0x270   : > { %5678 = vst.msk [vmem:[%s8143_s21 + $0x138] sm:$0xf] %vm5599_vm2, %v6609_v23  ;;  %v6607_v7 = vpack.c.bf16 %v4695_v33, %v4695_v33  ;;  %v4698_v34 = vmax.f32 %v4502_v5, 0.0  ;;  %v4302_v20 = vmul.f32 %v8512_v56, %v3759_v43  ;;  %v3751_v4 = vadd.f32 %v3750_v54, %v8603_v10  ;;  %v7489_v13 = vld [vmem:[%s7603_s7 + $0x6ac] ss:$12 sps:$4 sm:$0xff]  }
 0x271   : > { %v4500_v35 = vadd.f32 %v8522_v1, %v4297_v39  ;;  %v8737_v3 = vpop.f32.mrf.mxu0  ;;  %v6917_v44 = vpop.f32.mrf.mxu1 }
 0x272   : > { %5676 = vst.msk [vmem:[%s8143_s21 + $0x130] sm:$0xf] %vm5599_vm2, %v6607_v7  ;;  %v6610_v41 = vpack.c.bf16 %v4698_v34, %v4698_v34  ;;  %v4505_v28 = vadd.f32 %v8522_v1, %v4302_v20  ;;  %v4300_v57 = vmul.f32 %v8512_v56, %v3751_v4  ;;  %v3762_v2 = vadd.f32 %v6917_v44, %v8647_v60 }
 0x273   : > { %v4696_v10 = vmax.f32 %v4500_v35, 0.0  ;;  %v2970_v8 = vpop.f32.mrf.mxu0  ;;  %v3753_v26 = vpop.f32.mrf.mxu1 }
 0x274   : > { %5679 = vst.msk [vmem:[%s8143_s21 + $0x13c] sm:$0xf] %vm5599_vm2, %v6610_v41  ;;  %v4701_v47 = vmax.f32 %v4505_v28, 0.0  ;;  %v4503_v45 = vadd.f32 %v8522_v1, %v4300_v57  ;;  %v4303_v15 = vmul.f32 %v8512_v56, %v3762_v2  ;;  %v3754_v49 = vadd.f32 %v3753_v26, %v8617_v62  ;;  %v7487_v57 = vld [vmem:[%s7603_s7 + $0x6a8] ss:$12 sps:$4 sm:$0xff]  }
 0x275   : > { %v6608_v30 = vpack.c.bf16 %v4696_v10, %v4696_v10  ;;  %v2973_v21 = vpop.f32.mrf.mxu0  ;;  %3164 = vmatmul.mubr.bf16.gmra.mxu0 %v7477_v22  ;;  %v6920_v60 = vpop.f32.mrf.mxu1  ;;  %7015 = vmatmul.mubr.msk.bf16.gmra.mxu1 %vm2280_vm1, %v7481_v6  ;;  %v7491_v2 = vld [vmem:[%s7603_s7 + $0x8f0] ss:$12 sps:$4 sm:$0xff]  }
 0x276   : > { %v6613_v59 = vpack.c.bf16 %v4701_v47, %v4701_v47  ;;  %v4699_v42 = vmax.f32 %v4503_v45, 0.0  ;;  %v4506_v31 = vadd.f32 %v8522_v1, %v4303_v15  ;;  %v4301_v16 = vmul.f32 %v8512_v56, %v3754_v49  ;;  %3171 = vmatprep.mubr.bf16.mxu0 %v7484_v58  ;;  %7018 = vmatprep.mubr.msk.bf16.mxu1 %vm2280_vm1, %v7485_v11  ;;  %v7494_v26 = vld [vmem:[%s7603_s7 + $0x6c4] ss:$12 sps:$4 sm:$0xff]   ;;  %v7495_v49 = vld [vmem:[%s7603_s7 + $0x908] ss:$12 sps:$4 sm:$0xff]  }
 0x277   : > { %5677 = vst.msk [vmem:[%s8143_s21 + $0x134] sm:$0xf] %vm5599_vm2, %v6608_v30  ;;  %v3775_v62 = vadd.f32 %v6920_v60, %v8693_v14  ;;  %v2975_v0 = vpop.f32.mrf.mxu0  ;;  %v3766_v63 = vpop.f32.mrf.mxu1 }
 0x278   : > { %5682 = vst.msk [vmem:[%s8143_s21 + $0x148] sm:$0xf] %vm5599_vm2, %v6613_v59  ;;  %v6611_v19 = vpack.c.bf16 %v4699_v42, %v4699_v42  ;;  %v4702_v61 = vmax.f32 %v4506_v31, 0.0  ;;  %v4504_v37 = vadd.f32 %v8522_v1, %v4301_v16  ;;  %v3767_v46 = vadd.f32 %v3766_v63, %v8663_v52 }
 0x279   : > { %v4306_v17 = vmul.f32 %v8512_v56, %v3775_v62  ;;  %v2976_v55 = vpop.f32.mrf.mxu0  ;;  %v6921_v18 = vpop.f32.mrf.mxu1 }
 0x27a   : > { %5680 = vst.msk [vmem:[%s8143_s21 + $0x140] sm:$0xf] %vm5599_vm2, %v6611_v19  ;;  %v6614_v14 = vpack.c.bf16 %v4702_v61, %v4702_v61  ;;  %v4700_v53 = vmax.f32 %v4504_v37, 0.0  ;;  %v4304_v36 = vmul.f32 %v8512_v56, %v3767_v46  ;;  %v3778_v9 = vadd.f32 %v6921_v18, %v8707_v32 }
 0x27b   : > { %v4509_v52 = vadd.f32 %v8522_v1, %v4306_v17  ;;  %v2978_v38 = vpop.f32.mrf.mxu0  ;;  %v3769_v48 = vpop.f32.mrf.mxu1 }
 0x27c   : > { %5683 = vst.msk [vmem:[%s8143_s21 + $0x14c] sm:$0xf] %vm5599_vm2, %v6614_v14  ;;  %v6612_v29 = vpack.c.bf16 %v4700_v53, %v4700_v53  ;;  %v4507_v27 = vadd.f32 %v8522_v1, %v4304_v36  ;;  %v4307_v23 = vmul.f32 %v8512_v56, %v3778_v9  ;;  %v3770_v33 = vadd.f32 %v3769_v48, %v8677_v40  ;;  %v7492_v14 = vld [vmem:[%s7603_s7 + $0x6c0] ss:$12 sps:$4 sm:$0xff]  }
 0x27d   : > { %v4705_v5 = vmax.f32 %v4509_v52, 0.0  ;;  %v2981_v43 = vpop.f32.mrf.mxu0  ;;  %3172 = vmatmul.mubr.bf16.gmra.mxu0 %v7482_v25  ;;  %v6924_v32 = vpop.f32.mrf.mxu1  ;;  %7019 = vmatmul.mubr.msk.bf16.gmra.mxu1 %vm2280_vm1, %v7486_v50  ;;  %v7496_v53 = vld [vmem:[%s7603_s7 + $0x920] ss:$12 sps:$4 sm:$0xff]   ;;  %v7499_v52 = vld [vmem:[%s7603_s7 + $0x6dc] ss:$12 sps:$4 sm:$0xff]  }
 0x27e   : > { %5681 = vst.msk [vmem:[%s8143_s21 + $0x144] sm:$0xf] %vm5599_vm2, %v6612_v29  ;;  %v4703_v39 = vmax.f32 %v4507_v27, 0.0  ;;  %v4510_v24 = vadd.f32 %v8522_v1, %v4307_v23  ;;  %v4305_v54 = vmul.f32 %v8512_v56, %v3770_v33  ;;  %v3791_v7 = vadd.f32 %v6924_v32, %v2973_v21  ;;  %3179 = vmatprep.mubr.bf16.mxu0 %v7489_v13 }
 0x27f   : > { %7022 = vmatprep.mubr.msk.bf16.mxu1 %vm2280_vm1, %v7490_v51  ;;  %v6617_v40 = vpack.c.bf16 %v4705_v5, %v4705_v5  ;;  %v2983_v34 = vpop.f32.mrf.mxu0  ;;  %v3782_v20 = vpop.f32.mrf.mxu1 }
 0x280   : > { %v6615_v4 = vpack.c.bf16 %v4703_v39, %v4703_v39  ;;  %v4706_v35 = vmax.f32 %v4510_v24, 0.0  ;;  %v4508_v44 = vadd.f32 %v8522_v1, %v4305_v54  ;;  %v4310_v22 = vmul.f32 %v8512_v56, %v3791_v7 }
 0x281   : > { %5686 = vst.msk [vmem:[%s8143_s21 + $0x158] sm:$0xf] %vm5599_vm2, %v6617_v40  ;;  %v3783_v6 = vadd.f32 %v3782_v20, %v8723_v12  ;;  %v2984_v41 = vpop.f32.mrf.mxu0  ;;  %v6925_v28 = vpop.f32.mrf.mxu1 }
 0x282   : > { %5684 = vst.msk [vmem:[%s8143_s21 + $0x150] sm:$0xf] %vm5599_vm2, %v6615_v4  ;;  %v6618_v58 = vpack.c.bf16 %v4706_v35, %v4706_v35  ;;  %v4704_v11 = vmax.f32 %v4508_v44, 0.0  ;;  %v4513_v10 = vadd.f32 %v8522_v1, %v4310_v22  ;;  %v3794_v8 = vadd.f32 %v6925_v28, %v2976_v55  ;;  %v7497_v28 = vld [vmem:[%s7603_s7 + $0x6d8] ss:$12 sps:$4 sm:$0xff]  }
 0x283   : > { %v4308_v47 = vmul.f32 %v8512_v56, %v3783_v6  ;;  %v2986_v45 = vpop.f32.mrf.mxu0  ;;  %v3785_v15 = vpop.f32.mrf.mxu1 }
 0x284   : > { %5687 = vst.msk [vmem:[%s8143_s21 + $0x15c] sm:$0xf] %vm5599_vm2, %v6618_v58  ;;  %v6616_v12 = vpack.c.bf16 %v4704_v11, %v4704_v11  ;;  %v4709_v30 = vmax.f32 %v4513_v10, 0.0  ;;  %v4311_v21 = vmul.f32 %v8512_v56, %v3794_v8  ;;  %v3786_v60 = vadd.f32 %v3785_v15, %v8737_v3 }
 0x285   : > { %v4511_v59 = vadd.f32 %v8522_v1, %v4308_v47  ;;  %v2989_v42 = vpop.f32.mrf.mxu0  ;;  %3180 = vmatmul.mubr.bf16.gmra.mxu0 %v7487_v57  ;;  %v6928_v31 = vpop.f32.mrf.mxu1  ;;  %7023 = vmatmul.mubr.msk.bf16.gmra.mxu1 %vm2280_vm1, %v7491_v2 }
 0x286   : > { %5685 = vst.msk [vmem:[%s8143_s21 + $0x154] sm:$0xf] %vm5599_vm2, %v6616_v12  ;;  %v6621_v16 = vpack.c.bf16 %v4709_v30, %v4709_v30  ;;  %v4514_v62 = vadd.f32 %v8522_v1, %v4311_v21  ;;  %v4309_v0 = vmul.f32 %v8512_v56, %v3786_v60  ;;  %v3807_v63 = vadd.f32 %v6928_v31, %v2989_v42 }
 0x287   : > { %3187 = vmatprep.mubr.bf16.mxu0 %v7494_v26  ;;  %v4707_v3 = vmax.f32 %v4511_v59, 0.0  ;;  %v2991_v19 = vpop.f32.mrf.mxu0  ;;  %v3798_v61 = vpop.f32.mrf.mxu1  ;;  %7026 = vmatprep.mubr.msk.bf16.mxu1 %vm2280_vm1, %v7495_v49 }
 0x288   : > { %5690 = vst.msk [vmem:[%s8143_s21 + $0x168] sm:$0xf] %vm5599_vm2, %v6621_v16  ;;  %v4710_v37 = vmax.f32 %v4514_v62, 0.0  ;;  %v4512_v46 = vadd.f32 %v8522_v1, %v4309_v0  ;;  %v4314_v17 = vmul.f32 %v8512_v56, %v3807_v63  ;;  %v3799_v55 = vadd.f32 %v3798_v61, %v2981_v43 }
 0x289   : > { %v6619_v18 = vpack.c.bf16 %v4707_v3, %v4707_v3  ;;  %v2992_v25 = vpop.f32.mrf.mxu0  ;;  %v6929_v50 = vpop.f32.mrf.mxu1 }
 0x28a   : > { %v6622_v36 = vpack.c.bf16 %v4710_v37, %v4710_v37  ;;  %v4708_v9 = vmax.f32 %v4512_v46, 0.0  ;;  %v4517_v13 = vadd.f32 %v8522_v1, %v4314_v17  ;;  %v4312_v51 = vmul.f32 %v8512_v56, %v3799_v55 }
 0x28b   : > { %5688 = vst.msk [vmem:[%s8143_s21 + $0x160] sm:$0xf] %vm5599_vm2, %v6619_v18  ;;  %v3810_v38 = vadd.f32 %v6929_v50, %v2992_v25  ;;  %v2994_v48 = vpop.f32.mrf.mxu0  ;;  %v3801_v29 = vpop.f32.mrf.mxu1 }
 0x28c   : > { %5691 = vst.msk [vmem:[%s8143_s21 + $0x16c] sm:$0xf] %vm5599_vm2, %v6622_v36  ;;  %v6620_v27 = vpack.c.bf16 %v4708_v9, %v4708_v9  ;;  %v4713_v23 = vmax.f32 %v4517_v13, 0.0  ;;  %v4515_v33 = vadd.f32 %v8522_v1, %v4312_v51  ;;  %v3802_v5 = vadd.f32 %v3801_v29, %v2984_v41 }
 0x28d   : > { %v4315_v43 = vmul.f32 %v8512_v56, %v3810_v38  ;;  %v2997_v32 = vpop.f32.mrf.mxu0  ;;  %3188 = vmatmul.mubr.bf16.gmra.mxu0 %v7492_v14  ;;  %v6932_v39 = vpop.f32.mrf.mxu1  ;;  %7027 = vmatmul.mubr.msk.bf16.gmra.mxu1 %vm2280_vm1, %v7496_v53 }
 0x28e   : > { %5689 = vst.msk [vmem:[%s8143_s21 + $0x164] sm:$0xf] %vm5599_vm2, %v6620_v27  ;;  %v6625_v24 = vpack.c.bf16 %v4713_v23, %v4713_v23  ;;  %v4711_v54 = vmax.f32 %v4515_v33, 0.0  ;;  %v4313_v7 = vmul.f32 %v8512_v56, %v3802_v5  ;;  %3195 = vmatprep.mubr.bf16.mxu0 %v7499_v52 }
 0x28f   : > { %v4518_v40 = vadd.f32 %v8522_v1, %v4315_v43  ;;  %v2999_v34 = vpop.f32.mrf.mxu0  ;;  %v3814_v20 = vpop.f32.mrf.mxu1 }
 0x290   : > { %5694 = vst.msk [vmem:[%s8143_s21 + $0x178] sm:$0xf] %vm5599_vm2, %v6625_v24  ;;  %v6623_v4 = vpack.c.bf16 %v4711_v54, %v4711_v54  ;;  %v4516_v35 = vadd.f32 %v8522_v1, %v4313_v7  ;;  %v3815_v44 = vadd.f32 %v3814_v20, %v2997_v32  ;;  %v8870_v20 = vld [vmem:[%s9438_s2] ss:$0 sm:$0xff] }
 0x291   : > { %v4714_v22 = vmax.f32 %v4518_v40, 0.0  ;;  %v3000_v6 = vpop.f32.mrf.mxu0  ;;  %v6933_v41 = vpop.f32.mrf.mxu1 }
 0x292   : > { %5692 = vst.msk [vmem:[%s8143_s21 + $0x170] sm:$0xf] %vm5599_vm2, %v6623_v4  ;;  %v4712_v57 = vmax.f32 %v4516_v35, 0.0  ;;  %v4316_v2 = vmul.f32 %v8512_v56, %v3815_v44 }
 0x293   : > { %v6626_v58 = vpack.c.bf16 %v4714_v22, %v4714_v22  ;;  %v3002_v11 = vpop.f32.mrf.mxu0  ;;  %v3817_v10 = vpop.f32.mrf.mxu1 }
 0x294   : > { %v6624_v8 = vpack.c.bf16 %v4712_v57, %v4712_v57  ;;  %v4519_v26 = vadd.f32 %v8522_v1, %v4316_v2  ;;  %v3818_v47 = vadd.f32 %v3817_v10, %v3000_v6 }
 0x295   : > { %5695 = vst.msk [vmem:[%s8143_s21 + $0x17c] sm:$0xf] %vm5599_vm2, %v6626_v58  ;;  %v3005_v45 = vpop.f32.mrf.mxu0  ;;  %3196 = vmatmul.mubr.bf16.gmra.mxu0 %v7497_v28  ;;  %v6936_v15 = vpop.f32.mrf.mxu1 }
 0x296   : > { %5693 = vst.msk [vmem:[%s8143_s21 + $0x174] sm:$0xf] %vm5599_vm2, %v6624_v8  ;;  %v4715_v49 = vmax.f32 %v4519_v26, 0.0  ;;  %v4317_v12 = vmul.f32 %v8512_v56, %v3818_v47  ;;  %v3823_v30 = vadd.f32 %v6932_v39, %v3005_v45  ;;  %v8884_v8 = vld [vmem:[%s9439_s3] ss:$0 sm:$0xff] }
 0x297   : > { %v3007_v21 = vpop.f32.mrf.mxu0  ;;  %v3830_v60 = vpop.f32.mrf.mxu1 }
 0x298   : > { %v6627_v59 = vpack.c.bf16 %v4715_v49, %v4715_v49  ;;  %v4520_v42 = vadd.f32 %v8522_v1, %v4317_v12  ;;  %v4318_v31 = vmul.f32 %v8512_v56, %v3823_v30 }
 0x299   : > { %v3008_v16 = vpop.f32.mrf.mxu0  ;;  %v6937_v62 = vpop.f32.mrf.mxu1 }
 0x29a   : > { %5696 = vst.msk [vmem:[%s8143_s21 + $0x180] sm:$0xf] %vm5599_vm2, %v6627_v59  ;;  %v4716_v0 = vmax.f32 %v4520_v42, 0.0  ;;  %v4521_v63 = vadd.f32 %v8522_v1, %v4318_v31  ;;  %v3826_v3 = vadd.f32 %v6933_v41, %v3008_v16 }
 0x29b   : > { %v3010_v19 = vpop.f32.mrf.mxu0  ;;  %v3833_v61 = vpop.f32.mrf.mxu1 }
 0x29c   : > { %v6628_v37 = vpack.c.bf16 %v4716_v0, %v4716_v0  ;;  %v4717_v46 = vmax.f32 %v4521_v63, 0.0  ;;  %v4319_v17 = vmul.f32 %v8512_v56, %v3826_v3 }
 0x29d   : > { %v3013_v55 = vpop.f32.mrf.mxu0  ;;  %v8848_v18 = vpop.f32.mrf.mxu1 }
 0x29e   : > { %5697 = vst.msk [vmem:[%s8143_s21 + $0x184] sm:$0xf] %vm5599_vm2, %v6628_v37  ;;  %v6629_v25 = vpack.c.bf16 %v4717_v46, %v4717_v46  ;;  %v4522_v50 = vadd.f32 %v8522_v1, %v4319_v17  ;;  %v3831_v14 = vadd.f32 %v3830_v60, %v3013_v55 }
 0x29f   : > { %v3015_v53 = vpop.f32.mrf.mxu0  ;;  %v3846_v36 = vpop.f32.mrf.mxu1 }
 0x2a0   : > { %5698 = vst.msk [vmem:[%s8143_s21 + $0x188] sm:$0xf] %vm5599_vm2, %v6629_v25  ;;  %v4718_v9 = vmax.f32 %v4522_v50, 0.0  ;;  %v4320_v13 = vmul.f32 %v8512_v56, %v3831_v14 }
 0x2a1   : > { %v3016_v51 = vpop.f32.mrf.mxu0  ;;  %v8856_v52 = vpop.f32.mrf.mxu1 }
 0x2a2   : > { %v6630_v38 = vpack.c.bf16 %v4718_v9, %v4718_v9  ;;  %v4523_v48 = vadd.f32 %v8522_v1, %v4320_v13  ;;  %v3834_v29 = vadd.f32 %v3833_v61, %v3016_v51 }
 0x2a3   : > { %v3018_v27 = vpop.f32.mrf.mxu0  ;;  %v3849_v23 = vpop.f32.mrf.mxu1 }
 0x2a4   : > { %5699 = vst.msk [vmem:[%s8143_s21 + $0x18c] sm:$0xf] %vm5599_vm2, %v6630_v38  ;;  %v4719_v33 = vmax.f32 %v4523_v48, 0.0  ;;  %v4321_v5 = vmul.f32 %v8512_v56, %v3834_v29 }
 0x2a5   : > { %v3021_v43 = vpop.f32.mrf.mxu0  ;;  %v8862_v32 = vpop.f32.mrf.mxu1 }
 0x2a6   : > { %v6631_v39 = vpack.c.bf16 %v4719_v33, %v4719_v33  ;;  %v4524_v24 = vadd.f32 %v8522_v1, %v4321_v5  ;;  %v3839_v54 = vadd.f32 %v6936_v15, %v3021_v43 }
 0x2a7   : > { %v3023_v7 = vpop.f32.mrf.mxu0  ;;  %v3862_v40 = vpop.f32.mrf.mxu1 }
 0x2a8   : > { %5700 = vst.msk [vmem:[%s8143_s21 + $0x190] sm:$0xf] %vm5599_vm2, %v6631_v39  ;;  %v4720_v34 = vmax.f32 %v4524_v24, 0.0  ;;  %v4322_v56 = vmul.f32 %v8870_v20, %v3839_v54 }
 0x2a9   : > { %v3024_v4 = vpop.f32.mrf.mxu0  ;;  %v8873_v35 = vpop.f32.mrf.mxu1 }
 0x2aa   : > { %v6632_v44 = vpack.c.bf16 %v4720_v34, %v4720_v34  ;;  %v4525_v22 = vadd.f32 %v8522_v1, %v4322_v56  ;;  %v3842_v6 = vadd.f32 %v6937_v62, %v3024_v4 }
 0x2ab   : > { %v3026_v41 = vpop.f32.mrf.mxu0  ;;  %v3865_v28 = vpop.f32.mrf.mxu1 }
 0x2ac   : > { %5701 = vst.msk [vmem:[%s8143_s21 + $0x194] sm:$0xf] %vm5599_vm2, %v6632_v44  ;;  %v4721_v57 = vmax.f32 %v4525_v22, 0.0  ;;  %v4323_v2 = vmul.f32 %v8870_v20, %v3842_v6 }
 0x2ad   : > { %v3029_v58 = vpop.f32.mrf.mxu0  ;;  %v8879_v11 = vpop.f32.mrf.mxu1 }
 0x2ae   : > { %v6633_v10 = vpack.c.bf16 %v4721_v57, %v4721_v57  ;;  %v4526_v1 = vadd.f32 %v8884_v8, %v4323_v2  ;;  %v3847_v26 = vadd.f32 %v3846_v36, %v3029_v58 }
 0x2af   : > { %v3031_v47 = vpop.f32.mrf.mxu0  ;;  %v8887_v45 = vpop.f32.mrf.mxu1 }
 0x2b0   : > { %5702 = vst.msk [vmem:[%s8143_s21 + $0x198] sm:$0xf] %vm5599_vm2, %v6633_v10  ;;  %v4722_v15 = vmax.f32 %v4526_v1, 0.0  ;;  %v4324_v49 = vmul.f32 %v8870_v20, %v3847_v26 }
 0x2b1   : > { %v3032_v12 = vpop.f32.mrf.mxu0  ;;  %v8892_v30 = vpop.f32.mrf.mxu1 }
 0x2b2   : > { %v6634_v21 = vpack.c.bf16 %v4722_v15, %v4722_v15  ;;  %v4527_v60 = vadd.f32 %v8884_v8, %v4324_v49  ;;  %v3850_v59 = vadd.f32 %v3849_v23, %v3032_v12 }
 0x2b3   : > { %v3034_v42 = vpop.f32.mrf.mxu0  ;;  %v8895_v31 = vpop.f32.mrf.mxu1 }
 0x2b4   : > { %5703 = vst.msk [vmem:[%s8143_s21 + $0x19c] sm:$0xf] %vm5599_vm2, %v6634_v21  ;;  %v4723_v16 = vmax.f32 %v4527_v60, 0.0  ;;  %v4325_v62 = vmul.f32 %v8870_v20, %v3850_v59 }
 0x2b5   : > { %v3037_v0 = vpop.f32.mrf.mxu0  ;;  %v8900_v63 = vpop.f32.mrf.mxu1 }
 0x2b6   : > { %v6635_v3 = vpack.c.bf16 %v4723_v16, %v4723_v16  ;;  %v4528_v19 = vadd.f32 %v8884_v8, %v4325_v62  ;;  %v3855_v61 = vadd.f32 %v8848_v18, %v3037_v0 }
 0x2b7   : > { %v3039_v37 = vpop.f32.mrf.mxu0  ;;  %v8904_v46 = vpop.f32.mrf.mxu1 }
 0x2b8   : > { %5704 = vst.msk [vmem:[%s8143_s21 + $0x1a0] sm:$0xf] %vm5599_vm2, %v6635_v3  ;;  %v4724_v17 = vmax.f32 %v4528_v19, 0.0  ;;  %v4326_v55 = vmul.f32 %v8870_v20, %v3855_v61 }
 0x2b9   : > { %v3040_v25 = vpop.f32.mrf.mxu0  ;;  %v8909_v50 = vpop.f32.mrf.mxu1 }
 0x2ba   : > { %v6636_v14 = vpack.c.bf16 %v4724_v17, %v4724_v17  ;;  %v4529_v53 = vadd.f32 %v8884_v8, %v4326_v55  ;;  %v3858_v36 = vadd.f32 %v8856_v52, %v3040_v25 }
 0x2bb   : > { %v3042_v9 = vpop.f32.mrf.mxu0  ;;  %v8913_v13 = vpop.f32.mrf.mxu1 }
 0x2bc   : > { %5705 = vst.msk [vmem:[%s8143_s21 + $0x1a4] sm:$0xf] %vm5599_vm2, %v6636_v14  ;;  %v4725_v18 = vmax.f32 %v4529_v53, 0.0  ;;  %v4327_v51 = vmul.f32 %v8870_v20, %v3858_v36 }
 0x2bd   : > { %v3045_v38 = vpop.f32.mrf.mxu0  ;;  %v8918_v48 = vpop.f32.mrf.mxu1 }
 0x2be   : > { %v6637_v29 = vpack.c.bf16 %v4725_v18, %v4725_v18  ;;  %v4530_v27 = vadd.f32 %v8884_v8, %v4327_v51  ;;  %v3863_v23 = vadd.f32 %v3862_v40, %v3045_v38 }
 0x2bf   : > { %v3047_v33 = vpop.f32.mrf.mxu0  ;;  %v8921_v5 = vpop.f32.mrf.mxu1 }
 0x2c0   : > { %5706 = vst.msk [vmem:[%s8143_s21 + $0x1a8] sm:$0xf] %vm5599_vm2, %v6637_v29  ;;  %v4726_v52 = vmax.f32 %v4530_v27, 0.0  ;;  %v4328_v43 = vmul.f32 %v8870_v20, %v3863_v23 }
 0x2c1   : > { %v3048_v39 = vpop.f32.mrf.mxu0  ;;  %v8926_v24 = vpop.f32.mrf.mxu1 }
 0x2c2   : > { %v6638_v54 = vpack.c.bf16 %v4726_v52, %v4726_v52  ;;  %v4531_v7 = vadd.f32 %v8884_v8, %v4328_v43  ;;  %v3866_v34 = vadd.f32 %v3865_v28, %v3048_v39 }
 0x2c3   : > { %v3050_v56 = vpop.f32.mrf.mxu0  ;;  %v8929_v4 = vpop.f32.mrf.mxu1 }
 0x2c4   : > { %5707 = vst.msk [vmem:[%s8143_s21 + $0x1ac] sm:$0xf] %vm5599_vm2, %v6638_v54  ;;  %v4727_v40 = vmax.f32 %v4531_v7, 0.0  ;;  %v4329_v44 = vmul.f32 %v8870_v20, %v3866_v34 }
 0x2c5   : > { %v3053_v22 = vpop.f32.mrf.mxu0  ;;  %v8934_v6 = vpop.f32.mrf.mxu1 }
 0x2c6   : > { %v6639_v41 = vpack.c.bf16 %v4727_v40, %v4727_v40  ;;  %v4532_v57 = vadd.f32 %v8884_v8, %v4329_v44  ;;  %v3871_v2 = vadd.f32 %v8862_v32, %v3053_v22 }
 0x2c7   : > { %v3055_v58 = vpop.f32.mrf.mxu0  ;;  %v8938_v10 = vpop.f32.mrf.mxu1 }
 0x2c8   : > { %5708 = vst.msk [vmem:[%s8143_s21 + $0x1b0] sm:$0xf] %vm5599_vm2, %v6639_v41  ;;  %v4728_v28 = vmax.f32 %v4532_v57, 0.0  ;;  %v4330_v1 = vmul.f32 %v8870_v20, %v3871_v2 }
 0x2c9   : > { %v3056_v26 = vpop.f32.mrf.mxu0  ;;  %v8943_v47 = vpop.f32.mrf.mxu1 }
 0x2ca   : > { %v6640_v15 = vpack.c.bf16 %v4728_v28, %v4728_v28  ;;  %v4533_v49 = vadd.f32 %v8884_v8, %v4330_v1  ;;  %v3874_v12 = vadd.f32 %v8873_v35, %v3056_v26 }
 0x2cb   : > { %v3058_v21 = vpop.f32.mrf.mxu0  ;;  %v8947_v60 = vpop.f32.mrf.mxu1 }
 0x2cc   : > { %5709 = vst.msk [vmem:[%s8143_s21 + $0x1b4] sm:$0xf] %vm5599_vm2, %v6640_v15  ;;  %v4729_v32 = vmax.f32 %v4533_v49, 0.0  ;;  %v4331_v59 = vmul.f32 %v8870_v20, %v3874_v12 }
 0x2cd   : > { %v3061_v42 = vpop.f32.mrf.mxu0  ;;  %v8952_v16 = vpop.f32.mrf.mxu1 }
 0x2ce   : > { %v6641_v62 = vpack.c.bf16 %v4729_v32, %v4729_v32  ;;  %v4534_v0 = vadd.f32 %v8884_v8, %v4331_v59  ;;  %v3879_v3 = vadd.f32 %v8887_v45, %v3061_v42 }
 0x2cf   : > { %v3063_v19 = vpop.f32.mrf.mxu0  ;;  %v8956_v61 = vpop.f32.mrf.mxu1 }
 0x2d0   : > { %5710 = vst.msk [vmem:[%s8143_s21 + $0x1b8] sm:$0xf] %vm5599_vm2, %v6641_v62  ;;  %v4730_v35 = vmax.f32 %v4534_v0, 0.0  ;;  %v4332_v37 = vmul.f32 %v8870_v20, %v3879_v3 }
 0x2d1   : > { %v3064_v17 = vpop.f32.mrf.mxu0  ;;  %v8961_v55 = vpop.f32.mrf.mxu1 }
 0x2d2   : > { %v6642_v25 = vpack.c.bf16 %v4730_v35, %v4730_v35  ;;  %v4535_v14 = vadd.f32 %v8884_v8, %v4332_v37  ;;  %v3882_v53 = vadd.f32 %v8895_v31, %v3064_v17 }
 0x2d3   : > { %v3066_v36 = vpop.f32.mrf.mxu0  ;;  %v8965_v9 = vpop.f32.mrf.mxu1 }
 0x2d4   : > { %5711 = vst.msk [vmem:[%s8143_s21 + $0x1bc] sm:$0xf] %vm5599_vm2, %v6642_v25  ;;  %v4731_v45 = vmax.f32 %v4535_v14, 0.0  ;;  %v4333_v18 = vmul.f32 %v8870_v20, %v3882_v53 }
 0x2d5   : > { %v3069_v51 = vpop.f32.mrf.mxu0  ;;  %v8970_v38 = vpop.f32.mrf.mxu1 }
 0x2d6   : > { %v6643_v29 = vpack.c.bf16 %v4731_v45, %v4731_v45  ;;  %v4536_v27 = vadd.f32 %v8884_v8, %v4333_v18  ;;  %v3887_v23 = vadd.f32 %v8879_v11, %v3069_v51 }
 0x2d7   : > { %v3071_v33 = vpop.f32.mrf.mxu0  ;;  %v8974_v52 = vpop.f32.mrf.mxu1 }
 0x2d8   : > { %5712 = vst.msk [vmem:[%s8143_s21 + $0x1c0] sm:$0xf] %vm5599_vm2, %v6643_v29  ;;  %v4732_v31 = vmax.f32 %v4536_v27, 0.0  ;;  %v4334_v43 = vmul.f32 %v8870_v20, %v3887_v23 }
 0x2d9   : > { %v3072_v39 = vpop.f32.mrf.mxu0  ;;  %v8979_v54 = vpop.f32.mrf.mxu1 }
 0x2da   : > { %v6644_v7 = vpack.c.bf16 %v4732_v31, %v4732_v31  ;;  %v4537_v34 = vadd.f32 %v8884_v8, %v4334_v43  ;;  %v3890_v56 = vadd.f32 %v8892_v30, %v3072_v39 }
 0x2db   : > { %v3074_v40 = vpop.f32.mrf.mxu0  ;;  %v8983_v44 = vpop.f32.mrf.mxu1 }
 0x2dc   : > { %5713 = vst.msk [vmem:[%s8143_s21 + $0x1c4] sm:$0xf] %vm5599_vm2, %v6644_v7  ;;  %v4733_v11 = vmax.f32 %v4537_v34, 0.0  ;;  %v4335_v22 = vmul.f32 %v8870_v20, %v3890_v56 }
 0x2dd   : > { %v3077_v41 = vpop.f32.mrf.mxu0  ;;  %v8988_v57 = vpop.f32.mrf.mxu1 }
 0x2de   : > { %v6645_v2 = vpack.c.bf16 %v4733_v11, %v4733_v11  ;;  %v4538_v58 = vadd.f32 %v8884_v8, %v4335_v22  ;;  %v3895_v28 = vadd.f32 %v8904_v46, %v3077_v41 }
 0x2df   : > { %v3079_v1 = vpop.f32.mrf.mxu0  ;;  %v8992_v26 = vpop.f32.mrf.mxu1 }
 0x2e0   : > { %5714 = vst.msk [vmem:[%s8143_s21 + $0x1c8] sm:$0xf] %vm5599_vm2, %v6645_v2  ;;  %v4734_v30 = vmax.f32 %v4538_v58, 0.0  ;;  %v4336_v15 = vmul.f32 %v8870_v20, %v3895_v28 }
 0x2e1   : > { %v3080_v49 = vpop.f32.mrf.mxu0  ;;  %v8997_v12 = vpop.f32.mrf.mxu1 }
 0x2e2   : > { %v6646_v21 = vpack.c.bf16 %v4734_v30, %v4734_v30  ;;  %v4539_v32 = vadd.f32 %v8884_v8, %v4336_v15  ;;  %v3898_v59 = vadd.f32 %v8913_v13, %v3080_v49 }
 0x2e3   : > { %v3082_v42 = vpop.f32.mrf.mxu0  ;;  %v9001_v62 = vpop.f32.mrf.mxu1 }
 0x2e4   : > { %5715 = vst.msk [vmem:[%s8143_s21 + $0x1cc] sm:$0xf] %vm5599_vm2, %v6646_v21  ;;  %v4735_v46 = vmax.f32 %v4539_v32, 0.0  ;;  %v4337_v0 = vmul.f32 %v8870_v20, %v3898_v59 }
 0x2e5   : > { %v3085_v3 = vpop.f32.mrf.mxu0  ;;  %v9006_v19 = vpop.f32.mrf.mxu1 }
 0x2e6   : > { %v6647_v35 = vpack.c.bf16 %v4735_v46, %v4735_v46  ;;  %v4540_v37 = vadd.f32 %v8884_v8, %v4337_v0  ;;  %v3903_v17 = vadd.f32 %v8900_v63, %v3085_v3  ;;  %v9495_v46 = vld [vmem:[#allocation4_spill] sm:$0xff] }
 0x2e7   : > { %v3087_v25 = vpop.f32.mrf.mxu0  ;;  %v9010_v14 = vpop.f32.mrf.mxu1 }
 0x2e8   : > { %5716 = vst.msk [vmem:[%s8143_s21 + $0x1d0] sm:$0xf] %vm5599_vm2, %v6647_v35  ;;  %v4736_v13 = vmax.f32 %v4540_v37, 0.0  ;;  %v4338_v53 = vmul.f32 %v8870_v20, %v3903_v17  ;;  %v9496_v25 = vld [vmem:[#allocation2_spill] sm:$0xff] }
 0x2e9   : > { %v3088_v36 = vpop.f32.mrf.mxu0  ;;  %v9015_v45 = vpop.f32.mrf.mxu1 }
 0x2ea   : > { %v6648_v18 = vpack.c.bf16 %v4736_v13, %v4736_v13  ;;  %v4541_v51 = vadd.f32 %v8884_v8, %v4338_v53  ;;  %v3906_v29 = vadd.f32 %v8909_v50, %v3088_v36 }
 0x2eb   : > { %v3090_v27 = vpop.f32.mrf.mxu0  ;;  %v9019_v23 = vpop.f32.mrf.mxu1 }
 0x2ec   : > { %5717 = vst.msk [vmem:[%s8143_s21 + $0x1d4] sm:$0xf] %vm5599_vm2, %v6648_v18  ;;  %v4737_v63 = vmax.f32 %v4541_v51, 0.0  ;;  %v4339_v33 = vmul.f32 %v8870_v20, %v3906_v29 }
 0x2ed   : > { %v3093_v31 = vpop.f32.mrf.mxu0  ;;  %v9024_v43 = vpop.f32.mrf.mxu1 }
 0x2ee   : > { %v6649_v39 = vpack.c.bf16 %v4737_v63, %v4737_v63  ;;  %v4542_v7 = vadd.f32 %v8884_v8, %v4339_v33  ;;  %v3911_v34 = vadd.f32 %v8921_v5, %v3093_v31  ;;  %v9497_v63 = vld [vmem:[#allocation5_spill] sm:$0xff] }
 0x2ef   : > { %v3095_v56 = vpop.f32.mrf.mxu0  ;;  %v9028_v40 = vpop.f32.mrf.mxu1 }
 0x2f0   : > { %5718 = vst.msk [vmem:[%s8143_s21 + $0x1d8] sm:$0xf] %vm5599_vm2, %v6649_v39  ;;  %v4738_v50 = vmax.f32 %v4542_v7, 0.0  ;;  %v4340_v11 = vmul.f32 %v8870_v20, %v3911_v34 }
 0x2f1   : > { %v3096_v22 = vpop.f32.mrf.mxu0  ;;  %v9033_v41 = vpop.f32.mrf.mxu1 }
 0x2f2   : > { %v6650_v2 = vpack.c.bf16 %v4738_v50, %v4738_v50  ;;  %v4543_v58 = vadd.f32 %v8884_v8, %v4340_v11  ;;  %v3914_v28 = vadd.f32 %v8929_v4, %v3096_v22  ;;  %v9498_v50 = vld [vmem:[#allocation3_spill] sm:$0xff] }
 0x2f3   : > { %v3098_v1 = vpop.f32.mrf.mxu0  ;;  %v9037_v30 = vpop.f32.mrf.mxu1 }
 0x2f4   : > { %5719 = vst.msk [vmem:[%s8143_s21 + $0x1dc] sm:$0xf] %vm5599_vm2, %v6650_v2  ;;  %v4739_v5 = vmax.f32 %v4543_v58, 0.0  ;;  %v4341_v15 = vmul.f32 %v8870_v20, %v3914_v28 }
 0x2f5   : > { %v3101_v49 = vpop.f32.mrf.mxu0  ;;  %v6984_v21 = vpop.f32.mrf.mxu1 }
 0x2f6   : > { %v6651_v32 = vpack.c.bf16 %v4739_v5, %v4739_v5  ;;  %v4544_v59 = vadd.f32 %v8884_v8, %v4341_v15  ;;  %v3919_v42 = vadd.f32 %v8918_v48, %v3101_v49  ;;  %v4031_v0 = vadd.f32 %v6984_v21, %v9495_v46 }
 0x2f7   : > { %v3103_v3 = vpop.f32.mrf.mxu0  ;;  %v4022_v35 = vpop.f32.mrf.mxu1 }
 0x2f8   : > { %5720 = vst.msk [vmem:[%s8143_s21 + $0x1e0] sm:$0xf] %vm5599_vm2, %v6651_v32  ;;  %v4740_v4 = vmax.f32 %v4544_v59, 0.0  ;;  %v4342_v37 = vmul.f32 %v8870_v20, %v3919_v42  ;;  %v4370_v17 = vmul.f32 %v8870_v20, %v4031_v0  ;;  %v4023_v13 = vadd.f32 %v4022_v35, %v9496_v25  ;;  %v9499_v59 = vld [vmem:[#allocation8_spill] sm:$0xff] }
 0x2f9   : > { %v3104_v53 = vpop.f32.mrf.mxu0  ;;  %v6985_v36 = vpop.f32.mrf.mxu1 }
 0x2fa   : > { %v6652_v18 = vpack.c.bf16 %v4740_v4, %v4740_v4  ;;  %v4545_v51 = vadd.f32 %v8884_v8, %v4342_v37  ;;  %v4573_v48 = vadd.f32 %v8884_v8, %v4370_v17  ;;  %v4368_v29 = vmul.f32 %v8870_v20, %v4023_v13  ;;  %v9500_v4 = vld [vmem:[#allocation6_spill] sm:$0xff] }
 0x2fb   : > { %v3922_v27 = vadd.f32 %v8926_v24, %v3104_v53  ;;  %v4034_v33 = vadd.f32 %v6985_v36, %v9497_v63  ;;  %v3106_v31 = vpop.f32.mrf.mxu0  ;;  %v4025_v39 = vpop.f32.mrf.mxu1 }
 0x2fc   : > { %5721 = vst.msk [vmem:[%s8143_s21 + $0x1e4] sm:$0xf] %vm5599_vm2, %v6652_v18  ;;  %v4741_v7 = vmax.f32 %v4545_v51, 0.0  ;;  %v4769_v34 = vmax.f32 %v4573_v48, 0.0  ;;  %v4571_v56 = vadd.f32 %v8884_v8, %v4368_v29  ;;  %v4026_v11 = vadd.f32 %v4025_v39, %v9498_v50  ;;  %v9501_v29 = vld [vmem:[#allocation9_spill] sm:$0xff] }
 0x2fd   : > { %v4343_v22 = vmul.f32 %v8870_v20, %v3922_v27  ;;  %v4371_v2 = vmul.f32 %v8870_v20, %v4034_v33  ;;  %v3109_v58 = vpop.f32.mrf.mxu0  ;;  %v6988_v24 = vpop.f32.mrf.mxu1 }
 0x2fe   : > { %v6653_v28 = vpack.c.bf16 %v4741_v7, %v4741_v7  ;;  %v6681_v1 = vpack.c.bf16 %v4769_v34, %v4769_v34  ;;  %v4767_v5 = vmax.f32 %v4571_v56, 0.0  ;;  %v4369_v15 = vmul.f32 %v8870_v20, %v4026_v11 }
 0x2ff   : > { %v4546_v49 = vadd.f32 %v8884_v8, %v4343_v22  ;;  %v4574_v21 = vadd.f32 %v8884_v8, %v4371_v2  ;;  %v3927_v32 = vadd.f32 %v8938_v10, %v3109_v58  ;;  %v4047_v42 = vadd.f32 %v6988_v24, %v9499_v59  ;;  %v3111_v46 = vpop.f32.mrf.mxu0  ;;  %v4038_v0 = vpop.f32.mrf.mxu1  ;;  %v9502_v58 = vld [vmem:[#allocation7_spill] sm:$0xff] }
 0x300   : > { %5722 = vst.msk [vmem:[%s8143_s21 + $0x1e8] sm:$0xf] %vm5599_vm2, %v6653_v28  ;;  %5750 = vst.msk [vmem:[%s8143_s21 + $0x258] sm:$0xf] %vm5599_vm2, %v6681_v1  ;;  %v6679_v3 = vpack.c.bf16 %v4767_v5, %v4767_v5  ;;  %v4572_v35 = vadd.f32 %v8884_v8, %v4369_v15  ;;  %v4039_v37 = vadd.f32 %v4038_v0, %v9500_v4  ;;  %v9503_v46 = vld [vmem:[#allocation12_spill] sm:$0xff] }
 0x301   : > { %v4742_v17 = vmax.f32 %v4546_v49, 0.0  ;;  %v4770_v25 = vmax.f32 %v4574_v21, 0.0  ;;  %v4344_v13 = vmul.f32 %v8870_v20, %v3927_v32  ;;  %v4374_v53 = vmul.f32 %v8870_v20, %v4047_v42  ;;  %v3112_v10 = vpop.f32.mrf.mxu0  ;;  %v6989_v36 = vpop.f32.mrf.mxu1 }
 0x302   : > { %5748 = vst.msk [vmem:[%s8143_s21 + $0x250] sm:$0xf] %vm5599_vm2, %v6679_v3  ;;  %v4768_v18 = vmax.f32 %v4572_v35, 0.0  ;;  %v4372_v51 = vmul.f32 %v8870_v20, %v4039_v37  ;;  %v3930_v48 = vadd.f32 %v8947_v60, %v3112_v10  ;;  %v4050_v27 = vadd.f32 %v6989_v36, %v9501_v29 }
 0x303   : > { %v6654_v63 = vpack.c.bf16 %v4742_v17, %v4742_v17  ;;  %v6682_v33 = vpack.c.bf16 %v4770_v25, %v4770_v25  ;;  %v4547_v31 = vadd.f32 %v8884_v8, %v4344_v13  ;;  %v4577_v39 = vadd.f32 %v8884_v8, %v4374_v53  ;;  %v3114_v7 = vpop.f32.mrf.mxu0  ;;  %v4041_v34 = vpop.f32.mrf.mxu1  ;;  %v9504_v53 = vld [vmem:[#allocation10_spill] sm:$0xff] }
 0x304   : > { %v6680_v56 = vpack.c.bf16 %v4768_v18, %v4768_v18  ;;  %v4575_v50 = vadd.f32 %v8884_v8, %v4372_v51  ;;  %v4345_v11 = vmul.f32 %v8870_v20, %v3930_v48  ;;  %v4375_v22 = vmul.f32 %v8870_v20, %v4050_v27 }
 0x305   : > { %5723 = vst.msk [vmem:[%s8143_s21 + $0x1ec] sm:$0xf] %vm5599_vm2, %v6654_v63  ;;  %5751 = vst.msk [vmem:[%s8143_s21 + $0x25c] sm:$0xf] %vm5599_vm2, %v6682_v33  ;;  %v4743_v60 = vmax.f32 %v4547_v31, 0.0  ;;  %v4773_v2 = vmax.f32 %v4577_v39, 0.0  ;;  %v4042_v24 = vadd.f32 %v4041_v34, %v9502_v58  ;;  %v3117_v28 = vpop.f32.mrf.mxu0  ;;  %v6992_v1 = vpop.f32.mrf.mxu1 }
 0x306   : > { %5749 = vst.msk [vmem:[%s8143_s21 + $0x254] sm:$0xf] %vm5599_vm2, %v6680_v56  ;;  %v4771_v5 = vmax.f32 %v4575_v50, 0.0  ;;  %v4548_v15 = vadd.f32 %v8884_v8, %v4345_v11  ;;  %v4578_v49 = vadd.f32 %v8884_v8, %v4375_v22  ;;  %v3935_v21 = vadd.f32 %v8934_v6, %v3117_v28  ;;  %v9505_v39 = vld [vmem:[#allocation13_spill] sm:$0xff]  ;;  %v9506_v22 = vld [vmem:[#allocation11_spill] sm:$0xff] }
 0x307   : > { %v6655_v32 = vpack.c.bf16 %v4743_v60, %v4743_v60  ;;  %v6685_v59 = vpack.c.bf16 %v4773_v2, %v4773_v2  ;;  %v4373_v42 = vmul.f32 %v8870_v20, %v4042_v24  ;;  %v4063_v0 = vadd.f32 %v6992_v1, %v9503_v46  ;;  %v3119_v3 = vpop.f32.mrf.mxu0  ;;  %v4054_v35 = vpop.f32.mrf.mxu1  ;;  %v9507_v46 = vld [vmem:[#allocation16_spill] sm:$0xff] }
 0x308   : > { %v6683_v4 = vpack.c.bf16 %v4771_v5, %v4771_v5  ;;  %v4744_v37 = vmax.f32 %v4548_v15, 0.0  ;;  %v4774_v17 = vmax.f32 %v4578_v49, 0.0  ;;  %v4346_v25 = vmul.f32 %v8870_v20, %v3935_v21 }
 0x309   : > { %5724 = vst.msk [vmem:[%s8143_s21 + $0x1f0] sm:$0xf] %vm5599_vm2, %v6655_v32  ;;  %5754 = vst.msk [vmem:[%s8143_s21 + $0x268] sm:$0xf] %vm5599_vm2, %v6685_v59  ;;  %v4576_v6 = vadd.f32 %v8884_v8, %v4373_v42  ;;  %v4378_v13 = vmul.f32 %v8870_v20, %v4063_v0  ;;  %v4055_v10 = vadd.f32 %v4054_v35, %v9504_v53  ;;  %v3120_v36 = vpop.f32.mrf.mxu0  ;;  %v6993_v18 = vpop.f32.mrf.mxu1 }
 0x30a   : > { %5752 = vst.msk [vmem:[%s8143_s21 + $0x260] sm:$0xf] %vm5599_vm2, %v6683_v4  ;;  %v6656_v51 = vpack.c.bf16 %v4744_v37, %v4744_v37  ;;  %v6686_v48 = vpack.c.bf16 %v4774_v17, %v4774_v17  ;;  %v4549_v29 = vadd.f32 %v8884_v8, %v4346_v25  ;;  %v3938_v27 = vadd.f32 %v8943_v47, %v3120_v36  ;;  %v9508_v25 = vld [vmem:[#allocation14_spill] sm:$0xff] }
 0x30b   : > { %v4772_v63 = vmax.f32 %v4576_v6, 0.0  ;;  %v4581_v33 = vadd.f32 %v8884_v8, %v4378_v13  ;;  %v4376_v31 = vmul.f32 %v8870_v20, %v4055_v10  ;;  %v4066_v7 = vadd.f32 %v6993_v18, %v9505_v39  ;;  %v3122_v34 = vpop.f32.mrf.mxu0  ;;  %v4057_v56 = vpop.f32.mrf.mxu1 }
 0x30c   : > { %5725 = vst.msk [vmem:[%s8143_s21 + $0x1f4] sm:$0xf] %vm5599_vm2, %v6656_v51  ;;  %5755 = vst.msk [vmem:[%s8143_s21 + $0x26c] sm:$0xf] %vm5599_vm2, %v6686_v48  ;;  %v4745_v50 = vmax.f32 %v4549_v29, 0.0  ;;  %v4347_v11 = vmul.f32 %v8870_v20, %v3938_v27  ;;  %v4058_v60 = vadd.f32 %v4057_v56, %v9506_v22  ;;  %v9510_v22 = vld [vmem:[#allocation15_spill] sm:$0xff] }
 0x30d   : > { %v6684_v47 = vpack.c.bf16 %v4772_v63, %v4772_v63  ;;  %v4777_v2 = vmax.f32 %v4581_v33, 0.0  ;;  %v4579_v58 = vadd.f32 %v8884_v8, %v4376_v31  ;;  %v4379_v24 = vmul.f32 %v8870_v20, %v4066_v7  ;;  %v3125_v28 = vpop.f32.mrf.mxu0  ;;  %v6996_v1 = vpop.f32.mrf.mxu1  ;;  %v9509_v31 = vld [vmem:[#allocation17_spill] sm:$0xff] }
 0x30e   : > { %v6657_v5 = vpack.c.bf16 %v4745_v50, %v4745_v50  ;;  %v4550_v15 = vadd.f32 %v8884_v8, %v4347_v11  ;;  %v4377_v49 = vmul.f32 %v8870_v20, %v4058_v60  ;;  %v3943_v21 = vadd.f32 %v8956_v61, %v3125_v28 }
 0x30f   : > { %5753 = vst.msk [vmem:[%s8143_s21 + $0x264] sm:$0xf] %vm5599_vm2, %v6684_v47  ;;  %v6689_v32 = vpack.c.bf16 %v4777_v2, %v4777_v2  ;;  %v4775_v59 = vmax.f32 %v4579_v58, 0.0  ;;  %v4582_v42 = vadd.f32 %v8884_v8, %v4379_v24  ;;  %v4079_v0 = vadd.f32 %v6996_v1, %v9507_v46  ;;  %v3127_v3 = vpop.f32.mrf.mxu0  ;;  %v4070_v35 = vpop.f32.mrf.mxu1 }
 0x310   : > { %5726 = vst.msk [vmem:[%s8143_s21 + $0x1f8] sm:$0xf] %vm5599_vm2, %v6657_v5  ;;  %v4746_v4 = vmax.f32 %v4550_v15, 0.0  ;;  %v4580_v37 = vadd.f32 %v8884_v8, %v4377_v49  ;;  %v4348_v17 = vmul.f32 %v8870_v20, %v3943_v21  ;;  %v4071_v61 = vadd.f32 %v4070_v35, %v9508_v25 }
 0x311   : > { %5758 = vst.msk [vmem:[%s8143_s21 + $0x278] sm:$0xf] %vm5599_vm2, %v6689_v32  ;;  %v6687_v6 = vpack.c.bf16 %v4775_v59, %v4775_v59  ;;  %v4778_v13 = vmax.f32 %v4582_v42, 0.0  ;;  %v4382_v53 = vmul.f32 %v8870_v20, %v4079_v0  ;;  %v3128_v10 = vpop.f32.mrf.mxu0  ;;  %v6997_v36 = vpop.f32.mrf.mxu1  ;;  %v9511_v59 = vld [vmem:[#allocation20_spill] sm:$0xff] }
 0x312   : > { %v6658_v18 = vpack.c.bf16 %v4746_v4, %v4746_v4  ;;  %v4776_v51 = vmax.f32 %v4580_v37, 0.0  ;;  %v4551_v48 = vadd.f32 %v8884_v8, %v4348_v17  ;;  %v4380_v29 = vmul.f32 %v8870_v20, %v4071_v61  ;;  %v9512_v37 = vld [vmem:[#allocation18_spill] sm:$0xff] }
 0x313   : > { %5756 = vst.msk [vmem:[%s8143_s21 + $0x270] sm:$0xf] %vm5599_vm2, %v6687_v6  ;;  %v6690_v27 = vpack.c.bf16 %v4778_v13, %v4778_v13  ;;  %v4585_v63 = vadd.f32 %v8884_v8, %v4382_v53  ;;  %v3946_v33 = vadd.f32 %v8965_v9, %v3128_v10  ;;  %v4082_v39 = vadd.f32 %v6997_v36, %v9509_v31  ;;  %v3130_v7 = vpop.f32.mrf.mxu0  ;;  %v4073_v34 = vpop.f32.mrf.mxu1 }
 0x314   : > { %5727 = vst.msk [vmem:[%s8143_s21 + $0x1fc] sm:$0xf] %vm5599_vm2, %v6658_v18  ;;  %v6688_v56 = vpack.c.bf16 %v4776_v51, %v4776_v51  ;;  %v4747_v50 = vmax.f32 %v4551_v48, 0.0  ;;  %v4583_v11 = vadd.f32 %v8884_v8, %v4380_v29  ;;  %v4074_v60 = vadd.f32 %v4073_v34, %v9510_v22 }
 0x315   : > { %5759 = vst.msk [vmem:[%s8143_s21 + $0x27c] sm:$0xf] %vm5599_vm2, %v6690_v27  ;;  %v4781_v47 = vmax.f32 %v4585_v63, 0.0  ;;  %v4349_v2 = vmul.f32 %v8870_v20, %v3946_v33  ;;  %v4383_v9 = vmul.f32 %v8870_v20, %v4082_v39  ;;  %v3133_v58 = vpop.f32.mrf.mxu0  ;;  %v7000_v24 = vpop.f32.mrf.mxu1  ;;  %v9513_v27 = vld [vmem:[#allocation21_spill] sm:$0xff] }
 0x316   : > { %5757 = vst.msk [vmem:[%s8143_s21 + $0x274] sm:$0xf] %vm5599_vm2, %v6688_v56  ;;  %v6659_v28 = vpack.c.bf16 %v4747_v50, %v4747_v50  ;;  %v4779_v1 = vmax.f32 %v4583_v11, 0.0  ;;  %v4381_v5 = vmul.f32 %v8870_v20, %v4074_v60  ;;  %v3951_v15 = vadd.f32 %v8952_v16, %v3133_v58  ;;  %v9514_v11 = vld [vmem:[#allocation19_spill] sm:$0xff] }
 0x317   : > { %v6693_v49 = vpack.c.bf16 %v4781_v47, %v4781_v47  ;;  %v4552_v21 = vadd.f32 %v8884_v8, %v4349_v2  ;;  %v4586_v32 = vadd.f32 %v8884_v8, %v4383_v9  ;;  %v4095_v42 = vadd.f32 %v7000_v24, %v9511_v59  ;;  %v3135_v46 = vpop.f32.mrf.mxu0  ;;  %v4086_v0 = vpop.f32.mrf.mxu1 }
 0x318   : > { %5728 = vst.msk [vmem:[%s8143_s21 + $0x200] sm:$0xf] %vm5599_vm2, %v6659_v28  ;;  %v6691_v3 = vpack.c.bf16 %v4779_v1, %v4779_v1  ;;  %v4584_v35 = vadd.f32 %v8884_v8, %v4381_v5  ;;  %v4350_v4 = vmul.f32 %v8870_v20, %v3951_v15  ;;  %v4087_v17 = vadd.f32 %v4086_v0, %v9512_v37  ;;  %v9515_v15 = vld [vmem:[#allocation24_spill] sm:$0xff]  ;;  %v9516_v0 = vld [vmem:[#allocation22_spill] sm:$0xff] }
 0x319   : > { %5762 = vst.msk [vmem:[%s8143_s21 + $0x288] sm:$0xf] %vm5599_vm2, %v6693_v49  ;;  %v4748_v16 = vmax.f32 %v4552_v21, 0.0  ;;  %v4782_v25 = vmax.f32 %v4586_v32, 0.0  ;;  %v4386_v61 = vmul.f32 %v8870_v20, %v4095_v42  ;;  %v3136_v6 = vpop.f32.mrf.mxu0  ;;  %v7001_v13 = vpop.f32.mrf.mxu1 }
 0x31a   : > { %5760 = vst.msk [vmem:[%s8143_s21 + $0x280] sm:$0xf] %vm5599_vm2, %v6691_v3  ;;  %v4780_v53 = vmax.f32 %v4584_v35, 0.0  ;;  %v4553_v10 = vadd.f32 %v8884_v8, %v4350_v4  ;;  %v4384_v36 = vmul.f32 %v8870_v20, %v4087_v17  ;;  %v3954_v18 = vadd.f32 %v8961_v55, %v3136_v6 }
 0x31b   : > { %v6660_v51 = vpack.c.bf16 %v4748_v16, %v4748_v16  ;;  %v6694_v48 = vpack.c.bf16 %v4782_v25, %v4782_v25  ;;  %v4589_v29 = vadd.f32 %v8884_v8, %v4386_v61  ;;  %v4098_v63 = vadd.f32 %v7001_v13, %v9513_v27  ;;  %v3138_v33 = vpop.f32.mrf.mxu0  ;;  %v4089_v31 = vpop.f32.mrf.mxu1 }
 0x31c   : > { %v6692_v39 = vpack.c.bf16 %v4780_v53, %v4780_v53  ;;  %v4749_v7 = vmax.f32 %v4553_v10, 0.0  ;;  %v4587_v34 = vadd.f32 %v8884_v8, %v4384_v36  ;;  %v4351_v56 = vmul.f32 %v8870_v20, %v3954_v18  ;;  %v9517_v36 = vld [vmem:[#allocation25_spill] sm:$0xff]  ;;  %v9518_v33 = vld [vmem:[#allocation23_spill] sm:$0xff] }
 0x31d   : > { %5729 = vst.msk [vmem:[%s8143_s21 + $0x204] sm:$0xf] %vm5599_vm2, %v6660_v51  ;;  %5763 = vst.msk [vmem:[%s8143_s21 + $0x28c] sm:$0xf] %vm5599_vm2, %v6694_v48  ;;  %v4785_v55 = vmax.f32 %v4589_v29, 0.0  ;;  %v4387_v50 = vmul.f32 %v8870_v20, %v4098_v63  ;;  %v4090_v22 = vadd.f32 %v4089_v31, %v9514_v11  ;;  %v3141_v60 = vpop.f32.mrf.mxu0  ;;  %v7004_v47 = vpop.f32.mrf.mxu1 }
 0x31e   : > { %5761 = vst.msk [vmem:[%s8143_s21 + $0x284] sm:$0xf] %vm5599_vm2, %v6692_v39  ;;  %v6661_v2 = vpack.c.bf16 %v4749_v7, %v4749_v7  ;;  %v4783_v9 = vmax.f32 %v4587_v34, 0.0  ;;  %v4554_v58 = vadd.f32 %v8884_v8, %v4351_v56  ;;  %v3959_v24 = vadd.f32 %v8974_v52, %v3141_v60 }
 0x31f   : > { %v6697_v28 = vpack.c.bf16 %v4785_v55, %v4785_v55  ;;  %v4590_v1 = vadd.f32 %v8884_v8, %v4387_v50  ;;  %v4385_v5 = vmul.f32 %v8870_v20, %v4090_v22  ;;  %v4111_v49 = vadd.f32 %v7004_v47, %v9515_v15  ;;  %v3143_v21 = vpop.f32.mrf.mxu0  ;;  %v4102_v32 = vpop.f32.mrf.mxu1 }
 0x320   : > { %5730 = vst.msk [vmem:[%s8143_s21 + $0x208] sm:$0xf] %vm5599_vm2, %v6661_v2  ;;  %v6695_v59 = vpack.c.bf16 %v4783_v9, %v4783_v9  ;;  %v4750_v42 = vmax.f32 %v4554_v58, 0.0  ;;  %v4352_v46 = vmul.f32 %v8870_v20, %v3959_v24  ;;  %v4103_v3 = vadd.f32 %v4102_v32, %v9516_v0  ;;  %v9519_v9 = vld [vmem:[#allocation28_spill] sm:$0xff] }
 0x321   : > { %5766 = vst.msk [vmem:[%s8143_s21 + $0x298] sm:$0xf] %vm5599_vm2, %v6697_v28  ;;  %v4786_v52 = vmax.f32 %v4590_v1, 0.0  ;;  %v4588_v35 = vadd.f32 %v8884_v8, %v4385_v5  ;;  %v4390_v4 = vmul.f32 %v8870_v20, %v4111_v49  ;;  %v3144_v37 = vpop.f32.mrf.mxu0  ;;  %v7005_v17 = vpop.f32.mrf.mxu1  ;;  %v9520_v49 = vld [vmem:[#allocation26_spill] sm:$0xff] }
 0x322   : > { %5764 = vst.msk [vmem:[%s8143_s21 + $0x290] sm:$0xf] %vm5599_vm2, %v6695_v59  ;;  %v6662_v16 = vpack.c.bf16 %v4750_v42, %v4750_v42  ;;  %v4555_v25 = vadd.f32 %v8884_v8, %v4352_v46  ;;  %v4388_v61 = vmul.f32 %v8870_v20, %v4103_v3  ;;  %v3962_v6 = vadd.f32 %v8983_v44, %v3144_v37 }
 0x323   : > { %v6698_v13 = vpack.c.bf16 %v4786_v52, %v4786_v52  ;;  %v4784_v53 = vmax.f32 %v4588_v35, 0.0  ;;  %v4593_v10 = vadd.f32 %v8884_v8, %v4390_v4  ;;  %v4114_v18 = vadd.f32 %v7005_v17, %v9517_v36  ;;  %v3146_v51 = vpop.f32.mrf.mxu0  ;;  %v4105_v48 = vpop.f32.mrf.mxu1  ;;  %v9522_v36 = vld [vmem:[#allocation27_spill] sm:$0xff] }
 0x324   : > { %5731 = vst.msk [vmem:[%s8143_s21 + $0x20c] sm:$0xf] %vm5599_vm2, %v6662_v16  ;;  %v4751_v29 = vmax.f32 %v4555_v25, 0.0  ;;  %v4591_v27 = vadd.f32 %v8884_v8, %v4388_v61  ;;  %v4353_v63 = vmul.f32 %v8870_v20, %v3962_v6  ;;  %v4106_v31 = vadd.f32 %v4105_v48, %v9518_v33  ;;  %v9521_v16 = vld [vmem:[#allocation29_spill] sm:$0xff] }
 0x325   : > { %5767 = vst.msk [vmem:[%s8143_s21 + $0x29c] sm:$0xf] %vm5599_vm2, %v6698_v13  ;;  %v6696_v44 = vpack.c.bf16 %v4784_v53, %v4784_v53  ;;  %v4789_v39 = vmax.f32 %v4593_v10, 0.0  ;;  %v4391_v7 = vmul.f32 %v8870_v20, %v4114_v18  ;;  %v3149_v34 = vpop.f32.mrf.mxu0  ;;  %v7008_v56 = vpop.f32.mrf.mxu1 }
 0x326   : > { %v6663_v55 = vpack.c.bf16 %v4751_v29, %v4751_v29  ;;  %v4787_v50 = vmax.f32 %v4591_v27, 0.0  ;;  %v4556_v11 = vadd.f32 %v8884_v8, %v4353_v63  ;;  %v4389_v22 = vmul.f32 %v8870_v20, %v4106_v31 }
 0x327   : > { %5765 = vst.msk [vmem:[%s8143_s21 + $0x294] sm:$0xf] %vm5599_vm2, %v6696_v44  ;;  %v6701_v60 = vpack.c.bf16 %v4789_v39, %v4789_v39  ;;  %v4594_v47 = vadd.f32 %v8884_v8, %v4391_v7  ;;  %v3967_v2 = vadd.f32 %v8970_v38, %v3149_v34  ;;  %v4127_v58 = vadd.f32 %v7008_v56, %v9519_v9  ;;  %v3151_v24 = vpop.f32.mrf.mxu0  ;;  %v4118_v28 = vpop.f32.mrf.mxu1  ;;  %v9523_v56 = vld [vmem:[#allocation32_spill] sm:$0xff] }
 0x328   : > { %5732 = vst.msk [vmem:[%s8143_s21 + $0x210] sm:$0xf] %vm5599_vm2, %v6663_v55  ;;  %v6699_v1 = vpack.c.bf16 %v4787_v50, %v4787_v50  ;;  %v4752_v5 = vmax.f32 %v4556_v11, 0.0  ;;  %v4592_v15 = vadd.f32 %v8884_v8, %v4389_v22  ;;  %v4119_v21 = vadd.f32 %v4118_v28, %v9520_v49 }
 0x329   : > { %5770 = vst.msk [vmem:[%s8143_s21 + $0x2a8] sm:$0xf] %vm5599_vm2, %v6701_v60  ;;  %v4790_v32 = vmax.f32 %v4594_v47, 0.0  ;;  %v4354_v59 = vmul.f32 %v8870_v20, %v3967_v2  ;;  %v4394_v38 = vmul.f32 %v8870_v20, %v4127_v58  ;;  %v3152_v42 = vpop.f32.mrf.mxu0  ;;  %v7009_v46 = vpop.f32.mrf.mxu1  ;;  %v9524_v58 = vld [vmem:[#allocation30_spill] sm:$0xff] }
 0x32a   : > { %5768 = vst.msk [vmem:[%s8143_s21 + $0x2a0] sm:$0xf] %vm5599_vm2, %v6699_v1  ;;  %v6664_v0 = vpack.c.bf16 %v4752_v5, %v4752_v5  ;;  %v4788_v3 = vmax.f32 %v4592_v15, 0.0  ;;  %v4392_v52 = vmul.f32 %v8870_v20, %v4119_v21  ;;  %v3970_v35 = vadd.f32 %v8979_v54, %v3152_v42  ;;  %v9525_v42 = vld [vmem:[#allocation33_spill] sm:$0xff] }
 0x32b   : > { %v6702_v4 = vpack.c.bf16 %v4790_v32, %v4790_v32  ;;  %v4557_v37 = vadd.f32 %v8884_v8, %v4354_v59  ;;  %v4597_v17 = vadd.f32 %v8884_v8, %v4394_v38  ;;  %v4130_v25 = vadd.f32 %v7009_v46, %v9521_v16  ;;  %v3154_v61 = vpop.f32.mrf.mxu0  ;;  %v4121_v6 = vpop.f32.mrf.mxu1 }
 0x32c   : > { %5733 = vst.msk [vmem:[%s8143_s21 + $0x214] sm:$0xf] %vm5599_vm2, %v6664_v0  ;;  %v6700_v13 = vpack.c.bf16 %v4788_v3, %v4788_v3  ;;  %v4595_v53 = vadd.f32 %v8884_v8, %v4392_v52  ;;  %v4355_v10 = vmul.f32 %v8870_v20, %v3970_v35  ;;  %v4122_v18 = vadd.f32 %v4121_v6, %v9522_v36 }
 0x32d   : > { %5771 = vst.msk [vmem:[%s8143_s21 + $0x2ac] sm:$0xf] %vm5599_vm2, %v6702_v4  ;;  %v4753_v54 = vmax.f32 %v4557_v37, 0.0  ;;  %v4793_v51 = vmax.f32 %v4597_v17, 0.0  ;;  %v4395_v48 = vmul.f32 %v8870_v20, %v4130_v25  ;;  %v3157_v29 = vpop.f32.mrf.mxu0  ;;  %v7012_v27 = vpop.f32.mrf.mxu1  ;;  %v9526_v4 = vld [vmem:[#allocation31_spill] sm:$0xff] }
 0x32e   : > { %5769 = vst.msk [vmem:[%s8143_s21 + $0x2a4] sm:$0xf] %vm5599_vm2, %v6700_v13  ;;  %v4791_v63 = vmax.f32 %v4595_v53, 0.0  ;;  %v4558_v33 = vadd.f32 %v8884_v8, %v4355_v10  ;;  %v4393_v31 = vmul.f32 %v8870_v20, %v4122_v18  ;;  %v3975_v44 = vadd.f32 %v8992_v26, %v3157_v29  ;;  %v9275_v17 = vld [vmem:[%s9439_s3] ss:$0 sm:$0xff] }
 0x32f   : > { %v6665_v39 = vpack.c.bf16 %v4753_v54, %v4753_v54  ;;  %v6705_v7 = vpack.c.bf16 %v4793_v51, %v4793_v51  ;;  %v4598_v34 = vadd.f32 %v8884_v8, %v4395_v48  ;;  %v4143_v55 = vadd.f32 %v7012_v27, %v9523_v56  ;;  %v3159_v50 = vpop.f32.mrf.mxu0  ;;  %v4134_v11 = vpop.f32.mrf.mxu1  ;;  %v9527_v48 = vld [vmem:[#allocation36_spill] sm:$0xff] }
 0x330   : > { %v6703_v22 = vpack.c.bf16 %v4791_v63, %v4791_v63  ;;  %v4754_v60 = vmax.f32 %v4558_v33, 0.0  ;;  %v4596_v47 = vadd.f32 %v8884_v8, %v4393_v31  ;;  %v4356_v2 = vmul.f32 %v8870_v20, %v3975_v44 }
 0x331   : > { %5734 = vst.msk [vmem:[%s8143_s21 + $0x218] sm:$0xf] %vm5599_vm2, %v6665_v39  ;;  %5774 = vst.msk [vmem:[%s8143_s21 + $0x2b8] sm:$0xf] %vm5599_vm2, %v6705_v7  ;;  %v4794_v26 = vmax.f32 %v4598_v34, 0.0  ;;  %v4398_v9 = vmul.f32 %v8870_v20, %v4143_v55  ;;  %v4135_v24 = vadd.f32 %v4134_v11, %v9524_v58  ;;  %v3160_v28 = vpop.f32.mrf.mxu0  ;;  %v7013_v1 = vpop.f32.mrf.mxu1  ;;  %v9528_v39 = vld [vmem:[#allocation34_spill] sm:$0xff] }
 0x332   : > { %5772 = vst.msk [vmem:[%s8143_s21 + $0x2b0] sm:$0xf] %vm5599_vm2, %v6703_v22  ;;  %v6666_v5 = vpack.c.bf16 %v4754_v60, %v4754_v60  ;;  %v4792_v15 = vmax.f32 %v4596_v47, 0.0  ;;  %v4559_v49 = vadd.f32 %v8884_v8, %v4356_v2  ;;  %v3978_v21 = vadd.f32 %v9001_v62, %v3160_v28  ;;  %v9262_v20 = vld [vmem:[%s9438_s2] ss:$0 sm:$0xff]  ;;  %v9529_v58 = vld [vmem:[#allocation37_spill] sm:$0xff] }
 0x333   : > { %v6706_v32 = vpack.c.bf16 %v4794_v26, %v4794_v26  ;;  %v4601_v59 = vadd.f32 %v8884_v8, %v4398_v9  ;;  %v4396_v38 = vmul.f32 %v9262_v20, %v4135_v24  ;;  %v4146_v46 = vadd.f32 %v7013_v1, %v9525_v42  ;;  %v3162_v0 = vpop.f32.mrf.mxu0  ;;  %v4137_v3 = vpop.f32.mrf.mxu1 }
 0x334   : > { %5735 = vst.msk [vmem:[%s8143_s21 + $0x21c] sm:$0xf] %vm5599_vm2, %v6666_v5  ;;  %v6704_v52 = vpack.c.bf16 %v4792_v15, %v4792_v15  ;;  %v4755_v35 = vmax.f32 %v4559_v49, 0.0  ;;  %v4357_v62 = vmul.f32 %v9262_v20, %v3978_v21  ;;  %v4138_v8 = vadd.f32 %v4137_v3, %v9526_v4  ;;  %v9530_v21 = vld [vmem:[#allocation35_spill] sm:$0xff] }
 0x335   : > { %5775 = vst.msk [vmem:[%s8143_s21 + $0x2bc] sm:$0xf] %vm5599_vm2, %v6706_v32  ;;  %v4797_v37 = vmax.f32 %v4601_v59, 0.0  ;;  %v4599_v16 = vadd.f32 %v9275_v17, %v4396_v38  ;;  %v4399_v25 = vmul.f32 %v9262_v20, %v4146_v46  ;;  %v3165_v61 = vpop.f32.mrf.mxu0  ;;  %v7016_v6 = vpop.f32.mrf.mxu1 }
 0x336   : > { %5773 = vst.msk [vmem:[%s8143_s21 + $0x2b4] sm:$0xf] %vm5599_vm2, %v6704_v52  ;;  %v6667_v13 = vpack.c.bf16 %v4755_v35, %v4755_v35  ;;  %v4560_v53 = vadd.f32 %v9275_v17, %v4357_v62  ;;  %v4397_v10 = vmul.f32 %v9262_v20, %v4138_v8  ;;  %v3983_v36 = vadd.f32 %v8988_v57, %v3165_v61 }
 0x337   : > { %v6709_v18 = vpack.c.bf16 %v4797_v37, %v4797_v37  ;;  %v4795_v54 = vmax.f32 %v4599_v16, 0.0  ;;  %v4602_v51 = vadd.f32 %v9275_v17, %v4399_v25  ;;  %v4159_v29 = vadd.f32 %v7016_v6, %v9527_v48  ;;  %v3167_v27 = vpop.f32.mrf.mxu0  ;;  %v4150_v63 = vpop.f32.mrf.mxu1  ;;  %v9531_v37 = vld [vmem:[#allocation40_spill] sm:$0xff] }
 0x338   : > { %5736 = vst.msk [vmem:[%s8143_s21 + $0x220] sm:$0xf] %vm5599_vm2, %v6667_v13  ;;  %v4756_v33 = vmax.f32 %v4560_v53, 0.0  ;;  %v4600_v31 = vadd.f32 %v9275_v17, %v4397_v10  ;;  %v4358_v44 = vmul.f32 %v9262_v20, %v3983_v36  ;;  %v4151_v7 = vadd.f32 %v4150_v63, %v9528_v39  ;;  %v9532_v10 = vld [vmem:[#allocation38_spill] sm:$0xff] }
 0x339   : > { %5778 = vst.msk [vmem:[%s8143_s21 + $0x2c8] sm:$0xf] %vm5599_vm2, %v6709_v18  ;;  %v6707_v57 = vpack.c.bf16 %v4795_v54, %v4795_v54  ;;  %v4798_v34 = vmax.f32 %v4602_v51, 0.0  ;;  %v4402_v56 = vmul.f32 %v9262_v20, %v4159_v29  ;;  %v3168_v55 = vpop.f32.mrf.mxu0  ;;  %v7017_v50 = vpop.f32.mrf.mxu1 }
 0x33a   : > { %v6668_v11 = vpack.c.bf16 %v4756_v33, %v4756_v33  ;;  %v4796_v22 = vmax.f32 %v4600_v31, 0.0  ;;  %v4561_v60 = vadd.f32 %v9275_v17, %v4358_v44  ;;  %v4400_v47 = vmul.f32 %v9262_v20, %v4151_v7  ;;  %v9533_v7 = vld [vmem:[#allocation41_spill] sm:$0xff] }
 0x33b   : > { %5776 = vst.msk [vmem:[%s8143_s21 + $0x2c0] sm:$0xf] %vm5599_vm2, %v6707_v57  ;;  %v6710_v2 = vpack.c.bf16 %v4798_v34, %v4798_v34  ;;  %v4605_v26 = vadd.f32 %v9275_v17, %v4402_v56  ;;  %v3986_v9 = vadd.f32 %v8997_v12, %v3168_v55  ;;  %v4162_v24 = vadd.f32 %v7017_v50, %v9529_v58  ;;  %v3170_v28 = vpop.f32.mrf.mxu0  ;;  %v4153_v1 = vpop.f32.mrf.mxu1 }
 0x33c   : > { %5737 = vst.msk [vmem:[%s8143_s21 + $0x224] sm:$0xf] %vm5599_vm2, %v6668_v11  ;;  %v6708_v5 = vpack.c.bf16 %v4796_v22, %v4796_v22  ;;  %v4757_v15 = vmax.f32 %v4561_v60, 0.0  ;;  %v4603_v49 = vadd.f32 %v9275_v17, %v4400_v47  ;;  %v4154_v32 = vadd.f32 %v4153_v1, %v9530_v21  ;;  %v9534_v47 = vld [vmem:[#allocation39_spill] sm:$0xff]  ;;  %v9535_v21 = vld [vmem:[#allocation44_spill] sm:$0xff] }
 0x33d   : > { %5779 = vst.msk [vmem:[%s8143_s21 + $0x2cc] sm:$0xf] %vm5599_vm2, %v6710_v2  ;;  %v4801_v59 = vmax.f32 %v4605_v26, 0.0  ;;  %v4359_v38 = vmul.f32 %v9262_v20, %v3986_v9  ;;  %v4403_v12 = vmul.f32 %v9262_v20, %v4162_v24  ;;  %v3173_v42 = vpop.f32.mrf.mxu0  ;;  %v7020_v46 = vpop.f32.mrf.mxu1 }
 0x33e   : > { %5777 = vst.msk [vmem:[%s8143_s21 + $0x2c4] sm:$0xf] %vm5599_vm2, %v6708_v5  ;;  %v6669_v0 = vpack.c.bf16 %v4757_v15, %v4757_v15  ;;  %v4799_v3 = vmax.f32 %v4603_v49, 0.0  ;;  %v4401_v52 = vmul.f32 %v9262_v20, %v4154_v32  ;;  %v3991_v35 = vadd.f32 %v9010_v14, %v3173_v42 }
 0x33f   : > { %v6713_v62 = vpack.c.bf16 %v4801_v59, %v4801_v59  ;;  %v4562_v4 = vadd.f32 %v9275_v17, %v4359_v38  ;;  %v4606_v8 = vadd.f32 %v9275_v17, %v4403_v12  ;;  %v4175_v16 = vadd.f32 %v7020_v46, %v9531_v37  ;;  %v3175_v25 = vpop.f32.mrf.mxu0  ;;  %v4166_v61 = vpop.f32.mrf.mxu1 }
 0x340   : > { %5738 = vst.msk [vmem:[%s8143_s21 + $0x228] sm:$0xf] %vm5599_vm2, %v6669_v0  ;;  %v6711_v6 = vpack.c.bf16 %v4799_v3, %v4799_v3  ;;  %v4604_v13 = vadd.f32 %v9275_v17, %v4401_v52  ;;  %v4360_v53 = vmul.f32 %v9262_v20, %v3991_v35  ;;  %v4167_v36 = vadd.f32 %v4166_v61, %v9532_v10  ;;  %v9536_v0 = vld [vmem:[#allocation42_spill] sm:$0xff] }
 0x341   : > { %5782 = vst.msk [vmem:[%s8143_s21 + $0x2d8] sm:$0xf] %vm5599_vm2, %v6713_v62  ;;  %v4758_v14 = vmax.f32 %v4562_v4, 0.0  ;;  %v4802_v18 = vmax.f32 %v4606_v8, 0.0  ;;  %v4406_v54 = vmul.f32 %v9262_v20, %v4175_v16  ;;  %v3176_v51 = vpop.f32.mrf.mxu0  ;;  %v7021_v48 = vpop.f32.mrf.mxu1 }
 0x342   : > { %5780 = vst.msk [vmem:[%s8143_s21 + $0x2d0] sm:$0xf] %vm5599_vm2, %v6711_v6  ;;  %v4800_v29 = vmax.f32 %v4604_v13, 0.0  ;;  %v4563_v27 = vadd.f32 %v9275_v17, %v4360_v53  ;;  %v4404_v63 = vmul.f32 %v9262_v20, %v4167_v36  ;;  %v3994_v33 = vadd.f32 %v9019_v23, %v3176_v51  ;;  %v9537_v53 = vld [vmem:[#allocation45_spill] sm:$0xff] }
 0x343   : > { %v6670_v31 = vpack.c.bf16 %v4758_v14, %v4758_v14  ;;  %v6714_v44 = vpack.c.bf16 %v4802_v18, %v4802_v18  ;;  %v4609_v39 = vadd.f32 %v9275_v17, %v4406_v54  ;;  %v4178_v57 = vadd.f32 %v7021_v48, %v9533_v7  ;;  %v3178_v34 = vpop.f32.mrf.mxu0  ;;  %v4169_v56 = vpop.f32.mrf.mxu1  ;;  %v9538_v48 = vld [vmem:[#allocation43_spill] sm:$0xff] }
 0x344   : > { %v6712_v55 = vpack.c.bf16 %v4800_v29, %v4800_v29  ;;  %v4759_v50 = vmax.f32 %v4563_v27, 0.0  ;;  %v4607_v11 = vadd.f32 %v9275_v17, %v4404_v63  ;;  %v4361_v22 = vmul.f32 %v9262_v20, %v3994_v33 }
 0x345   : > { %5739 = vst.msk [vmem:[%s8143_s21 + $0x22c] sm:$0xf] %vm5599_vm2, %v6670_v31  ;;  %5783 = vst.msk [vmem:[%s8143_s21 + $0x2dc] sm:$0xf] %vm5599_vm2, %v6714_v44  ;;  %v4805_v23 = vmax.f32 %v4609_v39, 0.0  ;;  %v4407_v60 = vmul.f32 %v9262_v20, %v4178_v57  ;;  %v4170_v2 = vadd.f32 %v4169_v56, %v9534_v47  ;;  %v3181_v26 = vpop.f32.mrf.mxu0  ;;  %v7024_v9 = vpop.f32.mrf.mxu1 }
 0x346   : > { %5781 = vst.msk [vmem:[%s8143_s21 + $0x2d4] sm:$0xf] %vm5599_vm2, %v6712_v55  ;;  %v6671_v58 = vpack.c.bf16 %v4759_v50, %v4759_v50  ;;  %v4803_v24 = vmax.f32 %v4607_v11, 0.0  ;;  %v4564_v28 = vadd.f32 %v9275_v17, %v4361_v22  ;;  %v3999_v1 = vadd.f32 %v9006_v19, %v3181_v26  ;;  %v9539_v50 = vld [vmem:[#allocation49_spill] sm:$0xff]  ;;  %v9540_v26 = vld [vmem:[#allocation46_spill] sm:$0xff] }
 0x347   : > { %v6717_v5 = vpack.c.bf16 %v4805_v23, %v4805_v23  ;;  %v4610_v15 = vadd.f32 %v9275_v17, %v4407_v60  ;;  %v4405_v49 = vmul.f32 %v9262_v20, %v4170_v2  ;;  %v4191_v32 = vadd.f32 %v7024_v9, %v9535_v21  ;;  %v3183_v59 = vpop.f32.mrf.mxu0  ;;  %v4182_v38 = vpop.f32.mrf.mxu1 }
 0x348   : > { %5740 = vst.msk [vmem:[%s8143_s21 + $0x230] sm:$0xf] %vm5599_vm2, %v6671_v58  ;;  %v6715_v12 = vpack.c.bf16 %v4803_v24, %v4803_v24  ;;  %v4760_v42 = vmax.f32 %v4564_v28, 0.0  ;;  %v4362_v46 = vmul.f32 %v9262_v20, %v3999_v1  ;;  %v4183_v3 = vadd.f32 %v4182_v38, %v9536_v0 }
 0x349   : > { %5786 = vst.msk [vmem:[%s8143_s21 + $0x2e8] sm:$0xf] %vm5599_vm2, %v6717_v5  ;;  %v4806_v19 = vmax.f32 %v4610_v15, 0.0  ;;  %v4608_v52 = vadd.f32 %v9275_v17, %v4405_v49  ;;  %v4410_v35 = vmul.f32 %v9262_v20, %v4191_v32  ;;  %v3184_v62 = vpop.f32.mrf.mxu0  ;;  %v7025_v4 = vpop.f32.mrf.mxu1 }
 0x34a   : > { %5784 = vst.msk [vmem:[%s8143_s21 + $0x2e0] sm:$0xf] %vm5599_vm2, %v6715_v12  ;;  %v6672_v8 = vpack.c.bf16 %v4760_v42, %v4760_v42  ;;  %v4565_v37 = vadd.f32 %v9275_v17, %v4362_v46  ;;  %v4408_v16 = vmul.f32 %v9262_v20, %v4183_v3  ;;  %v4002_v25 = vadd.f32 %v9015_v45, %v3184_v62  ;;  %v9541_v12 = vld [vmem:[#allocation50_spill] sm:$0xff] }
 0x34b   : > { %v6718_v61 = vpack.c.bf16 %v4806_v19, %v4806_v19  ;;  %v4804_v6 = vmax.f32 %v4608_v52, 0.0  ;;  %v4613_v13 = vadd.f32 %v9275_v17, %v4410_v35  ;;  %v4194_v10 = vadd.f32 %v7025_v4, %v9537_v53  ;;  %v3186_v36 = vpop.f32.mrf.mxu0  ;;  %v4185_v14 = vpop.f32.mrf.mxu1  ;;  %v9542_v35 = vld [vmem:[#allocation48_spill] sm:$0xff] }
 0x34c   : > { %5741 = vst.msk [vmem:[%s8143_s21 + $0x234] sm:$0xf] %vm5599_vm2, %v6672_v8  ;;  %v4761_v18 = vmax.f32 %v4565_v37, 0.0  ;;  %v4611_v54 = vadd.f32 %v9275_v17, %v4408_v16  ;;  %v4363_v51 = vmul.f32 %v9262_v20, %v4002_v25  ;;  %v4186_v29 = vadd.f32 %v4185_v14, %v9538_v48 }
 0x34d   : > { %5787 = vst.msk [vmem:[%s8143_s21 + $0x2ec] sm:$0xf] %vm5599_vm2, %v6718_v61  ;;  %v6716_v45 = vpack.c.bf16 %v4804_v6, %v4804_v6  ;;  %v4809_v27 = vmax.f32 %v4613_v13, 0.0  ;;  %v4411_v63 = vmul.f32 %v9262_v20, %v4194_v10  ;;  %v3189_v33 = vpop.f32.mrf.mxu0  ;;  %v7028_v31 = vpop.f32.mrf.mxu1 }
 0x34e   : > { %v6673_v44 = vpack.c.bf16 %v4761_v18, %v4761_v18  ;;  %v4807_v39 = vmax.f32 %v4611_v54, 0.0  ;;  %v4566_v7 = vadd.f32 %v9275_v17, %v4363_v51  ;;  %v4409_v57 = vmul.f32 %v9262_v20, %v4186_v29 }
 0x34f   : > { %5785 = vst.msk [vmem:[%s8143_s21 + $0x2e4] sm:$0xf] %vm5599_vm2, %v6716_v45  ;;  %v6721_v34 = vpack.c.bf16 %v4809_v27, %v4809_v27  ;;  %v4614_v56 = vadd.f32 %v9275_v17, %v4411_v63  ;;  %v4007_v55 = vadd.f32 %v9028_v40, %v3189_v33  ;;  %v4207_v11 = vadd.f32 %v7028_v31, %v9539_v50  ;;  %v3191_v22 = vpop.f32.mrf.mxu0  ;;  %v4198_v23 = vpop.f32.mrf.mxu1 }
 0x350   : > { %5742 = vst.msk [vmem:[%s8143_s21 + $0x238] sm:$0xf] %vm5599_vm2, %v6673_v44  ;;  %v6719_v60 = vpack.c.bf16 %v4807_v39, %v4807_v39  ;;  %v4762_v47 = vmax.f32 %v4566_v7, 0.0  ;;  %v4612_v2 = vadd.f32 %v9275_v17, %v4409_v57  ;;  %v4199_v9 = vadd.f32 %v4198_v23, %v9540_v26 }
 0x351   : > { %5790 = vst.msk [vmem:[%s8143_s21 + $0x2f8] sm:$0xf] %vm5599_vm2, %v6721_v34  ;;  %v4810_v58 = vmax.f32 %v4614_v56, 0.0  ;;  %v4364_v24 = vmul.f32 %v9262_v20, %v4007_v55  ;;  %v4414_v40 = vmul.f32 %v9262_v20, %v4207_v11  ;;  %v3192_v28 = vpop.f32.mrf.mxu0  ;;  %v7029_v1 = vpop.f32.mrf.mxu1 }
 0x352   : > { %5788 = vst.msk [vmem:[%s8143_s21 + $0x2f0] sm:$0xf] %vm5599_vm2, %v6719_v60  ;;  %v6674_v5 = vpack.c.bf16 %v4762_v47, %v4762_v47  ;;  %v4808_v15 = vmax.f32 %v4612_v2, 0.0  ;;  %v4412_v49 = vmul.f32 %v9262_v20, %v4199_v9  ;;  %v4010_v21 = vadd.f32 %v9037_v30, %v3192_v28 }
 0x353   : > { %v6722_v32 = vpack.c.bf16 %v4810_v58, %v4810_v58  ;;  %v4567_v59 = vadd.f32 %v9275_v17, %v4364_v24  ;;  %v4617_v38 = vadd.f32 %v9275_v17, %v4414_v40  ;;  %v4210_v42 = vadd.f32 %v7029_v1, %v9541_v12  ;;  %v3194_v46 = vpop.f32.mrf.mxu0  ;;  %v4201_v0 = vpop.f32.mrf.mxu1 }
 0x354   : > { %5743 = vst.msk [vmem:[%s8143_s21 + $0x23c] sm:$0xf] %vm5599_vm2, %v6674_v5  ;;  %v6720_v3 = vpack.c.bf16 %v4808_v15, %v4808_v15  ;;  %v4615_v19 = vadd.f32 %v9275_v17, %v4412_v49  ;;  %v4365_v52 = vmul.f32 %v9262_v20, %v4010_v21  ;;  %v4202_v62 = vadd.f32 %v4201_v0, %v9542_v35 }
 0x355   : > { %5791 = vst.msk [vmem:[%s8143_s21 + $0x2fc] sm:$0xf] %vm5599_vm2, %v6722_v32  ;;  %v4763_v30 = vmax.f32 %v4567_v59, 0.0  ;;  %v4813_v4 = vmax.f32 %v4617_v38, 0.0  ;;  %v4415_v8 = vmul.f32 %v9262_v20, %v4210_v42  ;;  %v3197_v37 = vpop.f32.mrf.mxu0 }
 0x356   : > { %5789 = vst.msk [vmem:[%s8143_s21 + $0x2f4] sm:$0xf] %vm5599_vm2, %v6720_v3  ;;  %v4811_v16 = vmax.f32 %v4615_v19, 0.0  ;;  %v4568_v25 = vadd.f32 %v9275_v17, %v4365_v52  ;;  %v4413_v61 = vmul.f32 %v9262_v20, %v4202_v62  ;;  %v4015_v6 = vadd.f32 %v9024_v43, %v3197_v37 }
 0x357   : > { %v6675_v13 = vpack.c.bf16 %v4763_v30, %v4763_v30  ;;  %v6725_v53 = vpack.c.bf16 %v4813_v4, %v4813_v4  ;;  %v4618_v10 = vadd.f32 %v9275_v17, %v4415_v8  ;;  %v3199_v36 = vpop.f32.mrf.mxu0 }
 0x358   : > { %v6723_v14 = vpack.c.bf16 %v4811_v16, %v4811_v16  ;;  %v4764_v18 = vmax.f32 %v4568_v25, 0.0  ;;  %v4616_v54 = vadd.f32 %v9275_v17, %v4413_v61  ;;  %v4366_v51 = vmul.f32 %v9262_v20, %v4015_v6 }
 0x359   : > { %5744 = vst.msk [vmem:[%s8143_s21 + $0x240] sm:$0xf] %vm5599_vm2, %v6675_v13  ;;  %5794 = vst.msk [vmem:[%s8143_s21 + $0x308] sm:$0xf] %vm5599_vm2, %v6725_v53  ;;  %v4814_v48 = vmax.f32 %v4618_v10, 0.0  ;;  %v3200_v43 = vpop.f32.mrf.mxu0 }
 0x35a   : > { %5792 = vst.msk [vmem:[%s8143_s21 + $0x300] sm:$0xf] %vm5599_vm2, %v6723_v14  ;;  %v6676_v29 = vpack.c.bf16 %v4764_v18, %v4764_v18  ;;  %v4812_v45 = vmax.f32 %v4616_v54, 0.0  ;;  %v4569_v27 = vadd.f32 %v9275_v17, %v4366_v51  ;;  %v4018_v63 = vadd.f32 %v9033_v41, %v3200_v43 }
 0x35b   : > { %v6726_v33 = vpack.c.bf16 %v4814_v48, %v4814_v48  ;;  %v3202_v31 = vpop.f32.mrf.mxu0 }
 0x35c   : > { %5745 = vst.msk [vmem:[%s8143_s21 + $0x244] sm:$0xf] %vm5599_vm2, %v6676_v29  ;;  %v6724_v44 = vpack.c.bf16 %v4812_v45, %v4812_v45  ;;  %v4765_v39 = vmax.f32 %v4569_v27, 0.0  ;;  %v4367_v7 = vmul.f32 %v9262_v20, %v4018_v63 }
 0x35d   : > { %5795 = vst.msk [vmem:[%s8143_s21 + $0x30c] sm:$0xf] %vm5599_vm2, %v6726_v33 }
 0x35e   : > { %5793 = vst.msk [vmem:[%s8143_s21 + $0x304] sm:$0xf] %vm5599_vm2, %v6724_v44  ;;  %v6677_v57 = vpack.c.bf16 %v4765_v39, %v4765_v39  ;;  %v4570_v34 = vadd.f32 %v9275_v17, %v4367_v7 }
 0x360   : > { %5746 = vst.msk [vmem:[%s8143_s21 + $0x248] sm:$0xf] %vm5599_vm2, %v6677_v57  ;;  %v4766_v56 = vmax.f32 %v4570_v34, 0.0 }
 0x362   : > { %v6678_v55 = vpack.c.bf16 %v4766_v56, %v4766_v56 }
 0x364   : > { %5747 = vst.msk [vmem:[%s8143_s21 + $0x24c] sm:$0xf] %vm5599_vm2, %v6678_v55 }
 0x365 PF: > { %s14_s17 = sadd.s32 1, %s7528_s17   ;;  %s9543_s15 = smov %s7524_s16 }
 0x366   : > { %p11_p5 = scmp.ge.s32.totalorder %s14_s17, 18   ;;  %s9544_s16 = smov %s9546_s18 }
 0x368   :  { %13 = sbr.rel (!%p11_p5) target bundleno = 2 (0x2), region = 75 }

</bundles_post_ra>
